<compile_context>
chip_gen: v5e
topology: v5e:2x2
jax: 0.10.0
libtpu: 0.0.40
codegen_flags: <defaults>
</compile_context>

<pallas_src>
import functools

import numpy as np
import jax
import jax.numpy as jnp
from jax.experimental import pallas as pl
from jax.experimental.pallas import tpu as pltpu


# ----------------------------------------------------------------------------
# Fused kernel: whole autoencoder for one batch block, VMEM-resident.
# ----------------------------------------------------------------------------
def _fused_ae_kernel(*refs, relus):
    # refs = [x_ref, (S, W_blockdiag, bias) * 6, o_ref]
    x_ref = refs[0]
    o_ref = refs[-1]
    layer_refs = refs[1:-1]

    h = x_ref[...]                                   # (L_in, B*C_in_pad) bf16
    for li, relu in enumerate(relus):
        s_ref, w_ref, b_ref = layer_refs[3 * li:3 * li + 3]
        k_taps = s_ref.shape[0]

        acc = None
        for k in range(k_taps):
            # gather matmul: row o of S_k selects the input time step feeding
            # tap k at output position o (all-zero row => padding / hole).
            g = jnp.dot(s_ref[k], h, preferred_element_type=jnp.float32)
            g = g.astype(jnp.bfloat16)               # exact: S is 0/1, h bf16
            # per-tap weight matmul (block-diagonal over the batch block),
            # f32 accumulation across taps.
            part = jnp.dot(g, w_ref[k], preferred_element_type=jnp.float32)
            acc = part if acc is None else acc + part

        y = acc + b_ref[...]                         # (1, W_out) broadcasts, f32
        if relu:
            y = jnp.maximum(y, 0.0)                  # f32 elementwise (v5e-safe)
        h = y.astype(jnp.bfloat16)                   # next layer operand

    o_ref[...] = h                                   # lane-dense bf16 store


# ----------------------------------------------------------------------------
# Plan construction (one-time, host side): selection matrices + block-diag W
# ----------------------------------------------------------------------------
_LAYER_CFG = (
    dict(kind="conv",  w="enc1_w", b="enc1_b", K=7, stride=2, pad=3, relu=True),
    dict(kind="conv",  w="enc2_w", b="enc2_b", K=5, stride=2, pad=2, relu=True),
    dict(kind="conv",  w="enc3_w", b="enc3_b", K=3, stride=2, pad=1, relu=True),
    dict(kind="convT", w="dec1_w", b="dec1_b", K=3, stride=2, pad=1, opad=1, relu=True),
    dict(kind="convT", w="dec2_w", b="dec2_b", K=5, stride=2, pad=2, opad=1, relu=True),
    dict(kind="convT", w="dec3_w", b="dec3_b", K=7, stride=2, pad=3, opad=1, relu=False),
)


def _conv_selection(l_in, l_out, k_taps, stride, pad):
    # y[o] uses x[stride*o + k - pad] for tap k (zero row if out of range).
    s = np.zeros((k_taps, l_out, l_in), np.float32)
    for k in range(k_taps):
        for o in range(l_out):
            i = stride * o + k - pad
            if 0 <= i < l_in:
                s[k, o, i] = 1.0
    return s


def _convT_selection(l_in, l_out, k_taps, stride, pad):
    # Equivalent stride-1 conv (flipped kernel) over the zero-stuffed + padded
    # input; the stuffed zeros are folded into the selection matrix
    # (polyphase: taps hitting holes get an all-zero row -> no wasted work).
    pad_l = k_taps - 1 - pad
    s = np.zeros((k_taps, l_out, l_in), np.float32)
    for k in range(k_taps):
        for o in range(l_out):
            t = o + k - pad_l
            if t >= 0 and t % stride == 0 and t // stride < l_in:
                s[k, o, t // stride] = 1.0
    return s


def _pad_channels(b_blk, c):
    """Smallest c_pad >= c (multiple of 8) with b_blk*c_pad a multiple of 128."""
    c_pad = ((c + 7) // 8) * 8
    while (b_blk * c_pad) % 128:
        c_pad += 8
    return c_pad


def make_plan(params, l_in, b_blk):
    """Returns (flat tuple of [S, W_blockdiag, bias]*6, relu flags, c_in_pad)."""
    arrays, relus = [], []
    length = l_in
    n_layers = len(_LAYER_CFG)
    c_in_pad = _pad_channels(b_blk, 12)              # lane-dense input DMA

    for idx, cfg in enumerate(_LAYER_CFG):
        w = np.asarray(params[cfg["w"]], np.float32)
        b = np.asarray(params[cfg["b"]], np.float32)
        k_taps, stride, pad = cfg["K"], cfg["stride"], cfg["pad"]

        if cfg["kind"] == "conv":
            c_out, c_in, _ = w.shape
            l_out = (length + 2 * pad - k_taps) // stride + 1
            taps = [np.ascontiguousarray(w[:, :, k].T) for k in range(k_taps)]
            sel = _conv_selection(length, l_out, k_taps, stride, pad)
        else:
            c_in, c_out, _ = w.shape
            l_out = (length - 1) * stride - 2 * pad + k_taps + cfg["opad"]
            # flipped kernel: tap k uses original index K-1-k, (C_in, C_out)
            taps = [np.ascontiguousarray(w[:, :, k_taps - 1 - k]) for k in range(k_taps)]
            sel = _convT_selection(length, l_out, k_taps, stride, pad)

        cin_blk = c_in_pad if idx == 0 else c_in
        cout_blk = _pad_channels(b_blk, c_out) if idx == n_layers - 1 else c_out

        w_bd = np.zeros((k_taps, b_blk * cin_blk, b_blk * cout_blk), np.float32)
        bias = np.zeros((1, b_blk * cout_blk), np.float32)
        for e in range(b_blk):
            r0, c0 = e * cin_blk, e * cout_blk
            for k in range(k_taps):
                w_bd[k, r0:r0 + c_in, c0:c0 + c_out] = taps[k]
            bias[0, c0:c0 + c_out] = b               # padded lanes stay exactly 0

        arrays += [jnp.asarray(sel, jnp.bfloat16),   # 0/1: exact in bf16
                   jnp.asarray(w_bd, jnp.bfloat16),
                   jnp.asarray(bias, jnp.float32)]
        relus.append(bool(cfg["relu"]))
        length = l_out

    return tuple(arrays), tuple(relus), c_in_pad


# ----------------------------------------------------------------------------
# Forward wrapper: one pallas_call, grid over batch blocks ("parallel")
# ----------------------------------------------------------------------------
@functools.partial(jax.jit, static_argnames=("relus", "b_blk", "out_channels"))
def ecg_autoencoder_forward(x_ncl, plan_arrays, *, relus, b_blk, out_channels):
    n, c_in, length = x_ncl.shape
    n_pad = pl.cdiv(n, b_blk) * b_blk
    n_blk = n_pad // b_blk

    c_in_pad = plan_arrays[1].shape[1] // b_blk      # per-element padded C_in
    c_out_pad = plan_arrays[-2].shape[2] // b_blk    # per-element padded C_out
    l_final = plan_arrays[-3].shape[1]               # last layer L_out
    w_in = b_blk * c_in_pad
    w_out = b_blk * c_out_pad

    # (N, C, L) -> (n_blk, L, B*c_in_pad), bf16, zero-padded channels & batch
    x = jnp.pad(x_ncl.astype(jnp.bfloat16),
                ((0, n_pad - n), (0, c_in_pad - c_in), (0, 0)))
    x = x.reshape(n_blk, b_blk, c_in_pad, length)
    x = jnp.transpose(x, (0, 3, 1, 2)).reshape(n_blk, length, w_in)

    in_specs = [pl.BlockSpec((None, length, w_in), lambda i: (i, 0, 0))]
    for a in plan_arrays:
        # constant block index: plan arrays are not re-DMA'd between grid steps
        in_specs.append(pl.BlockSpec(a.shape, lambda i, _nd=a.ndim: (0,) * _nd))

    # advisory cost estimate for XLA scheduling of the surrounding glue
    flops = 0
    for li in range(len(relus)):
        s, w = plan_arrays[3 * li], plan_arrays[3 * li + 1]
        kk, lo, lin = s.shape
        _, win_, wout_ = w.shape
        flops += 2 * kk * lo * lin * win_ + 2 * kk * lo * win_ * wout_
    flops *= n_blk
    bytes_accessed = (x.size * x.dtype.itemsize
                      + sum(a.size * a.dtype.itemsize for a in plan_arrays)
                      + n_blk * l_final * w_out * 2)

    out = pl.pallas_call(
        functools.partial(_fused_ae_kernel, relus=relus),
        out_shape=jax.ShapeDtypeStruct((n_blk, l_final, w_out), jnp.bfloat16),
        grid=(n_blk,),
        in_specs=in_specs,
        out_specs=pl.BlockSpec((None, l_final, w_out), lambda i: (i, 0, 0)),
        compiler_params=pltpu.CompilerParams(
            dimension_semantics=("parallel",)),
        cost_estimate=pl.CostEstimate(flops=int(flops), transcendentals=0,
                                      bytes_accessed=int(bytes_accessed)),
    )(x, *plan_arrays)

    # (n_blk, L, B*c_out_pad) -> PyTorch NCL layout, drop padding, back to f32
    out = out.reshape(n_blk, l_final, b_blk, c_out_pad)
    out = jnp.transpose(out, (0, 2, 3, 1)).reshape(n_pad, c_out_pad, l_final)
    return out[:n, :out_channels, :].astype(jnp.float32)


# ----------------------------------------------------------------------------
# Parameters (PyTorch-style uniform init)
# ----------------------------------------------------------------------------
def init_params(key):
    def u(k, shape, fan_in):
        bound = 1.0 / jnp.sqrt(jnp.float32(fan_in))
        return jax.random.uniform(k, shape, jnp.float32, -bound, bound)

    keys = jax.random.split(key, 12)
    p = {}
    p["enc1_w"] = u(keys[0], (32, 12, 7), 12 * 7)
    p["enc1_b"] = u(keys[1], (32,), 12 * 7)
    p["enc2_w"] = u(keys[2], (64, 32, 5), 32 * 5)
    p["enc2_b"] = u(keys[3], (64,), 32 * 5)
    p["enc3_w"] = u(keys[4], (128, 64, 3), 64 * 3)
    p["enc3_b"] = u(keys[5], (128,), 64 * 3)
    p["dec1_w"] = u(keys[6], (128, 64, 3), 128 * 3)
    p["dec1_b"] = u(keys[7], (64,), 128 * 3)
    p["dec2_w"] = u(keys[8], (64, 32, 5), 64 * 5)
    p["dec2_b"] = u(keys[9], (32,), 64 * 5)
    p["dec3_w"] = u(keys[10], (32, 12, 7), 32 * 7)
    p["dec3_b"] = u(keys[11], (12,), 32 * 7)
    return p


# ----------------------------------------------------------------------------
# Pure-JAX reference (f32 lax convs) to validate the Pallas path
# ----------------------------------------------------------------------------
def ref_forward(x_ncl, p):
    dn = ("NCH", "OIH", "NCH")

    def conv(x, w, b, stride, pad):
        y = jax.lax.conv_general_dilated(x, w, (stride,), [(pad, pad)],
                                         dimension_numbers=dn)
        return y + b[None, :, None]

    def convT(x, w, b, stride, pad, opad):
        k = w.shape[2]
        w_c = jnp.transpose(w, (1, 0, 2))[:, :, ::-1]   # (C_out, C_in, K) flipped
        y = jax.lax.conv_general_dilated(
            x, w_c, (1,), [(k - 1 - pad, k - 1 - pad + opad)],
            lhs_dilation=(stride,), dimension_numbers=dn)
        return y + b[None, :, None]

    h = jax.nn.relu(conv(x_ncl, p["enc1_w"], p["enc1_b"], 2, 3))
    h = jax.nn.relu(conv(h, p["enc2_w"], p["enc2_b"], 2, 2))
    h = jax.nn.relu(conv(h, p["enc3_w"], p["enc3_b"], 2, 1))
    h = jax.nn.relu(convT(h, p["dec1_w"], p["dec1_b"], 2, 1, 1))
    h = jax.nn.relu(convT(h, p["dec2_w"], p["dec2_b"], 2, 2, 1))
    h = convT(h, p["dec3_w"], p["dec3_b"], 2, 3, 1)
    return h


if __name__ == "__main__":
    key = jax.random.PRNGKey(0)
    k_param, k_x = jax.random.split(key)
    params = init_params(k_param)

    # Round-trip params / input through bf16 once so the bf16 Pallas path and
    # the f32 lax reference consume identical values (only inter-layer
    # activation rounding differs -> moderate tolerance is sufficient).
    to_bf16_f32 = lambda a: a.astype(jnp.bfloat16).astype(jnp.float32)
    params = jax.tree_util.tree_map(to_bf16_f32, params)

    N, C, L = 2, 12, 64                  # (batch, ECG leads, samples)
    x = to_bf16_f32(jax.random.normal(k_x, (N, C, L), jnp.float32))

    B_BLK = 2                            # batch elements per grid step
    plan_arrays, relus, _ = make_plan(params, L, B_BLK)

    out = ecg_autoencoder_forward(x, plan_arrays, relus=relus, b_blk=B_BLK,
                                  out_channels=C)
    out = jax.block_until_ready(out)
    assert out.shape == (N, C, L), out.shape

    ref = ref_forward(x, params)
    if not bool(jnp.allclose(out, ref, atol=2.5e-2, rtol=5e-2)):
        err = float(jnp.max(jnp.abs(out - ref)))
        raise AssertionError(
            f"Pallas output does not match JAX reference (max abs err {err})")

    print("KERNEL_OK")
</pallas_src>

<mosaic_0001>
module attributes {stable_mosaic.version = 11 : i64} {
  func.func @_fused_ae_kernel(%arg0: i32, %arg1: memref<1x64x128xbf16, #tpu.memory_space<vmem>>, %arg2: memref<7x32x64xbf16, #tpu.memory_space<vmem>>, %arg3: memref<7x128x64xbf16, #tpu.memory_space<vmem>>, %arg4: memref<1x64xf32, #tpu.memory_space<vmem>>, %arg5: memref<5x16x32xbf16, #tpu.memory_space<vmem>>, %arg6: memref<5x64x128xbf16, #tpu.memory_space<vmem>>, %arg7: memref<1x128xf32, #tpu.memory_space<vmem>>, %arg8: memref<3x8x16xbf16, #tpu.memory_space<vmem>>, %arg9: memref<3x128x256xbf16, #tpu.memory_space<vmem>>, %arg10: memref<1x256xf32, #tpu.memory_space<vmem>>, %arg11: memref<3x16x8xbf16, #tpu.memory_space<vmem>>, %arg12: memref<3x256x128xbf16, #tpu.memory_space<vmem>>, %arg13: memref<1x128xf32, #tpu.memory_space<vmem>>, %arg14: memref<5x32x16xbf16, #tpu.memory_space<vmem>>, %arg15: memref<5x128x64xbf16, #tpu.memory_space<vmem>>, %arg16: memref<1x64xf32, #tpu.memory_space<vmem>>, %arg17: memref<7x64x32xbf16, #tpu.memory_space<vmem>>, %arg18: memref<7x64x128xbf16, #tpu.memory_space<vmem>>, %arg19: memref<1x128xf32, #tpu.memory_space<vmem>>, %arg20: memref<1x64x128xbf16, #tpu.memory_space<vmem>>) attributes {dimension_semantics = [#tpu.dimension_semantics<parallel>], iteration_bounds = array<i64: 1>, scalar_prefetch = 0 : i64, scratch_operands = 0 : i64, tpu.core_type = #tpu.core_type<tc>, window_params = [{transform_indices = @transform_0, window_bounds = array<i64: 1, 64, 128>}, {pipeline_mode = #tpu.pipeline_mode<synchronous>, transform_indices = @transform_1, window_bounds = array<i64: 7, 32, 64>}, {pipeline_mode = #tpu.pipeline_mode<synchronous>, transform_indices = @transform_2, window_bounds = array<i64: 7, 128, 64>}, {pipeline_mode = #tpu.pipeline_mode<synchronous>, transform_indices = @transform_3, window_bounds = array<i64: 1, 64>}, {pipeline_mode = #tpu.pipeline_mode<synchronous>, transform_indices = @transform_4, window_bounds = array<i64: 5, 16, 32>}, {pipeline_mode = #tpu.pipeline_mode<synchronous>, transform_indices = @transform_5, window_bounds = array<i64: 5, 64, 128>}, {pipeline_mode = #tpu.pipeline_mode<synchronous>, transform_indices = @transform_6, window_bounds = array<i64: 1, 128>}, {pipeline_mode = #tpu.pipeline_mode<synchronous>, transform_indices = @transform_7, window_bounds = array<i64: 3, 8, 16>}, {pipeline_mode = #tpu.pipeline_mode<synchronous>, transform_indices = @transform_8, window_bounds = array<i64: 3, 128, 256>}, {pipeline_mode = #tpu.pipeline_mode<synchronous>, transform_indices = @transform_9, window_bounds = array<i64: 1, 256>}, {pipeline_mode = #tpu.pipeline_mode<synchronous>, transform_indices = @transform_10, window_bounds = array<i64: 3, 16, 8>}, {pipeline_mode = #tpu.pipeline_mode<synchronous>, transform_indices = @transform_11, window_bounds = array<i64: 3, 256, 128>}, {pipeline_mode = #tpu.pipeline_mode<synchronous>, transform_indices = @transform_12, window_bounds = array<i64: 1, 128>}, {pipeline_mode = #tpu.pipeline_mode<synchronous>, transform_indices = @transform_13, window_bounds = array<i64: 5, 32, 16>}, {pipeline_mode = #tpu.pipeline_mode<synchronous>, transform_indices = @transform_14, window_bounds = array<i64: 5, 128, 64>}, {pipeline_mode = #tpu.pipeline_mode<synchronous>, transform_indices = @transform_15, window_bounds = array<i64: 1, 64>}, {pipeline_mode = #tpu.pipeline_mode<synchronous>, transform_indices = @transform_16, window_bounds = array<i64: 7, 64, 32>}, {pipeline_mode = #tpu.pipeline_mode<synchronous>, transform_indices = @transform_17, window_bounds = array<i64: 7, 64, 128>}, {pipeline_mode = #tpu.pipeline_mode<synchronous>, transform_indices = @transform_18, window_bounds = array<i64: 1, 128>}, {transform_indices = @transform_19, window_bounds = array<i64: 1, 64, 128>}]} {
    %c0 = arith.constant 0 : index
    %c0_0 = arith.constant 0 : index
    %c0_1 = arith.constant 0 : index
    %0 = vector.load %arg1[%c0, %c0_0, %c0_1] : memref<1x64x128xbf16, #tpu.memory_space<vmem>>, vector<1x64x128xbf16>
    %1 = vector.shape_cast %0 : vector<1x64x128xbf16> to vector<64x128xbf16>
    %c0_2 = arith.constant 0 : index
    %c0_3 = arith.constant 0 : index
    %c0_4 = arith.constant 0 : index
    %2 = vector.load %arg2[%c0_2, %c0_3, %c0_4] : memref<7x32x64xbf16, #tpu.memory_space<vmem>>, vector<1x32x64xbf16>
    %3 = vector.shape_cast %2 : vector<1x32x64xbf16> to vector<32x64xbf16>
    %cst = arith.constant dense<0.000000e+00> : vector<32x128xf32>
    %4 = tpu.matmul %3, %1, %cst {dimension_numbers = #tpu.dot_dimension_numbers<[1], [0], [0], [1], [0, 0, 1, 1], [], []>} : vector<32x64xbf16>, vector<64x128xbf16>, vector<32x128xf32> -> vector<32x128xf32>
    %5 = arith.truncf %4 : vector<32x128xf32> to vector<32x128xbf16>
    %c0_5 = arith.constant 0 : index
    %c0_6 = arith.constant 0 : index
    %c0_7 = arith.constant 0 : index
    %6 = vector.load %arg3[%c0_5, %c0_6, %c0_7] : memref<7x128x64xbf16, #tpu.memory_space<vmem>>, vector<1x128x64xbf16>
    %7 = vector.shape_cast %6 : vector<1x128x64xbf16> to vector<128x64xbf16>
    %cst_8 = arith.constant dense<0.000000e+00> : vector<32x64xf32>
    %8 = tpu.matmul %5, %7, %cst_8 {dimension_numbers = #tpu.dot_dimension_numbers<[1], [0], [0], [1], [0, 0, 1, 1], [], []>} : vector<32x128xbf16>, vector<128x64xbf16>, vector<32x64xf32> -> vector<32x64xf32>
    %c1 = arith.constant 1 : index
    %c0_9 = arith.constant 0 : index
    %c0_10 = arith.constant 0 : index
    %9 = vector.load %arg2[%c1, %c0_9, %c0_10] : memref<7x32x64xbf16, #tpu.memory_space<vmem>>, vector<1x32x64xbf16>
    %10 = vector.shape_cast %9 : vector<1x32x64xbf16> to vector<32x64xbf16>
    %cst_11 = arith.constant dense<0.000000e+00> : vector<32x128xf32>
    %11 = tpu.matmul %10, %1, %cst_11 {dimension_numbers = #tpu.dot_dimension_numbers<[1], [0], [0], [1], [0, 0, 1, 1], [], []>} : vector<32x64xbf16>, vector<64x128xbf16>, vector<32x128xf32> -> vector<32x128xf32>
    %12 = arith.truncf %11 : vector<32x128xf32> to vector<32x128xbf16>
    %c1_12 = arith.constant 1 : index
    %c0_13 = arith.constant 0 : index
    %c0_14 = arith.constant 0 : index
    %13 = vector.load %arg3[%c1_12, %c0_13, %c0_14] : memref<7x128x64xbf16, #tpu.memory_space<vmem>>, vector<1x128x64xbf16>
    %14 = vector.shape_cast %13 : vector<1x128x64xbf16> to vector<128x64xbf16>
    %cst_15 = arith.constant dense<0.000000e+00> : vector<32x64xf32>
    %15 = tpu.matmul %12, %14, %cst_15 {dimension_numbers = #tpu.dot_dimension_numbers<[1], [0], [0], [1], [0, 0, 1, 1], [], []>} : vector<32x128xbf16>, vector<128x64xbf16>, vector<32x64xf32> -> vector<32x64xf32>
    %16 = arith.addf %8, %15 : vector<32x64xf32>
    %c2 = arith.constant 2 : index
    %c0_16 = arith.constant 0 : index
    %c0_17 = arith.constant 0 : index
    %17 = vector.load %arg2[%c2, %c0_16, %c0_17] : memref<7x32x64xbf16, #tpu.memory_space<vmem>>, vector<1x32x64xbf16>
    %18 = vector.shape_cast %17 : vector<1x32x64xbf16> to vector<32x64xbf16>
    %cst_18 = arith.constant dense<0.000000e+00> : vector<32x128xf32>
    %19 = tpu.matmul %18, %1, %cst_18 {dimension_numbers = #tpu.dot_dimension_numbers<[1], [0], [0], [1], [0, 0, 1, 1], [], []>} : vector<32x64xbf16>, vector<64x128xbf16>, vector<32x128xf32> -> vector<32x128xf32>
    %20 = arith.truncf %19 : vector<32x128xf32> to vector<32x128xbf16>
    %c2_19 = arith.constant 2 : index
    %c0_20 = arith.constant 0 : index
    %c0_21 = arith.constant 0 : index
    %21 = vector.load %arg3[%c2_19, %c0_20, %c0_21] : memref<7x128x64xbf16, #tpu.memory_space<vmem>>, vector<1x128x64xbf16>
    %22 = vector.shape_cast %21 : vector<1x128x64xbf16> to vector<128x64xbf16>
    %cst_22 = arith.constant dense<0.000000e+00> : vector<32x64xf32>
    %23 = tpu.matmul %20, %22, %cst_22 {dimension_numbers = #tpu.dot_dimension_numbers<[1], [0], [0], [1], [0, 0, 1, 1], [], []>} : vector<32x128xbf16>, vector<128x64xbf16>, vector<32x64xf32> -> vector<32x64xf32>
    %24 = arith.addf %16, %23 : vector<32x64xf32>
    %c3 = arith.constant 3 : index
    %c0_23 = arith.constant 0 : index
    %c0_24 = arith.constant 0 : index
    %25 = vector.load %arg2[%c3, %c0_23, %c0_24] : memref<7x32x64xbf16, #tpu.memory_space<vmem>>, vector<1x32x64xbf16>
    %26 = vector.shape_cast %25 : vector<1x32x64xbf16> to vector<32x64xbf16>
    %cst_25 = arith.constant dense<0.000000e+00> : vector<32x128xf32>
    %27 = tpu.matmul %26, %1, %cst_25 {dimension_numbers = #tpu.dot_dimension_numbers<[1], [0], [0], [1], [0, 0, 1, 1], [], []>} : vector<32x64xbf16>, vector<64x128xbf16>, vector<32x128xf32> -> vector<32x128xf32>
    %28 = arith.truncf %27 : vector<32x128xf32> to vector<32x128xbf16>
    %c3_26 = arith.constant 3 : index
    %c0_27 = arith.constant 0 : index
    %c0_28 = arith.constant 0 : index
    %29 = vector.load %arg3[%c3_26, %c0_27, %c0_28] : memref<7x128x64xbf16, #tpu.memory_space<vmem>>, vector<1x128x64xbf16>
    %30 = vector.shape_cast %29 : vector<1x128x64xbf16> to vector<128x64xbf16>
    %cst_29 = arith.constant dense<0.000000e+00> : vector<32x64xf32>
    %31 = tpu.matmul %28, %30, %cst_29 {dimension_numbers = #tpu.dot_dimension_numbers<[1], [0], [0], [1], [0, 0, 1, 1], [], []>} : vector<32x128xbf16>, vector<128x64xbf16>, vector<32x64xf32> -> vector<32x64xf32>
    %32 = arith.addf %24, %31 : vector<32x64xf32>
    %c4 = arith.constant 4 : index
    %c0_30 = arith.constant 0 : index
    %c0_31 = arith.constant 0 : index
    %33 = vector.load %arg2[%c4, %c0_30, %c0_31] : memref<7x32x64xbf16, #tpu.memory_space<vmem>>, vector<1x32x64xbf16>
    %34 = vector.shape_cast %33 : vector<1x32x64xbf16> to vector<32x64xbf16>
    %cst_32 = arith.constant dense<0.000000e+00> : vector<32x128xf32>
    %35 = tpu.matmul %34, %1, %cst_32 {dimension_numbers = #tpu.dot_dimension_numbers<[1], [0], [0], [1], [0, 0, 1, 1], [], []>} : vector<32x64xbf16>, vector<64x128xbf16>, vector<32x128xf32> -> vector<32x128xf32>
    %36 = arith.truncf %35 : vector<32x128xf32> to vector<32x128xbf16>
    %c4_33 = arith.constant 4 : index
    %c0_34 = arith.constant 0 : index
    %c0_35 = arith.constant 0 : index
    %37 = vector.load %arg3[%c4_33, %c0_34, %c0_35] : memref<7x128x64xbf16, #tpu.memory_space<vmem>>, vector<1x128x64xbf16>
    %38 = vector.shape_cast %37 : vector<1x128x64xbf16> to vector<128x64xbf16>
    %cst_36 = arith.constant dense<0.000000e+00> : vector<32x64xf32>
    %39 = tpu.matmul %36, %38, %cst_36 {dimension_numbers = #tpu.dot_dimension_numbers<[1], [0], [0], [1], [0, 0, 1, 1], [], []>} : vector<32x128xbf16>, vector<128x64xbf16>, vector<32x64xf32> -> vector<32x64xf32>
    %40 = arith.addf %32, %39 : vector<32x64xf32>
    %c5 = arith.constant 5 : index
    %c0_37 = arith.constant 0 : index
    %c0_38 = arith.constant 0 : index
    %41 = vector.load %arg2[%c5, %c0_37, %c0_38] : memref<7x32x64xbf16, #tpu.memory_space<vmem>>, vector<1x32x64xbf16>
    %42 = vector.shape_cast %41 : vector<1x32x64xbf16> to vector<32x64xbf16>
    %cst_39 = arith.constant dense<0.000000e+00> : vector<32x128xf32>
    %43 = tpu.matmul %42, %1, %cst_39 {dimension_numbers = #tpu.dot_dimension_numbers<[1], [0], [0], [1], [0, 0, 1, 1], [], []>} : vector<32x64xbf16>, vector<64x128xbf16>, vector<32x128xf32> -> vector<32x128xf32>
    %44 = arith.truncf %43 : vector<32x128xf32> to vector<32x128xbf16>
    %c5_40 = arith.constant 5 : index
    %c0_41 = arith.constant 0 : index
    %c0_42 = arith.constant 0 : index
    %45 = vector.load %arg3[%c5_40, %c0_41, %c0_42] : memref<7x128x64xbf16, #tpu.memory_space<vmem>>, vector<1x128x64xbf16>
    %46 = vector.shape_cast %45 : vector<1x128x64xbf16> to vector<128x64xbf16>
    %cst_43 = arith.constant dense<0.000000e+00> : vector<32x64xf32>
    %47 = tpu.matmul %44, %46, %cst_43 {dimension_numbers = #tpu.dot_dimension_numbers<[1], [0], [0], [1], [0, 0, 1, 1], [], []>} : vector<32x128xbf16>, vector<128x64xbf16>, vector<32x64xf32> -> vector<32x64xf32>
    %48 = arith.addf %40, %47 : vector<32x64xf32>
    %c6 = arith.constant 6 : index
    %c0_44 = arith.constant 0 : index
    %c0_45 = arith.constant 0 : index
    %49 = vector.load %arg2[%c6, %c0_44, %c0_45] : memref<7x32x64xbf16, #tpu.memory_space<vmem>>, vector<1x32x64xbf16>
    %50 = vector.shape_cast %49 : vector<1x32x64xbf16> to vector<32x64xbf16>
    %cst_46 = arith.constant dense<0.000000e+00> : vector<32x128xf32>
    %51 = tpu.matmul %50, %1, %cst_46 {dimension_numbers = #tpu.dot_dimension_numbers<[1], [0], [0], [1], [0, 0, 1, 1], [], []>} : vector<32x64xbf16>, vector<64x128xbf16>, vector<32x128xf32> -> vector<32x128xf32>
    %52 = arith.truncf %51 : vector<32x128xf32> to vector<32x128xbf16>
    %c6_47 = arith.constant 6 : index
    %c0_48 = arith.constant 0 : index
    %c0_49 = arith.constant 0 : index
    %53 = vector.load %arg3[%c6_47, %c0_48, %c0_49] : memref<7x128x64xbf16, #tpu.memory_space<vmem>>, vector<1x128x64xbf16>
    %54 = vector.shape_cast %53 : vector<1x128x64xbf16> to vector<128x64xbf16>
    %cst_50 = arith.constant dense<0.000000e+00> : vector<32x64xf32>
    %55 = tpu.matmul %52, %54, %cst_50 {dimension_numbers = #tpu.dot_dimension_numbers<[1], [0], [0], [1], [0, 0, 1, 1], [], []>} : vector<32x128xbf16>, vector<128x64xbf16>, vector<32x64xf32> -> vector<32x64xf32>
    %56 = arith.addf %48, %55 : vector<32x64xf32>
    %c0_51 = arith.constant 0 : index
    %c0_52 = arith.constant 0 : index
    %57 = vector.load %arg4[%c0_51, %c0_52] : memref<1x64xf32, #tpu.memory_space<vmem>>, vector<1x64xf32>
    %58 = vector.broadcast %57 : vector<1x64xf32> to vector<32x64xf32>
    %59 = arith.addf %56, %58 : vector<32x64xf32>
    %cst_53 = arith.constant 0.000000e+00 : f32
    %60 = vector.broadcast %cst_53 : f32 to vector<32x64xf32>
    %61 = arith.maximumf %59, %60 : vector<32x64xf32>
    %62 = arith.truncf %61 : vector<32x64xf32> to vector<32x64xbf16>
    %c0_54 = arith.constant 0 : index
    %c0_55 = arith.constant 0 : index
    %c0_56 = arith.constant 0 : index
    %63 = vector.load %arg5[%c0_54, %c0_55, %c0_56] : memref<5x16x32xbf16, #tpu.memory_space<vmem>>, vector<1x16x32xbf16>
    %64 = vector.shape_cast %63 : vector<1x16x32xbf16> to vector<16x32xbf16>
    %cst_57 = arith.constant dense<0.000000e+00> : vector<16x64xf32>
    %65 = tpu.matmul %64, %62, %cst_57 {dimension_numbers = #tpu.dot_dimension_numbers<[1], [0], [0], [1], [0, 0, 1, 1], [], []>} : vector<16x32xbf16>, vector<32x64xbf16>, vector<16x64xf32> -> vector<16x64xf32>
    %66 = arith.truncf %65 : vector<16x64xf32> to vector<16x64xbf16>
    %c0_58 = arith.constant 0 : index
    %c0_59 = arith.constant 0 : index
    %c0_60 = arith.constant 0 : index
    %67 = vector.load %arg6[%c0_58, %c0_59, %c0_60] : memref<5x64x128xbf16, #tpu.memory_space<vmem>>, vector<1x64x128xbf16>
    %68 = vector.shape_cast %67 : vector<1x64x128xbf16> to vector<64x128xbf16>
    %cst_61 = arith.constant dense<0.000000e+00> : vector<16x128xf32>
    %69 = tpu.matmul %66, %68, %cst_61 {dimension_numbers = #tpu.dot_dimension_numbers<[1], [0], [0], [1], [0, 0, 1, 1], [], []>} : vector<16x64xbf16>, vector<64x128xbf16>, vector<16x128xf32> -> vector<16x128xf32>
    %c1_62 = arith.constant 1 : index
    %c0_63 = arith.constant 0 : index
    %c0_64 = arith.constant 0 : index
    %70 = vector.load %arg5[%c1_62, %c0_63, %c0_64] : memref<5x16x32xbf16, #tpu.memory_space<vmem>>, vector<1x16x32xbf16>
    %71 = vector.shape_cast %70 : vector<1x16x32xbf16> to vector<16x32xbf16>
    %cst_65 = arith.constant dense<0.000000e+00> : vector<16x64xf32>
    %72 = tpu.matmul %71, %62, %cst_65 {dimension_numbers = #tpu.dot_dimension_numbers<[1], [0], [0], [1], [0, 0, 1, 1], [], []>} : vector<16x32xbf16>, vector<32x64xbf16>, vector<16x64xf32> -> vector<16x64xf32>
    %73 = arith.truncf %72 : vector<16x64xf32> to vector<16x64xbf16>
    %c1_66 = arith.constant 1 : index
    %c0_67 = arith.constant 0 : index
    %c0_68 = arith.constant 0 : index
    %74 = vector.load %arg6[%c1_66, %c0_67, %c0_68] : memref<5x64x128xbf16, #tpu.memory_space<vmem>>, vector<1x64x128xbf16>
    %75 = vector.shape_cast %74 : vector<1x64x128xbf16> to vector<64x128xbf16>
    %cst_69 = arith.constant dense<0.000000e+00> : vector<16x128xf32>
    %76 = tpu.matmul %73, %75, %cst_69 {dimension_numbers = #tpu.dot_dimension_numbers<[1], [0], [0], [1], [0, 0, 1, 1], [], []>} : vector<16x64xbf16>, vector<64x128xbf16>, vector<16x128xf32> -> vector<16x128xf32>
    %77 = arith.addf %69, %76 : vector<16x128xf32>
    %c2_70 = arith.constant 2 : index
    %c0_71 = arith.constant 0 : index
    %c0_72 = arith.constant 0 : index
    %78 = vector.load %arg5[%c2_70, %c0_71, %c0_72] : memref<5x16x32xbf16, #tpu.memory_space<vmem>>, vector<1x16x32xbf16>
    %79 = vector.shape_cast %78 : vector<1x16x32xbf16> to vector<16x32xbf16>
    %cst_73 = arith.constant dense<0.000000e+00> : vector<16x64xf32>
    %80 = tpu.matmul %79, %62, %cst_73 {dimension_numbers = #tpu.dot_dimension_numbers<[1], [0], [0], [1], [0, 0, 1, 1], [], []>} : vector<16x32xbf16>, vector<32x64xbf16>, vector<16x64xf32> -> vector<16x64xf32>
    %81 = arith.truncf %80 : vector<16x64xf32> to vector<16x64xbf16>
    %c2_74 = arith.constant 2 : index
    %c0_75 = arith.constant 0 : index
    %c0_76 = arith.constant 0 : index
    %82 = vector.load %arg6[%c2_74, %c0_75, %c0_76] : memref<5x64x128xbf16, #tpu.memory_space<vmem>>, vector<1x64x128xbf16>
    %83 = vector.shape_cast %82 : vector<1x64x128xbf16> to vector<64x128xbf16>
    %cst_77 = arith.constant dense<0.000000e+00> : vector<16x128xf32>
    %84 = tpu.matmul %81, %83, %cst_77 {dimension_numbers = #tpu.dot_dimension_numbers<[1], [0], [0], [1], [0, 0, 1, 1], [], []>} : vector<16x64xbf16>, vector<64x128xbf16>, vector<16x128xf32> -> vector<16x128xf32>
    %85 = arith.addf %77, %84 : vector<16x128xf32>
    %c3_78 = arith.constant 3 : index
    %c0_79 = arith.constant 0 : index
    %c0_80 = arith.constant 0 : index
    %86 = vector.load %arg5[%c3_78, %c0_79, %c0_80] : memref<5x16x32xbf16, #tpu.memory_space<vmem>>, vector<1x16x32xbf16>
    %87 = vector.shape_cast %86 : vector<1x16x32xbf16> to vector<16x32xbf16>
    %cst_81 = arith.constant dense<0.000000e+00> : vector<16x64xf32>
    %88 = tpu.matmul %87, %62, %cst_81 {dimension_numbers = #tpu.dot_dimension_numbers<[1], [0], [0], [1], [0, 0, 1, 1], [], []>} : vector<16x32xbf16>, vector<32x64xbf16>, vector<16x64xf32> -> vector<16x64xf32>
    %89 = arith.truncf %88 : vector<16x64xf32> to vector<16x64xbf16>
    %c3_82 = arith.constant 3 : index
    %c0_83 = arith.constant 0 : index
    %c0_84 = arith.constant 0 : index
    %90 = vector.load %arg6[%c3_82, %c0_83, %c0_84] : memref<5x64x128xbf16, #tpu.memory_space<vmem>>, vector<1x64x128xbf16>
    %91 = vector.shape_cast %90 : vector<1x64x128xbf16> to vector<64x128xbf16>
    %cst_85 = arith.constant dense<0.000000e+00> : vector<16x128xf32>
    %92 = tpu.matmul %89, %91, %cst_85 {dimension_numbers = #tpu.dot_dimension_numbers<[1], [0], [0], [1], [0, 0, 1, 1], [], []>} : vector<16x64xbf16>, vector<64x128xbf16>, vector<16x128xf32> -> vector<16x128xf32>
    %93 = arith.addf %85, %92 : vector<16x128xf32>
    %c4_86 = arith.constant 4 : index
    %c0_87 = arith.constant 0 : index
    %c0_88 = arith.constant 0 : index
    %94 = vector.load %arg5[%c4_86, %c0_87, %c0_88] : memref<5x16x32xbf16, #tpu.memory_space<vmem>>, vector<1x16x32xbf16>
    %95 = vector.shape_cast %94 : vector<1x16x32xbf16> to vector<16x32xbf16>
    %cst_89 = arith.constant dense<0.000000e+00> : vector<16x64xf32>
    %96 = tpu.matmul %95, %62, %cst_89 {dimension_numbers = #tpu.dot_dimension_numbers<[1], [0], [0], [1], [0, 0, 1, 1], [], []>} : vector<16x32xbf16>, vector<32x64xbf16>, vector<16x64xf32> -> vector<16x64xf32>
    %97 = arith.truncf %96 : vector<16x64xf32> to vector<16x64xbf16>
    %c4_90 = arith.constant 4 : index
    %c0_91 = arith.constant 0 : index
    %c0_92 = arith.constant 0 : index
    %98 = vector.load %arg6[%c4_90, %c0_91, %c0_92] : memref<5x64x128xbf16, #tpu.memory_space<vmem>>, vector<1x64x128xbf16>
    %99 = vector.shape_cast %98 : vector<1x64x128xbf16> to vector<64x128xbf16>
    %cst_93 = arith.constant dense<0.000000e+00> : vector<16x128xf32>
    %100 = tpu.matmul %97, %99, %cst_93 {dimension_numbers = #tpu.dot_dimension_numbers<[1], [0], [0], [1], [0, 0, 1, 1], [], []>} : vector<16x64xbf16>, vector<64x128xbf16>, vector<16x128xf32> -> vector<16x128xf32>
    %101 = arith.addf %93, %100 : vector<16x128xf32>
    %c0_94 = arith.constant 0 : index
    %c0_95 = arith.constant 0 : index
    %102 = vector.load %arg7[%c0_94, %c0_95] : memref<1x128xf32, #tpu.memory_space<vmem>>, vector<1x128xf32>
    %103 = vector.broadcast %102 : vector<1x128xf32> to vector<16x128xf32>
    %104 = arith.addf %101, %103 : vector<16x128xf32>
    %cst_96 = arith.constant 0.000000e+00 : f32
    %105 = vector.broadcast %cst_96 : f32 to vector<16x128xf32>
    %106 = arith.maximumf %104, %105 : vector<16x128xf32>
    %107 = arith.truncf %106 : vector<16x128xf32> to vector<16x128xbf16>
    %c0_97 = arith.constant 0 : index
    %c0_98 = arith.constant 0 : index
    %c0_99 = arith.constant 0 : index
    %108 = vector.load %arg8[%c0_97, %c0_98, %c0_99] : memref<3x8x16xbf16, #tpu.memory_space<vmem>>, vector<1x8x16xbf16>
    %109 = vector.shape_cast %108 : vector<1x8x16xbf16> to vector<8x16xbf16>
    %cst_100 = arith.constant dense<0.000000e+00> : vector<8x128xf32>
    %110 = tpu.matmul %109, %107, %cst_100 {dimension_numbers = #tpu.dot_dimension_numbers<[1], [0], [0], [1], [0, 0, 1, 1], [], []>} : vector<8x16xbf16>, vector<16x128xbf16>, vector<8x128xf32> -> vector<8x128xf32>
    %111 = arith.truncf %110 : vector<8x128xf32> to vector<8x128xbf16>
    %c0_101 = arith.constant 0 : index
    %c0_102 = arith.constant 0 : index
    %c0_103 = arith.constant 0 : index
    %112 = vector.load %arg9[%c0_101, %c0_102, %c0_103] : memref<3x128x256xbf16, #tpu.memory_space<vmem>>, vector<1x128x256xbf16>
    %113 = vector.shape_cast %112 : vector<1x128x256xbf16> to vector<128x256xbf16>
    %cst_104 = arith.constant dense<0.000000e+00> : vector<8x256xf32>
    %114 = tpu.matmul %111, %113, %cst_104 {dimension_numbers = #tpu.dot_dimension_numbers<[1], [0], [0], [1], [0, 0, 1, 1], [], []>} : vector<8x128xbf16>, vector<128x256xbf16>, vector<8x256xf32> -> vector<8x256xf32>
    %c1_105 = arith.constant 1 : index
    %c0_106 = arith.constant 0 : index
    %c0_107 = arith.constant 0 : index
    %115 = vector.load %arg8[%c1_105, %c0_106, %c0_107] : memref<3x8x16xbf16, #tpu.memory_space<vmem>>, vector<1x8x16xbf16>
    %116 = vector.shape_cast %115 : vector<1x8x16xbf16> to vector<8x16xbf16>
    %cst_108 = arith.constant dense<0.000000e+00> : vector<8x128xf32>
    %117 = tpu.matmul %116, %107, %cst_108 {dimension_numbers = #tpu.dot_dimension_numbers<[1], [0], [0], [1], [0, 0, 1, 1], [], []>} : vector<8x16xbf16>, vector<16x128xbf16>, vector<8x128xf32> -> vector<8x128xf32>
    %118 = arith.truncf %117 : vector<8x128xf32> to vector<8x128xbf16>
    %c1_109 = arith.constant 1 : index
    %c0_110 = arith.constant 0 : index
    %c0_111 = arith.constant 0 : index
    %119 = vector.load %arg9[%c1_109, %c0_110, %c0_111] : memref<3x128x256xbf16, #tpu.memory_space<vmem>>, vector<1x128x256xbf16>
    %120 = vector.shape_cast %119 : vector<1x128x256xbf16> to vector<128x256xbf16>
    %cst_112 = arith.constant dense<0.000000e+00> : vector<8x256xf32>
    %121 = tpu.matmul %118, %120, %cst_112 {dimension_numbers = #tpu.dot_dimension_numbers<[1], [0], [0], [1], [0, 0, 1, 1], [], []>} : vector<8x128xbf16>, vector<128x256xbf16>, vector<8x256xf32> -> vector<8x256xf32>
    %122 = arith.addf %114, %121 : vector<8x256xf32>
    %c2_113 = arith.constant 2 : index
    %c0_114 = arith.constant 0 : index
    %c0_115 = arith.constant 0 : index
    %123 = vector.load %arg8[%c2_113, %c0_114, %c0_115] : memref<3x8x16xbf16, #tpu.memory_space<vmem>>, vector<1x8x16xbf16>
    %124 = vector.shape_cast %123 : vector<1x8x16xbf16> to vector<8x16xbf16>
    %cst_116 = arith.constant dense<0.000000e+00> : vector<8x128xf32>
    %125 = tpu.matmul %124, %107, %cst_116 {dimension_numbers = #tpu.dot_dimension_numbers<[1], [0], [0], [1], [0, 0, 1, 1], [], []>} : vector<8x16xbf16>, vector<16x128xbf16>, vector<8x128xf32> -> vector<8x128xf32>
    %126 = arith.truncf %125 : vector<8x128xf32> to vector<8x128xbf16>
    %c2_117 = arith.constant 2 : index
    %c0_118 = arith.constant 0 : index
    %c0_119 = arith.constant 0 : index
    %127 = vector.load %arg9[%c2_117, %c0_118, %c0_119] : memref<3x128x256xbf16, #tpu.memory_space<vmem>>, vector<1x128x256xbf16>
    %128 = vector.shape_cast %127 : vector<1x128x256xbf16> to vector<128x256xbf16>
    %cst_120 = arith.constant dense<0.000000e+00> : vector<8x256xf32>
    %129 = tpu.matmul %126, %128, %cst_120 {dimension_numbers = #tpu.dot_dimension_numbers<[1], [0], [0], [1], [0, 0, 1, 1], [], []>} : vector<8x128xbf16>, vector<128x256xbf16>, vector<8x256xf32> -> vector<8x256xf32>
    %130 = arith.addf %122, %129 : vector<8x256xf32>
    %c0_121 = arith.constant 0 : index
    %c0_122 = arith.constant 0 : index
    %131 = vector.load %arg10[%c0_121, %c0_122] : memref<1x256xf32, #tpu.memory_space<vmem>>, vector<1x256xf32>
    %132 = vector.broadcast %131 : vector<1x256xf32> to vector<8x256xf32>
    %133 = arith.addf %130, %132 : vector<8x256xf32>
    %cst_123 = arith.constant 0.000000e+00 : f32
    %134 = vector.broadcast %cst_123 : f32 to vector<8x256xf32>
    %135 = arith.maximumf %133, %134 : vector<8x256xf32>
    %136 = arith.truncf %135 : vector<8x256xf32> to vector<8x256xbf16>
    %c0_124 = arith.constant 0 : index
    %c0_125 = arith.constant 0 : index
    %c0_126 = arith.constant 0 : index
    %137 = vector.load %arg11[%c0_124, %c0_125, %c0_126] : memref<3x16x8xbf16, #tpu.memory_space<vmem>>, vector<1x16x8xbf16>
    %138 = vector.shape_cast %137 : vector<1x16x8xbf16> to vector<16x8xbf16>
    %cst_127 = arith.constant dense<0.000000e+00> : vector<16x256xf32>
    %139 = tpu.matmul %138, %136, %cst_127 {dimension_numbers = #tpu.dot_dimension_numbers<[1], [0], [0], [1], [0, 0, 1, 1], [], []>} : vector<16x8xbf16>, vector<8x256xbf16>, vector<16x256xf32> -> vector<16x256xf32>
    %140 = arith.truncf %139 : vector<16x256xf32> to vector<16x256xbf16>
    %c0_128 = arith.constant 0 : index
    %c0_129 = arith.constant 0 : index
    %c0_130 = arith.constant 0 : index
    %141 = vector.load %arg12[%c0_128, %c0_129, %c0_130] : memref<3x256x128xbf16, #tpu.memory_space<vmem>>, vector<1x256x128xbf16>
    %142 = vector.shape_cast %141 : vector<1x256x128xbf16> to vector<256x128xbf16>
    %cst_131 = arith.constant dense<0.000000e+00> : vector<16x128xf32>
    %143 = tpu.matmul %140, %142, %cst_131 {dimension_numbers = #tpu.dot_dimension_numbers<[1], [0], [0], [1], [0, 0, 1, 1], [], []>} : vector<16x256xbf16>, vector<256x128xbf16>, vector<16x128xf32> -> vector<16x128xf32>
    %c1_132 = arith.constant 1 : index
    %c0_133 = arith.constant 0 : index
    %c0_134 = arith.constant 0 : index
    %144 = vector.load %arg11[%c1_132, %c0_133, %c0_134] : memref<3x16x8xbf16, #tpu.memory_space<vmem>>, vector<1x16x8xbf16>
    %145 = vector.shape_cast %144 : vector<1x16x8xbf16> to vector<16x8xbf16>
    %cst_135 = arith.constant dense<0.000000e+00> : vector<16x256xf32>
    %146 = tpu.matmul %145, %136, %cst_135 {dimension_numbers = #tpu.dot_dimension_numbers<[1], [0], [0], [1], [0, 0, 1, 1], [], []>} : vector<16x8xbf16>, vector<8x256xbf16>, vector<16x256xf32> -> vector<16x256xf32>
    %147 = arith.truncf %146 : vector<16x256xf32> to vector<16x256xbf16>
    %c1_136 = arith.constant 1 : index
    %c0_137 = arith.constant 0 : index
    %c0_138 = arith.constant 0 : index
    %148 = vector.load %arg12[%c1_136, %c0_137, %c0_138] : memref<3x256x128xbf16, #tpu.memory_space<vmem>>, vector<1x256x128xbf16>
    %149 = vector.shape_cast %148 : vector<1x256x128xbf16> to vector<256x128xbf16>
    %cst_139 = arith.constant dense<0.000000e+00> : vector<16x128xf32>
    %150 = tpu.matmul %147, %149, %cst_139 {dimension_numbers = #tpu.dot_dimension_numbers<[1], [0], [0], [1], [0, 0, 1, 1], [], []>} : vector<16x256xbf16>, vector<256x128xbf16>, vector<16x128xf32> -> vector<16x128xf32>
    %151 = arith.addf %143, %150 : vector<16x128xf32>
    %c2_140 = arith.constant 2 : index
    %c0_141 = arith.constant 0 : index
    %c0_142 = arith.constant 0 : index
    %152 = vector.load %arg11[%c2_140, %c0_141, %c0_142] : memref<3x16x8xbf16, #tpu.memory_space<vmem>>, vector<1x16x8xbf16>
    %153 = vector.shape_cast %152 : vector<1x16x8xbf16> to vector<16x8xbf16>
    %cst_143 = arith.constant dense<0.000000e+00> : vector<16x256xf32>
    %154 = tpu.matmul %153, %136, %cst_143 {dimension_numbers = #tpu.dot_dimension_numbers<[1], [0], [0], [1], [0, 0, 1, 1], [], []>} : vector<16x8xbf16>, vector<8x256xbf16>, vector<16x256xf32> -> vector<16x256xf32>
    %155 = arith.truncf %154 : vector<16x256xf32> to vector<16x256xbf16>
    %c2_144 = arith.constant 2 : index
    %c0_145 = arith.constant 0 : index
    %c0_146 = arith.constant 0 : index
    %156 = vector.load %arg12[%c2_144, %c0_145, %c0_146] : memref<3x256x128xbf16, #tpu.memory_space<vmem>>, vector<1x256x128xbf16>
    %157 = vector.shape_cast %156 : vector<1x256x128xbf16> to vector<256x128xbf16>
    %cst_147 = arith.constant dense<0.000000e+00> : vector<16x128xf32>
    %158 = tpu.matmul %155, %157, %cst_147 {dimension_numbers = #tpu.dot_dimension_numbers<[1], [0], [0], [1], [0, 0, 1, 1], [], []>} : vector<16x256xbf16>, vector<256x128xbf16>, vector<16x128xf32> -> vector<16x128xf32>
    %159 = arith.addf %151, %158 : vector<16x128xf32>
    %c0_148 = arith.constant 0 : index
    %c0_149 = arith.constant 0 : index
    %160 = vector.load %arg13[%c0_148, %c0_149] : memref<1x128xf32, #tpu.memory_space<vmem>>, vector<1x128xf32>
    %161 = vector.broadcast %160 : vector<1x128xf32> to vector<16x128xf32>
    %162 = arith.addf %159, %161 : vector<16x128xf32>
    %cst_150 = arith.constant 0.000000e+00 : f32
    %163 = vector.broadcast %cst_150 : f32 to vector<16x128xf32>
    %164 = arith.maximumf %162, %163 : vector<16x128xf32>
    %165 = arith.truncf %164 : vector<16x128xf32> to vector<16x128xbf16>
    %c0_151 = arith.constant 0 : index
    %c0_152 = arith.constant 0 : index
    %c0_153 = arith.constant 0 : index
    %166 = vector.load %arg14[%c0_151, %c0_152, %c0_153] : memref<5x32x16xbf16, #tpu.memory_space<vmem>>, vector<1x32x16xbf16>
    %167 = vector.shape_cast %166 : vector<1x32x16xbf16> to vector<32x16xbf16>
    %cst_154 = arith.constant dense<0.000000e+00> : vector<32x128xf32>
    %168 = tpu.matmul %167, %165, %cst_154 {dimension_numbers = #tpu.dot_dimension_numbers<[1], [0], [0], [1], [0, 0, 1, 1], [], []>} : vector<32x16xbf16>, vector<16x128xbf16>, vector<32x128xf32> -> vector<32x128xf32>
    %169 = arith.truncf %168 : vector<32x128xf32> to vector<32x128xbf16>
    %c0_155 = arith.constant 0 : index
    %c0_156 = arith.constant 0 : index
    %c0_157 = arith.constant 0 : index
    %170 = vector.load %arg15[%c0_155, %c0_156, %c0_157] : memref<5x128x64xbf16, #tpu.memory_space<vmem>>, vector<1x128x64xbf16>
    %171 = vector.shape_cast %170 : vector<1x128x64xbf16> to vector<128x64xbf16>
    %cst_158 = arith.constant dense<0.000000e+00> : vector<32x64xf32>
    %172 = tpu.matmul %169, %171, %cst_158 {dimension_numbers = #tpu.dot_dimension_numbers<[1], [0], [0], [1], [0, 0, 1, 1], [], []>} : vector<32x128xbf16>, vector<128x64xbf16>, vector<32x64xf32> -> vector<32x64xf32>
    %c1_159 = arith.constant 1 : index
    %c0_160 = arith.constant 0 : index
    %c0_161 = arith.constant 0 : index
    %173 = vector.load %arg14[%c1_159, %c0_160, %c0_161] : memref<5x32x16xbf16, #tpu.memory_space<vmem>>, vector<1x32x16xbf16>
    %174 = vector.shape_cast %173 : vector<1x32x16xbf16> to vector<32x16xbf16>
    %cst_162 = arith.constant dense<0.000000e+00> : vector<32x128xf32>
    %175 = tpu.matmul %174, %165, %cst_162 {dimension_numbers = #tpu.dot_dimension_numbers<[1], [0], [0], [1], [0, 0, 1, 1], [], []>} : vector<32x16xbf16>, vector<16x128xbf16>, vector<32x128xf32> -> vector<32x128xf32>
    %176 = arith.truncf %175 : vector<32x128xf32> to vector<32x128xbf16>
    %c1_163 = arith.constant 1 : index
    %c0_164 = arith.constant 0 : index
    %c0_165 = arith.constant 0 : index
    %177 = vector.load %arg15[%c1_163, %c0_164, %c0_165] : memref<5x128x64xbf16, #tpu.memory_space<vmem>>, vector<1x128x64xbf16>
    %178 = vector.shape_cast %177 : vector<1x128x64xbf16> to vector<128x64xbf16>
    %cst_166 = arith.constant dense<0.000000e+00> : vector<32x64xf32>
    %179 = tpu.matmul %176, %178, %cst_166 {dimension_numbers = #tpu.dot_dimension_numbers<[1], [0], [0], [1], [0, 0, 1, 1], [], []>} : vector<32x128xbf16>, vector<128x64xbf16>, vector<32x64xf32> -> vector<32x64xf32>
    %180 = arith.addf %172, %179 : vector<32x64xf32>
    %c2_167 = arith.constant 2 : index
    %c0_168 = arith.constant 0 : index
    %c0_169 = arith.constant 0 : index
    %181 = vector.load %arg14[%c2_167, %c0_168, %c0_169] : memref<5x32x16xbf16, #tpu.memory_space<vmem>>, vector<1x32x16xbf16>
    %182 = vector.shape_cast %181 : vector<1x32x16xbf16> to vector<32x16xbf16>
    %cst_170 = arith.constant dense<0.000000e+00> : vector<32x128xf32>
    %183 = tpu.matmul %182, %165, %cst_170 {dimension_numbers = #tpu.dot_dimension_numbers<[1], [0], [0], [1], [0, 0, 1, 1], [], []>} : vector<32x16xbf16>, vector<16x128xbf16>, vector<32x128xf32> -> vector<32x128xf32>
    %184 = arith.truncf %183 : vector<32x128xf32> to vector<32x128xbf16>
    %c2_171 = arith.constant 2 : index
    %c0_172 = arith.constant 0 : index
    %c0_173 = arith.constant 0 : index
    %185 = vector.load %arg15[%c2_171, %c0_172, %c0_173] : memref<5x128x64xbf16, #tpu.memory_space<vmem>>, vector<1x128x64xbf16>
    %186 = vector.shape_cast %185 : vector<1x128x64xbf16> to vector<128x64xbf16>
    %cst_174 = arith.constant dense<0.000000e+00> : vector<32x64xf32>
    %187 = tpu.matmul %184, %186, %cst_174 {dimension_numbers = #tpu.dot_dimension_numbers<[1], [0], [0], [1], [0, 0, 1, 1], [], []>} : vector<32x128xbf16>, vector<128x64xbf16>, vector<32x64xf32> -> vector<32x64xf32>
    %188 = arith.addf %180, %187 : vector<32x64xf32>
    %c3_175 = arith.constant 3 : index
    %c0_176 = arith.constant 0 : index
    %c0_177 = arith.constant 0 : index
    %189 = vector.load %arg14[%c3_175, %c0_176, %c0_177] : memref<5x32x16xbf16, #tpu.memory_space<vmem>>, vector<1x32x16xbf16>
    %190 = vector.shape_cast %189 : vector<1x32x16xbf16> to vector<32x16xbf16>
    %cst_178 = arith.constant dense<0.000000e+00> : vector<32x128xf32>
    %191 = tpu.matmul %190, %165, %cst_178 {dimension_numbers = #tpu.dot_dimension_numbers<[1], [0], [0], [1], [0, 0, 1, 1], [], []>} : vector<32x16xbf16>, vector<16x128xbf16>, vector<32x128xf32> -> vector<32x128xf32>
    %192 = arith.truncf %191 : vector<32x128xf32> to vector<32x128xbf16>
    %c3_179 = arith.constant 3 : index
    %c0_180 = arith.constant 0 : index
    %c0_181 = arith.constant 0 : index
    %193 = vector.load %arg15[%c3_179, %c0_180, %c0_181] : memref<5x128x64xbf16, #tpu.memory_space<vmem>>, vector<1x128x64xbf16>
    %194 = vector.shape_cast %193 : vector<1x128x64xbf16> to vector<128x64xbf16>
    %cst_182 = arith.constant dense<0.000000e+00> : vector<32x64xf32>
    %195 = tpu.matmul %192, %194, %cst_182 {dimension_numbers = #tpu.dot_dimension_numbers<[1], [0], [0], [1], [0, 0, 1, 1], [], []>} : vector<32x128xbf16>, vector<128x64xbf16>, vector<32x64xf32> -> vector<32x64xf32>
    %196 = arith.addf %188, %195 : vector<32x64xf32>
    %c4_183 = arith.constant 4 : index
    %c0_184 = arith.constant 0 : index
    %c0_185 = arith.constant 0 : index
    %197 = vector.load %arg14[%c4_183, %c0_184, %c0_185] : memref<5x32x16xbf16, #tpu.memory_space<vmem>>, vector<1x32x16xbf16>
    %198 = vector.shape_cast %197 : vector<1x32x16xbf16> to vector<32x16xbf16>
    %cst_186 = arith.constant dense<0.000000e+00> : vector<32x128xf32>
    %199 = tpu.matmul %198, %165, %cst_186 {dimension_numbers = #tpu.dot_dimension_numbers<[1], [0], [0], [1], [0, 0, 1, 1], [], []>} : vector<32x16xbf16>, vector<16x128xbf16>, vector<32x128xf32> -> vector<32x128xf32>
    %200 = arith.truncf %199 : vector<32x128xf32> to vector<32x128xbf16>
    %c4_187 = arith.constant 4 : index
    %c0_188 = arith.constant 0 : index
    %c0_189 = arith.constant 0 : index
    %201 = vector.load %arg15[%c4_187, %c0_188, %c0_189] : memref<5x128x64xbf16, #tpu.memory_space<vmem>>, vector<1x128x64xbf16>
    %202 = vector.shape_cast %201 : vector<1x128x64xbf16> to vector<128x64xbf16>
    %cst_190 = arith.constant dense<0.000000e+00> : vector<32x64xf32>
    %203 = tpu.matmul %200, %202, %cst_190 {dimension_numbers = #tpu.dot_dimension_numbers<[1], [0], [0], [1], [0, 0, 1, 1], [], []>} : vector<32x128xbf16>, vector<128x64xbf16>, vector<32x64xf32> -> vector<32x64xf32>
    %204 = arith.addf %196, %203 : vector<32x64xf32>
    %c0_191 = arith.constant 0 : index
    %c0_192 = arith.constant 0 : index
    %205 = vector.load %arg16[%c0_191, %c0_192] : memref<1x64xf32, #tpu.memory_space<vmem>>, vector<1x64xf32>
    %206 = vector.broadcast %205 : vector<1x64xf32> to vector<32x64xf32>
    %207 = arith.addf %204, %206 : vector<32x64xf32>
    %cst_193 = arith.constant 0.000000e+00 : f32
    %208 = vector.broadcast %cst_193 : f32 to vector<32x64xf32>
    %209 = arith.maximumf %207, %208 : vector<32x64xf32>
    %210 = arith.truncf %209 : vector<32x64xf32> to vector<32x64xbf16>
    %c0_194 = arith.constant 0 : index
    %c0_195 = arith.constant 0 : index
    %c0_196 = arith.constant 0 : index
    %211 = vector.load %arg17[%c0_194, %c0_195, %c0_196] : memref<7x64x32xbf16, #tpu.memory_space<vmem>>, vector<1x64x32xbf16>
    %212 = vector.shape_cast %211 : vector<1x64x32xbf16> to vector<64x32xbf16>
    %cst_197 = arith.constant dense<0.000000e+00> : vector<64x64xf32>
    %213 = tpu.matmul %212, %210, %cst_197 {dimension_numbers = #tpu.dot_dimension_numbers<[1], [0], [0], [1], [0, 0, 1, 1], [], []>} : vector<64x32xbf16>, vector<32x64xbf16>, vector<64x64xf32> -> vector<64x64xf32>
    %214 = arith.truncf %213 : vector<64x64xf32> to vector<64x64xbf16>
    %c0_198 = arith.constant 0 : index
    %c0_199 = arith.constant 0 : index
    %c0_200 = arith.constant 0 : index
    %215 = vector.load %arg18[%c0_198, %c0_199, %c0_200] : memref<7x64x128xbf16, #tpu.memory_space<vmem>>, vector<1x64x128xbf16>
    %216 = vector.shape_cast %215 : vector<1x64x128xbf16> to vector<64x128xbf16>
    %cst_201 = arith.constant dense<0.000000e+00> : vector<64x128xf32>
    %217 = tpu.matmul %214, %216, %cst_201 {dimension_numbers = #tpu.dot_dimension_numbers<[1], [0], [0], [1], [0, 0, 1, 1], [], []>} : vector<64x64xbf16>, vector<64x128xbf16>, vector<64x128xf32> -> vector<64x128xf32>
    %c1_202 = arith.constant 1 : index
    %c0_203 = arith.constant 0 : index
    %c0_204 = arith.constant 0 : index
    %218 = vector.load %arg17[%c1_202, %c0_203, %c0_204] : memref<7x64x32xbf16, #tpu.memory_space<vmem>>, vector<1x64x32xbf16>
    %219 = vector.shape_cast %218 : vector<1x64x32xbf16> to vector<64x32xbf16>
    %cst_205 = arith.constant dense<0.000000e+00> : vector<64x64xf32>
    %220 = tpu.matmul %219, %210, %cst_205 {dimension_numbers = #tpu.dot_dimension_numbers<[1], [0], [0], [1], [0, 0, 1, 1], [], []>} : vector<64x32xbf16>, vector<32x64xbf16>, vector<64x64xf32> -> vector<64x64xf32>
    %221 = arith.truncf %220 : vector<64x64xf32> to vector<64x64xbf16>
    %c1_206 = arith.constant 1 : index
    %c0_207 = arith.constant 0 : index
    %c0_208 = arith.constant 0 : index
    %222 = vector.load %arg18[%c1_206, %c0_207, %c0_208] : memref<7x64x128xbf16, #tpu.memory_space<vmem>>, vector<1x64x128xbf16>
    %223 = vector.shape_cast %222 : vector<1x64x128xbf16> to vector<64x128xbf16>
    %cst_209 = arith.constant dense<0.000000e+00> : vector<64x128xf32>
    %224 = tpu.matmul %221, %223, %cst_209 {dimension_numbers = #tpu.dot_dimension_numbers<[1], [0], [0], [1], [0, 0, 1, 1], [], []>} : vector<64x64xbf16>, vector<64x128xbf16>, vector<64x128xf32> -> vector<64x128xf32>
    %225 = arith.addf %217, %224 : vector<64x128xf32>
    %c2_210 = arith.constant 2 : index
    %c0_211 = arith.constant 0 : index
    %c0_212 = arith.constant 0 : index
    %226 = vector.load %arg17[%c2_210, %c0_211, %c0_212] : memref<7x64x32xbf16, #tpu.memory_space<vmem>>, vector<1x64x32xbf16>
    %227 = vector.shape_cast %226 : vector<1x64x32xbf16> to vector<64x32xbf16>
    %cst_213 = arith.constant dense<0.000000e+00> : vector<64x64xf32>
    %228 = tpu.matmul %227, %210, %cst_213 {dimension_numbers = #tpu.dot_dimension_numbers<[1], [0], [0], [1], [0, 0, 1, 1], [], []>} : vector<64x32xbf16>, vector<32x64xbf16>, vector<64x64xf32> -> vector<64x64xf32>
    %229 = arith.truncf %228 : vector<64x64xf32> to vector<64x64xbf16>
    %c2_214 = arith.constant 2 : index
    %c0_215 = arith.constant 0 : index
    %c0_216 = arith.constant 0 : index
    %230 = vector.load %arg18[%c2_214, %c0_215, %c0_216] : memref<7x64x128xbf16, #tpu.memory_space<vmem>>, vector<1x64x128xbf16>
    %231 = vector.shape_cast %230 : vector<1x64x128xbf16> to vector<64x128xbf16>
    %cst_217 = arith.constant dense<0.000000e+00> : vector<64x128xf32>
    %232 = tpu.matmul %229, %231, %cst_217 {dimension_numbers = #tpu.dot_dimension_numbers<[1], [0], [0], [1], [0, 0, 1, 1], [], []>} : vector<64x64xbf16>, vector<64x128xbf16>, vector<64x128xf32> -> vector<64x128xf32>
    %233 = arith.addf %225, %232 : vector<64x128xf32>
    %c3_218 = arith.constant 3 : index
    %c0_219 = arith.constant 0 : index
    %c0_220 = arith.constant 0 : index
    %234 = vector.load %arg17[%c3_218, %c0_219, %c0_220] : memref<7x64x32xbf16, #tpu.memory_space<vmem>>, vector<1x64x32xbf16>
    %235 = vector.shape_cast %234 : vector<1x64x32xbf16> to vector<64x32xbf16>
    %cst_221 = arith.constant dense<0.000000e+00> : vector<64x64xf32>
    %236 = tpu.matmul %235, %210, %cst_221 {dimension_numbers = #tpu.dot_dimension_numbers<[1], [0], [0], [1], [0, 0, 1, 1], [], []>} : vector<64x32xbf16>, vector<32x64xbf16>, vector<64x64xf32> -> vector<64x64xf32>
    %237 = arith.truncf %236 : vector<64x64xf32> to vector<64x64xbf16>
    %c3_222 = arith.constant 3 : index
    %c0_223 = arith.constant 0 : index
    %c0_224 = arith.constant 0 : index
    %238 = vector.load %arg18[%c3_222, %c0_223, %c0_224] : memref<7x64x128xbf16, #tpu.memory_space<vmem>>, vector<1x64x128xbf16>
    %239 = vector.shape_cast %238 : vector<1x64x128xbf16> to vector<64x128xbf16>
    %cst_225 = arith.constant dense<0.000000e+00> : vector<64x128xf32>
    %240 = tpu.matmul %237, %239, %cst_225 {dimension_numbers = #tpu.dot_dimension_numbers<[1], [0], [0], [1], [0, 0, 1, 1], [], []>} : vector<64x64xbf16>, vector<64x128xbf16>, vector<64x128xf32> -> vector<64x128xf32>
    %241 = arith.addf %233, %240 : vector<64x128xf32>
    %c4_226 = arith.constant 4 : index
    %c0_227 = arith.constant 0 : index
    %c0_228 = arith.constant 0 : index
    %242 = vector.load %arg17[%c4_226, %c0_227, %c0_228] : memref<7x64x32xbf16, #tpu.memory_space<vmem>>, vector<1x64x32xbf16>
    %243 = vector.shape_cast %242 : vector<1x64x32xbf16> to vector<64x32xbf16>
    %cst_229 = arith.constant dense<0.000000e+00> : vector<64x64xf32>
    %244 = tpu.matmul %243, %210, %cst_229 {dimension_numbers = #tpu.dot_dimension_numbers<[1], [0], [0], [1], [0, 0, 1, 1], [], []>} : vector<64x32xbf16>, vector<32x64xbf16>, vector<64x64xf32> -> vector<64x64xf32>
    %245 = arith.truncf %244 : vector<64x64xf32> to vector<64x64xbf16>
    %c4_230 = arith.constant 4 : index
    %c0_231 = arith.constant 0 : index
    %c0_232 = arith.constant 0 : index
    %246 = vector.load %arg18[%c4_230, %c0_231, %c0_232] : memref<7x64x128xbf16, #tpu.memory_space<vmem>>, vector<1x64x128xbf16>
    %247 = vector.shape_cast %246 : vector<1x64x128xbf16> to vector<64x128xbf16>
    %cst_233 = arith.constant dense<0.000000e+00> : vector<64x128xf32>
    %248 = tpu.matmul %245, %247, %cst_233 {dimension_numbers = #tpu.dot_dimension_numbers<[1], [0], [0], [1], [0, 0, 1, 1], [], []>} : vector<64x64xbf16>, vector<64x128xbf16>, vector<64x128xf32> -> vector<64x128xf32>
    %249 = arith.addf %241, %248 : vector<64x128xf32>
    %c5_234 = arith.constant 5 : index
    %c0_235 = arith.constant 0 : index
    %c0_236 = arith.constant 0 : index
    %250 = vector.load %arg17[%c5_234, %c0_235, %c0_236] : memref<7x64x32xbf16, #tpu.memory_space<vmem>>, vector<1x64x32xbf16>
    %251 = vector.shape_cast %250 : vector<1x64x32xbf16> to vector<64x32xbf16>
    %cst_237 = arith.constant dense<0.000000e+00> : vector<64x64xf32>
    %252 = tpu.matmul %251, %210, %cst_237 {dimension_numbers = #tpu.dot_dimension_numbers<[1], [0], [0], [1], [0, 0, 1, 1], [], []>} : vector<64x32xbf16>, vector<32x64xbf16>, vector<64x64xf32> -> vector<64x64xf32>
    %253 = arith.truncf %252 : vector<64x64xf32> to vector<64x64xbf16>
    %c5_238 = arith.constant 5 : index
    %c0_239 = arith.constant 0 : index
    %c0_240 = arith.constant 0 : index
    %254 = vector.load %arg18[%c5_238, %c0_239, %c0_240] : memref<7x64x128xbf16, #tpu.memory_space<vmem>>, vector<1x64x128xbf16>
    %255 = vector.shape_cast %254 : vector<1x64x128xbf16> to vector<64x128xbf16>
    %cst_241 = arith.constant dense<0.000000e+00> : vector<64x128xf32>
    %256 = tpu.matmul %253, %255, %cst_241 {dimension_numbers = #tpu.dot_dimension_numbers<[1], [0], [0], [1], [0, 0, 1, 1], [], []>} : vector<64x64xbf16>, vector<64x128xbf16>, vector<64x128xf32> -> vector<64x128xf32>
    %257 = arith.addf %249, %256 : vector<64x128xf32>
    %c6_242 = arith.constant 6 : index
    %c0_243 = arith.constant 0 : index
    %c0_244 = arith.constant 0 : index
    %258 = vector.load %arg17[%c6_242, %c0_243, %c0_244] : memref<7x64x32xbf16, #tpu.memory_space<vmem>>, vector<1x64x32xbf16>
    %259 = vector.shape_cast %258 : vector<1x64x32xbf16> to vector<64x32xbf16>
    %cst_245 = arith.constant dense<0.000000e+00> : vector<64x64xf32>
    %260 = tpu.matmul %259, %210, %cst_245 {dimension_numbers = #tpu.dot_dimension_numbers<[1], [0], [0], [1], [0, 0, 1, 1], [], []>} : vector<64x32xbf16>, vector<32x64xbf16>, vector<64x64xf32> -> vector<64x64xf32>
    %261 = arith.truncf %260 : vector<64x64xf32> to vector<64x64xbf16>
    %c6_246 = arith.constant 6 : index
    %c0_247 = arith.constant 0 : index
    %c0_248 = arith.constant 0 : index
    %262 = vector.load %arg18[%c6_246, %c0_247, %c0_248] : memref<7x64x128xbf16, #tpu.memory_space<vmem>>, vector<1x64x128xbf16>
    %263 = vector.shape_cast %262 : vector<1x64x128xbf16> to vector<64x128xbf16>
    %cst_249 = arith.constant dense<0.000000e+00> : vector<64x128xf32>
    %264 = tpu.matmul %261, %263, %cst_249 {dimension_numbers = #tpu.dot_dimension_numbers<[1], [0], [0], [1], [0, 0, 1, 1], [], []>} : vector<64x64xbf16>, vector<64x128xbf16>, vector<64x128xf32> -> vector<64x128xf32>
    %265 = arith.addf %257, %264 : vector<64x128xf32>
    %c0_250 = arith.constant 0 : index
    %c0_251 = arith.constant 0 : index
    %266 = vector.load %arg19[%c0_250, %c0_251] : memref<1x128xf32, #tpu.memory_space<vmem>>, vector<1x128xf32>
    %267 = vector.broadcast %266 : vector<1x128xf32> to vector<64x128xf32>
    %268 = arith.addf %265, %267 : vector<64x128xf32>
    %269 = arith.truncf %268 : vector<64x128xf32> to vector<64x128xbf16>
    %c0_252 = arith.constant 0 : index
    %c0_253 = arith.constant 0 : index
    %c0_254 = arith.constant 0 : index
    %270 = vector.load %arg20[%c0_252, %c0_253, %c0_254] : memref<1x64x128xbf16, #tpu.memory_space<vmem>>, vector<1x64x128xbf16>
    %271 = vector.shape_cast %270 : vector<1x64x128xbf16> to vector<64x128xbf16>
    %272 = vector.shape_cast %269 : vector<64x128xbf16> to vector<1x64x128xbf16>
    tpu.vector_store %arg20[%c0_252, %c0_253, %c0_254], %272 {strides = array<i32>} : memref<1x64x128xbf16, #tpu.memory_space<vmem>>, vector<1x64x128xbf16>,
    return
  }
  func.func @transform_0(%arg0: i32) -> (i32, i32, i32) {
    %c0_i32 = arith.constant 0 : i32
    %c0_i32_0 = arith.constant 0 : i32
    %c0_i32_1 = arith.constant 0 : i32
    return %arg0, %c0_i32, %c0_i32_0 : i32, i32, i32
  }
  func.func @transform_1(%arg0: i32) -> (i32, i32, i32) {
    %c0_i32 = arith.constant 0 : i32
    %c0_i32_0 = arith.constant 0 : i32
    %c0_i32_1 = arith.constant 0 : i32
    %c0_i32_2 = arith.constant 0 : i32
    return %c0_i32, %c0_i32_0, %c0_i32_1 : i32, i32, i32
  }
  func.func @transform_2(%arg0: i32) -> (i32, i32, i32) {
    %c0_i32 = arith.constant 0 : i32
    %c0_i32_0 = arith.constant 0 : i32
    %c0_i32_1 = arith.constant 0 : i32
    %c0_i32_2 = arith.constant 0 : i32
    return %c0_i32, %c0_i32_0, %c0_i32_1 : i32, i32, i32
  }
  func.func @transform_3(%arg0: i32) -> (i32, i32) {
    %c0_i32 = arith.constant 0 : i32
    %c0_i32_0 = arith.constant 0 : i32
    %c0_i32_1 = arith.constant 0 : i32
    return %c0_i32, %c0_i32_0 : i32, i32
  }
  func.func @transform_4(%arg0: i32) -> (i32, i32, i32) {
    %c0_i32 = arith.constant 0 : i32
    %c0_i32_0 = arith.constant 0 : i32
    %c0_i32_1 = arith.constant 0 : i32
    %c0_i32_2 = arith.constant 0 : i32
    return %c0_i32, %c0_i32_0, %c0_i32_1 : i32, i32, i32
  }
  func.func @transform_5(%arg0: i32) -> (i32, i32, i32) {
    %c0_i32 = arith.constant 0 : i32
    %c0_i32_0 = arith.constant 0 : i32
    %c0_i32_1 = arith.constant 0 : i32
    %c0_i32_2 = arith.constant 0 : i32
    return %c0_i32, %c0_i32_0, %c0_i32_1 : i32, i32, i32
  }
  func.func @transform_6(%arg0: i32) -> (i32, i32) {
    %c0_i32 = arith.constant 0 : i32
    %c0_i32_0 = arith.constant 0 : i32
    %c0_i32_1 = arith.constant 0 : i32
    return %c0_i32, %c0_i32_0 : i32, i32
  }
  func.func @transform_7(%arg0: i32) -> (i32, i32, i32) {
    %c0_i32 = arith.constant 0 : i32
    %c0_i32_0 = arith.constant 0 : i32
    %c0_i32_1 = arith.constant 0 : i32
    %c0_i32_2 = arith.constant 0 : i32
    return %c0_i32, %c0_i32_0, %c0_i32_1 : i32, i32, i32
  }
  func.func @transform_8(%arg0: i32) -> (i32, i32, i32) {
    %c0_i32 = arith.constant 0 : i32
    %c0_i32_0 = arith.constant 0 : i32
    %c0_i32_1 = arith.constant 0 : i32
    %c0_i32_2 = arith.constant 0 : i32
    return %c0_i32, %c0_i32_0, %c0_i32_1 : i32, i32, i32
  }
  func.func @transform_9(%arg0: i32) -> (i32, i32) {
    %c0_i32 = arith.constant 0 : i32
    %c0_i32_0 = arith.constant 0 : i32
    %c0_i32_1 = arith.constant 0 : i32
    return %c0_i32, %c0_i32_0 : i32, i32
  }
  func.func @transform_10(%arg0: i32) -> (i32, i32, i32) {
    %c0_i32 = arith.constant 0 : i32
    %c0_i32_0 = arith.constant 0 : i32
    %c0_i32_1 = arith.constant 0 : i32
    %c0_i32_2 = arith.constant 0 : i32
    return %c0_i32, %c0_i32_0, %c0_i32_1 : i32, i32, i32
  }
  func.func @transform_11(%arg0: i32) -> (i32, i32, i32) {
    %c0_i32 = arith.constant 0 : i32
    %c0_i32_0 = arith.constant 0 : i32
    %c0_i32_1 = arith.constant 0 : i32
    %c0_i32_2 = arith.constant 0 : i32
    return %c0_i32, %c0_i32_0, %c0_i32_1 : i32, i32, i32
  }
  func.func @transform_12(%arg0: i32) -> (i32, i32) {
    %c0_i32 = arith.constant 0 : i32
    %c0_i32_0 = arith.constant 0 : i32
    %c0_i32_1 = arith.constant 0 : i32
    return %c0_i32, %c0_i32_0 : i32, i32
  }
  func.func @transform_13(%arg0: i32) -> (i32, i32, i32) {
    %c0_i32 = arith.constant 0 : i32
    %c0_i32_0 = arith.constant 0 : i32
    %c0_i32_1 = arith.constant 0 : i32
    %c0_i32_2 = arith.constant 0 : i32
    return %c0_i32, %c0_i32_0, %c0_i32_1 : i32, i32, i32
  }
  func.func @transform_14(%arg0: i32) -> (i32, i32, i32) {
    %c0_i32 = arith.constant 0 : i32
    %c0_i32_0 = arith.constant 0 : i32
    %c0_i32_1 = arith.constant 0 : i32
    %c0_i32_2 = arith.constant 0 : i32
    return %c0_i32, %c0_i32_0, %c0_i32_1 : i32, i32, i32
  }
  func.func @transform_15(%arg0: i32) -> (i32, i32) {
    %c0_i32 = arith.constant 0 : i32
    %c0_i32_0 = arith.constant 0 : i32
    %c0_i32_1 = arith.constant 0 : i32
    return %c0_i32, %c0_i32_0 : i32, i32
  }
  func.func @transform_16(%arg0: i32) -> (i32, i32, i32) {
    %c0_i32 = arith.constant 0 : i32
    %c0_i32_0 = arith.constant 0 : i32
    %c0_i32_1 = arith.constant 0 : i32
    %c0_i32_2 = arith.constant 0 : i32
    return %c0_i32, %c0_i32_0, %c0_i32_1 : i32, i32, i32
  }
  func.func @transform_17(%arg0: i32) -> (i32, i32, i32) {
    %c0_i32 = arith.constant 0 : i32
    %c0_i32_0 = arith.constant 0 : i32
    %c0_i32_1 = arith.constant 0 : i32
    %c0_i32_2 = arith.constant 0 : i32
    return %c0_i32, %c0_i32_0, %c0_i32_1 : i32, i32, i32
  }
  func.func @transform_18(%arg0: i32) -> (i32, i32) {
    %c0_i32 = arith.constant 0 : i32
    %c0_i32_0 = arith.constant 0 : i32
    %c0_i32_1 = arith.constant 0 : i32
    return %c0_i32, %c0_i32_0 : i32, i32
  }
  func.func @transform_19(%arg0: i32) -> (i32, i32, i32) {
    %c0_i32 = arith.constant 0 : i32
    %c0_i32_0 = arith.constant 0 : i32
    %c0_i32_1 = arith.constant 0 : i32
    return %arg0, %c0_i32, %c0_i32_0 : i32, i32, i32
  }
}

</mosaic_0001>

<bundles_post_ra>
// kernel: ecg_autoencoder_forward.1
= control target key start
LH: loop header
LB: loop body
LE: loop exit
PB: predicated region body
PF: predicated region fallthrough
CT: control target
= control target key end

     0   :  { %vm109_vm0 = vcmask 523264   ;;  %vm1017_vm1 = vcmask 261120   ;;  %vm1405_vm2 = vcmask 130048   ;;  %vm1854_vm3 = vcmask 1043456   ;;  %s7676_s0 = inlined_call_operand.vmem [shape: bf16[1,64,128], index: 0, kind: input, shape index: {}]   ;;  %s7677_s1 = inlined_call_operand.vmem [shape: bf16[7,32,64], index: 1, kind: input, shape index: {}]   ;;  %s7678_s2 = inlined_call_operand.vmem [shape: bf16[7,128,64], index: 2, kind: input, shape index: {}]   ;;  %s7679_s3 = inlined_call_operand.vmem [shape: f32[1,64], index: 3, kind: input, shape index: {}]   ;;  %s7680_s5 = inlined_call_operand.vmem [shape: bf16[5,64,128], index: 5, kind: input, shape index: {}]   ;;  %s7681_s4 = inlined_call_operand.vmem [shape: bf16[5,16,32], index: 4, kind: input, shape index: {}]   ;;  %s7682_s6 = inlined_call_operand.vmem [shape: f32[1,128], index: 6, kind: input, shape index: {}]   ;;  %s7683_s8 = inlined_call_operand.vmem [shape: bf16[3,128,256], index: 8, kind: input, shape index: {}]   ;;  %s7684_s7 = inlined_call_operand.vmem [shape: bf16[3,8,16], index: 7, kind: input, shape index: {}]   ;;  %s7685_s11 = inlined_call_operand.vmem [shape: bf16[3,256,128], index: 11, kind: input, shape index: {}]   ;;  %s7686_s9 = inlined_call_operand.vmem [shape: f32[1,256], index: 9, kind: input, shape index: {}]   ;;  %s7687_s10 = inlined_call_operand.vmem [shape: bf16[3,16,8], index: 10, kind: input, shape index: {}]   ;;  %s7688_s12 = inlined_call_operand.vmem [shape: f32[1,128], index: 12, kind: input, shape index: {}]   ;;  %s7689_s14 = inlined_call_operand.vmem [shape: bf16[5,128,64], index: 14, kind: input, shape index: {}]   ;;  %s7690_s13 = inlined_call_operand.vmem [shape: bf16[5,32,16], index: 13, kind: input, shape index: {}]   ;;  %s7691_s15 = inlined_call_operand.vmem [shape: f32[1,64], index: 15, kind: input, shape index: {}]   ;;  %s7692_s17 = inlined_call_operand.vmem [shape: bf16[7,64,128], index: 17, kind: input, shape index: {}]   ;;  %s7693_s16 = inlined_call_operand.vmem [shape: bf16[7,64,32], index: 16, kind: input, shape index: {}]   ;;  %s7694_s18 = inlined_call_operand.vmem [shape: f32[1,128], index: 18, kind: input, shape index: {}]   ;;  %s7695_s19 = inlined_call_operand.vmem [shape: bf16[1,64,128], index: 19, kind: output, shape index: {}]  }
   0x1   :  { %7699 = sst [smem:[#allocation2_spill]] %s7676_s0  ;;  %vm1850_vm4 = vcmask 64512  }
   0x2   :  { %7700 = sst [smem:[#allocation3_spill]] %s7677_s1 }
   0x3   :  { %7701 = sst [smem:[#allocation4_spill]] %s7678_s2 }
   0x4   :  { %7702 = sst [smem:[#allocation5_spill]] %s7679_s3 }
   0x5   :  { %s7703_s20 = sld [smem:[#allocation2_spill]] }
   0x6   :  { %s7704_s26 = sld [smem:[#allocation3_spill]] }
   0x7   :  { %s7705_s25 = sld [smem:[#allocation4_spill]] }
   0x8   :  { %s7706_s3 = sld [smem:[#allocation5_spill]] }
   0xb   :  { %v6402_v0 = vld [vmem:[%s7703_s20 + $0x18] sm:$0xff]  ;;  %v6408_v1 = vld [vmem:[%s7703_s20 + $0x10] sm:$0xff]  ;;  %v6414_v2 = vld [vmem:[%s7703_s20 + $0x8] sm:$0xff] }
   0xc   :  { %120 = vmatpush.bf16.msra.mxu0 %v6402_v0  ;;  %v6420_v3 = vld [vmem:[%s7703_s20] sm:$0xff]  ;;  %v5972_v5 = vld [vmem:[%s7704_s26 + $0x8] sm:$0xff]  ;;  %v5981_v6 = vld [vmem:[%s7704_s26 + $0x10] sm:$0xff] }
   0xd   :  { %v5971_v4 = vld [vmem:[%s7704_s26] sm:$0xff]  ;;  %v5982_v7 = vld [vmem:[%s7704_s26 + $0x18] sm:$0xff]  ;;  %v5992_v9 = vld [vmem:[%s7704_s26 + $0x28] sm:$0xff] }
   0xe   :  { %v5991_v8 = vld [vmem:[%s7704_s26 + $0x20] sm:$0xff]  ;;  %v5990_v10 = vld [vmem:[%s7705_s25 + $0x78] sm:$0xff]  ;;  %v5989_v11 = vld [vmem:[%s7705_s25 + $0x70] sm:$0xff] }
   0xf   :  { %260 = vmatpush.bf16.msra.mxu2 %v5990_v10  ;;  %v5988_v12 = vld [vmem:[%s7705_s25 + $0x68] sm:$0xff]  ;;  %v5987_v13 = vld [vmem:[%s7705_s25 + $0x60] sm:$0xff]  ;;  %v5986_v14 = vld [vmem:[%s7705_s25 + $0x58] sm:$0xff] }
  0x10   :  { %121 = vmatpush.bf16.msra.mxu0 %v6408_v1  ;;  %v5985_v15 = vld [vmem:[%s7705_s25 + $0x50] sm:$0xff]  ;;  %v5984_v17 = vld [vmem:[%s7705_s25 + $0x48] sm:$0xff]  ;;  %v5983_v18 = vld [vmem:[%s7705_s25 + $0x40] sm:$0xff] }
  0x11   :  { %v5980_v20 = vld [vmem:[%s7705_s25 + $0x38] sm:$0xff]  ;;  %v5979_v21 = vld [vmem:[%s7705_s25 + $0x30] sm:$0xff]  ;;  %v5978_v23 = vld [vmem:[%s7705_s25 + $0x28] sm:$0xff] }
  0x12   :  { %v6000_v24 = vld [vmem:[%s7705_s25 + $0xb8] sm:$0xff]  ;;  %v5977_v25 = vld [vmem:[%s7705_s25 + $0x20] sm:$0xff]  ;;  %v5999_v26 = vld [vmem:[%s7705_s25 + $0xb0] sm:$0xff] }
  0x13   :  { %261 = vmatpush.bf16.msra.mxu2 %v5989_v11  ;;  %453 = vmatpush.bf16.msra.mxu1 %v6000_v24  ;;  %v5976_v28 = vld [vmem:[%s7705_s25 + $0x18] sm:$0xff]  ;;  %v5998_v29 = vld [vmem:[%s7705_s25 + $0xa8] sm:$0xff]  ;;  %v5975_v30 = vld [vmem:[%s7705_s25 + $0x10] sm:$0xff] }
  0x14   :  { %122 = vmatpush.bf16.msra.mxu0 %v6414_v2  ;;  %v5997_v31 = vld [vmem:[%s7705_s25 + $0xa0] sm:$0xff]  ;;  %v5974_v33 = vld [vmem:[%s7705_s25 + $0x8] sm:$0xff]  ;;  %v5996_v34 = vld [vmem:[%s7705_s25 + $0x98] sm:$0xff] }
  0x15   :  { %v5973_v35 = vld [vmem:[%s7705_s25] sm:$0xff]  ;;  %v5995_v36 = vld [vmem:[%s7705_s25 + $0x90] sm:$0xff]  ;;  %v5994_v39 = vld [vmem:[%s7705_s25 + $0x88] sm:$0xff] }
  0x16   :  { %v5993_v40 = vld [vmem:[%s7705_s25 + $0x80] sm:$0xff]  ;;  %v6012_v49 = vld [vmem:[%s7704_s26 + $0x48] sm:$0xff]  ;;  %v6001_v55 = vld [vmem:[%s7704_s26 + $0x30] sm:$0xff] }
  0x17   :  { %262 = vmatpush.bf16.msra.mxu2 %v5988_v12  ;;  %454 = vmatpush.bf16.msra.mxu1 %v5999_v26  ;;  %v6011_v44 = vld [vmem:[%s7704_s26 + $0x40] sm:$0xff]  ;;  %v6032_v56 = vld [vmem:[%s7704_s26 + $0x68] sm:$0xff]  ;;  %v6002_v57 = vld [vmem:[%s7704_s26 + $0x38] sm:$0xff] }
  0x18   :  { %123 = vmatpush.bf16.msra.mxu0 %v6420_v3  ;;  %v6031_v54 = vld [vmem:[%s7704_s26 + $0x60] sm:$0xff]  ;;  %v6021_v58 = vld [vmem:[%s7704_s26 + $0x50] sm:$0xff]  ;;  %v6022_v59 = vld [vmem:[%s7704_s26 + $0x58] sm:$0xff] }
  0x19   :  { %v6020_v61 = vld [vmem:[%s7705_s25 + $0x138] sm:$0xff]  ;;  %v6019_v62 = vld [vmem:[%s7705_s25 + $0x130] sm:$0xff]  ;;  %v6014_v12 = vld [vmem:[%s7705_s25 + $0x108] sm:$0xff] }
  0x1a   :  { %v6006_v11 = vld [vmem:[%s7705_s25 + $0xd8] sm:$0xff]  ;;  %v6003_v24 = vld [vmem:[%s7705_s25 + $0xc0] sm:$0xff] }
  0x1b   :  { %4238 = vmatmul.msk.bf16.vlgmr.msra.gmra.mxu0 %vm109_vm0, %v5971_v4  ;;  %263 = vmatpush.bf16.msra.mxu2 %v5987_v13 }
  0x1c   :  { %178 = vmatpush.bf16.msrb.mxu0 %v6402_v0  ;;  %455 = vmatpush.bf16.msra.mxu1 %v5998_v29  ;;  %v6038_v29 = vld [vmem:[%s7705_s25 + $0x1a8] sm:$0xff] }
  0x1f   :  { %264 = vmatpush.bf16.msra.mxu2 %v5986_v14  ;;  %v6005_v14 = vld [vmem:[%s7705_s25 + $0xd0] sm:$0xff] }
  0x20   :  { %179 = vmatpush.bf16.msrb.mxu0 %v6408_v1  ;;  %456 = vmatpush.bf16.msra.mxu1 %v5997_v31  ;;  %v6037_v31 = vld [vmem:[%s7705_s25 + $0x1a0] sm:$0xff] }
  0x23   :  { %265 = vmatpush.bf16.msra.mxu2 %v5985_v15  ;;  %v6013_v15 = vld [vmem:[%s7705_s25 + $0x100] sm:$0xff] }
  0x24   :  { %180 = vmatpush.bf16.msrb.mxu0 %v6414_v2  ;;  %457 = vmatpush.bf16.msra.mxu1 %v5996_v34 }
  0x27   :  { %266 = vmatpush.bf16.msra.mxu2 %v5984_v17 }
  0x28   :  { %181 = vmatpush.bf16.msrb.mxu0 %v6420_v3  ;;  %458 = vmatpush.bf16.msra.mxu1 %v5995_v36  ;;  %v6036_v36 = vld [vmem:[%s7705_s25 + $0x198] sm:$0xff] }
  0x2b   :  { %4239 = vmatmul.msk.bf16.gmra.mxu0 %vm109_vm0, %v5972_v5  ;;  %267 = vmatpush.bf16.msra.mxu2 %v5983_v18  ;;  %v6008_v5 = vld [vmem:[%s7705_s25 + $0xe8] sm:$0xff] }
  0x2c   :  { %371 = vmatpush.bf16.msra.mxu0 %v6402_v0  ;;  %459 = vmatpush.bf16.msra.mxu1 %v5994_v39  ;;  %v6004_v18 = vld [vmem:[%s7705_s25 + $0xc8] sm:$0xff] }
  0x2f   :  { %327 = vmatpush.bf16.msrb.mxu2 %v5980_v20 }
  0x30   :  { %372 = vmatpush.bf16.msra.mxu0 %v6408_v1  ;;  %460 = vmatpush.bf16.msra.mxu1 %v5993_v40  ;;  %v6027_v40 = vld [vmem:[%s7705_s25 + $0x160] sm:$0xff] }
  0x33   :  { %328 = vmatpush.bf16.msrb.mxu2 %v5979_v21 }
  0x34   :  { %373 = vmatpush.bf16.msra.mxu0 %v6414_v2  ;;  %713 = vmatpush.bf16.msrb.mxu1 %v6020_v61 }
  0x37   :  { %329 = vmatpush.bf16.msrb.mxu2 %v5978_v23 }
  0x38   :  { %374 = vmatpush.bf16.msra.mxu0 %v6420_v3  ;;  %714 = vmatpush.bf16.msrb.mxu1 %v6019_v62 }
  0x3b   :  { %4252 = vmatmul.msk.bf16.vlgmr.msrb.gmra.mxu0 %vm109_vm0, %v5981_v6  ;;  %330 = vmatpush.bf16.msrb.mxu2 %v5977_v25  ;;  %v6016_v6 = vld [vmem:[%s7705_s25 + $0x118] sm:$0xff]  ;;  %v6039_v25 = vld [vmem:[%s7705_s25 + $0x1b0] sm:$0xff] }
  0x3c   :  { %631 = vmatpush.bf16.msrb.mxu0 %v6402_v0 }
  0x3f   :  { %331 = vmatpush.bf16.msrb.mxu2 %v5976_v28  ;;  %v6030_v28 = vld [vmem:[%s7705_s25 + $0x178] sm:$0xff] }
  0x40   :  { %632 = vmatpush.bf16.msrb.mxu0 %v6408_v1 }
  0x43   :  { %332 = vmatpush.bf16.msrb.mxu2 %v5975_v30  ;;  %v6029_v30 = vld [vmem:[%s7705_s25 + $0x170] sm:$0xff] }
  0x44   :  { %633 = vmatpush.bf16.msrb.mxu0 %v6414_v2 }
  0x47   :  { %333 = vmatpush.bf16.msrb.mxu2 %v5974_v33 }
  0x48   :  { %634 = vmatpush.bf16.msrb.mxu0 %v6420_v3 }
  0x4b   :  { %4253 = vmatmul.msk.bf16.gmra.mxu0 %vm109_vm0, %v5982_v7  ;;  %334 = vmatpush.bf16.msrb.mxu2 %v5973_v35  ;;  %v6007_v7 = vld [vmem:[%s7705_s25 + $0xe0] sm:$0xff]  ;;  %v6028_v35 = vld [vmem:[%s7705_s25 + $0x168] sm:$0xff] }
  0x5b   :  { %4346 = vmatmul.msk.bf16.vlgmr.msra.gmra.mxu0 %vm109_vm0, %v5991_v8  ;;  %v6015_v8 = vld [vmem:[%s7705_s25 + $0x110] sm:$0xff] }
  0x5c   :  { %891 = vmatpush.bf16.msra.mxu0 %v6402_v0 }
  0x60   :  { %892 = vmatpush.bf16.msra.mxu0 %v6408_v1 }
  0x64   :  { %893 = vmatpush.bf16.msra.mxu0 %v6414_v2 }
  0x68   :  { %894 = vmatpush.bf16.msra.mxu0 %v6420_v3 }
  0x6b   :  { %4347 = vmatmul.msk.bf16.gmra.mxu0 %vm109_vm0, %v5992_v9 }
  0x7b   :  { %4470 = vmatmul.msk.bf16.vlgmr.msrb.gmra.mxu0 %vm109_vm0, %v6011_v44  ;;  %v6026_v44 = vld [vmem:[%s7705_s25 + $0x158] sm:$0xff] }
  0x8b   :  { %4471 = vmatmul.msk.bf16.gmra.mxu0 %vm109_vm0, %v6012_v49 }
  0x98   :  { %v125_v16 = vpop.f32.mrf.mxu0 }
  0x9b   :  { %4594 = vmatmul.msk.bf16.vlgmr.msra.gmra.mxu0 %vm109_vm0, %v6031_v54 }
  0xa0   :  { %v127_v19 = vpop.f32.mrf.mxu0 }
  0xa1   :  { %v135_v47 = vpack.c.bf16 %v127_v19, %v125_v16  ;;  %v6040_v19 = vld [vmem:[%s7705_s25 + $0x1b8] sm:$0xff] }
  0xa8   :  { %v130_v22 = vpop.f32.mrf.mxu0 }
  0xab   :  { %4595 = vmatmul.msk.bf16.gmra.mxu0 %vm109_vm0, %v6032_v56 }
  0xb0   :  { %v132_v27 = vpop.f32.mrf.mxu0 }
  0xb1   :  { %v136_v52 = vpack.c.bf16 %v132_v27, %v130_v22 }
  0xb8   :  { %v183_v32 = vpop.f32.mrf.mxu0 }
  0xc0   :  { %v185_v37 = vpop.f32.mrf.mxu0 }
  0xc1   :  { %v193_v38 = vpack.c.bf16 %v185_v37, %v183_v32 }
  0xc3   :  { %268 = vmatmul.bf16.vlgmr.msra.gmra.mxu2 %v193_v38 }
  0xc4   :  { %501 = vmatpush.bf16.msra.mxu2 %v6402_v0 }
  0xc8   :  { %v188_v41 = vpop.f32.mrf.mxu0  ;;  %502 = vmatpush.bf16.msra.mxu2 %v6408_v1 }
  0xcc   :  { %503 = vmatpush.bf16.msra.mxu2 %v6414_v2 }
  0xd0   :  { %v190_v42 = vpop.f32.mrf.mxu0  ;;  %504 = vmatpush.bf16.msra.mxu2 %v6420_v3 }
  0xd1   :  { %v194_v43 = vpack.c.bf16 %v190_v42, %v188_v41  ;;  %v6035_v41 = vld [vmem:[%s7705_s25 + $0x190] sm:$0xff] }
  0xd3   :  { %273 = vmatmul.bf16.gmra.mxu2 %v194_v43 }
  0xd8   :  { %v376_v45 = vpop.f32.mrf.mxu0 }
  0xe0   :  { %v378_v46 = vpop.f32.mrf.mxu0 }
  0xe1   :  { %v386_v48 = vpack.c.bf16 %v378_v46, %v376_v45  ;;  %v6034_v45 = vld [vmem:[%s7705_s25 + $0x188] sm:$0xff]  ;;  %v6025_v46 = vld [vmem:[%s7705_s25 + $0x150] sm:$0xff] }
  0xe3   :  { %335 = vmatmul.bf16.vlgmr.msrb.gmra.mxu2 %v135_v47  ;;  %461 = vmatmul.bf16.vlgmr.msra.gmra.mxu1 %v386_v48  ;;  %v6033_v47 = vld [vmem:[%s7705_s25 + $0x180] sm:$0xff] }
  0xe4   :  { %761 = vmatpush.bf16.msrb.mxu2 %v6402_v0  ;;  %v6010_v0 = vld [vmem:[%s7705_s25 + $0xf8] sm:$0xff] }
  0xe5   :  { %583 = vmatpush.bf16.msra.mxu3 %v6010_v0 }
  0xe8   :  { %v381_v50 = vpop.f32.mrf.mxu0  ;;  %762 = vmatpush.bf16.msrb.mxu2 %v6408_v1  ;;  %v6018_v1 = vld [vmem:[%s7705_s25 + $0x128] sm:$0xff] }
  0xe9   :  { %715 = vmatpush.bf16.msrb.mxu1 %v6018_v1 }
  0xec   :  { %763 = vmatpush.bf16.msrb.mxu2 %v6414_v2  ;;  %v6009_v2 = vld [vmem:[%s7705_s25 + $0xf0] sm:$0xff] }
  0xed   :  { %584 = vmatpush.bf16.msra.mxu3 %v6009_v2 }
  0xf0   :  { %v383_v51 = vpop.f32.mrf.mxu0  ;;  %764 = vmatpush.bf16.msrb.mxu2 %v6420_v3  ;;  %v6017_v3 = vld [vmem:[%s7705_s25 + $0x120] sm:$0xff] }
  0xf1   :  { %v387_v53 = vpack.c.bf16 %v383_v51, %v381_v50  ;;  %716 = vmatpush.bf16.msrb.mxu1 %v6017_v3  ;;  %585 = vmatpush.bf16.msra.mxu3 %v6008_v5  ;;  %v6024_v50 = vld [vmem:[%s7705_s25 + $0x148] sm:$0xff] }
  0xf3   :  { %340 = vmatmul.bf16.gmra.mxu2 %v136_v52  ;;  %466 = vmatmul.bf16.gmra.mxu1 %v387_v53  ;;  %v6023_v52 = vld [vmem:[%s7705_s25 + $0x140] sm:$0xff] }
  0xf5   :  { %717 = vmatpush.bf16.msrb.mxu1 %v6016_v6  ;;  %586 = vmatpush.bf16.msra.mxu3 %v6007_v7 }
  0xf8   :  { %v636_v10 = vpop.f32.mrf.mxu0 }
  0xf9   :  { %718 = vmatpush.bf16.msrb.mxu1 %v6015_v8  ;;  %587 = vmatpush.bf16.msra.mxu3 %v6006_v11 }
  0xfd   :  { %719 = vmatpush.bf16.msrb.mxu1 %v6014_v12  ;;  %588 = vmatpush.bf16.msra.mxu3 %v6005_v14 }
 0x100   :  { %v638_v17 = vpop.f32.mrf.mxu0 }
 0x101   :  { %720 = vmatpush.bf16.msrb.mxu1 %v6013_v15  ;;  %v646_v21 = vpack.c.bf16 %v638_v17, %v636_v10  ;;  %589 = vmatpush.bf16.msra.mxu3 %v6004_v18  ;;  %v6049_v15 = vld [vmem:[%s7680_s5 + $0x30] sm:$0xff]  ;;  %v6048_v17 = vld [vmem:[%s7680_s5 + $0x28] sm:$0xff] }
 0x103   :  { %4408 = vmatmul.msk.bf16.vlgmr.msra.gmra.mxu2 %vm109_vm0, %v6001_v55 }
 0x104   :  { %721 = vmatmul.bf16.vlgmr.msrb.gmra.mxu1 %v646_v21 }
 0x105   :  { %973 = vmatpush.bf16.msra.mxu1 %v6040_v19  ;;  %590 = vmatpush.bf16.msra.mxu3 %v6003_v24  ;;  %v6047_v19 = vld [vmem:[%s7680_s5 + $0x20] sm:$0xff] }
 0x108   :  { %v641_v27 = vpop.f32.mrf.mxu0 }
 0x109   :  { %974 = vmatpush.bf16.msra.mxu1 %v6039_v25  ;;  %843 = vmatpush.bf16.msrb.mxu3 %v6030_v28 }
 0x10d   :  { %975 = vmatpush.bf16.msra.mxu1 %v6038_v29  ;;  %844 = vmatpush.bf16.msrb.mxu3 %v6029_v30 }
 0x110   :  { %v643_v34 = vpop.f32.mrf.mxu0 }
 0x111   :  { %976 = vmatpush.bf16.msra.mxu1 %v6037_v31  ;;  %v647_v38 = vpack.c.bf16 %v643_v34, %v641_v27  ;;  %845 = vmatpush.bf16.msrb.mxu3 %v6028_v35 }
 0x113   :  { %4409 = vmatmul.msk.bf16.gmra.mxu2 %vm109_vm0, %v6002_v57 }
 0x114   :  { %726 = vmatmul.bf16.gmra.mxu1 %v647_v38 }
 0x115   :  { %977 = vmatpush.bf16.msra.mxu1 %v6036_v36  ;;  %846 = vmatpush.bf16.msrb.mxu3 %v6027_v40 }
 0x118   :  { %v896_v43 = vpop.f32.mrf.mxu0 }
 0x119   :  { %978 = vmatpush.bf16.msra.mxu1 %v6035_v41  ;;  %847 = vmatpush.bf16.msrb.mxu3 %v6026_v44 }
 0x11d   :  { %979 = vmatpush.bf16.msra.mxu1 %v6034_v45  ;;  %848 = vmatpush.bf16.msrb.mxu3 %v6025_v46 }
 0x120   :  { %v898_v49 = vpop.f32.mrf.mxu0 }
 0x121   :  { %980 = vmatpush.bf16.msra.mxu1 %v6033_v47  ;;  %v906_v51 = vpack.c.bf16 %v898_v49, %v896_v43  ;;  %849 = vmatpush.bf16.msrb.mxu3 %v6024_v50 }
 0x123   :  { %4532 = vmatmul.msk.bf16.vlgmr.msrb.gmra.mxu2 %vm109_vm0, %v6021_v58 }
 0x124   :  { %981 = vmatmul.bf16.vlgmr.msra.gmra.mxu1 %v906_v51 }
 0x125   :  { %850 = vmatpush.bf16.msrb.mxu3 %v6023_v52 }
 0x128   :  { %v901_v54 = vpop.f32.mrf.mxu0 }
 0x130   :  { %v903_v57 = vpop.f32.mrf.mxu0 }
 0x131   :  { %v907_v58 = vpack.c.bf16 %v903_v57, %v901_v54  ;;  %v6046_v57 = vld [vmem:[%s7681_s4 + $0x8] sm:$0xff] }
 0x133   :  { %4533 = vmatmul.msk.bf16.gmra.mxu2 %vm109_vm0, %v6022_v59 }
 0x134   :  { %986 = vmatmul.bf16.gmra.mxu1 %v907_v58  ;;  %v6051_v58 = vld [vmem:[%s7681_s4 + $0x10] sm:$0xff] }
 0x146   :  { %v269_v60 = vpop.f32.mrf.mxu2 }
 0x14e   :  { %v6581_v63 = vpop.f32.mrf.mxu2 }
 0x156   :  { %v274_v4 = vpop.f32.mrf.mxu2 }
 0x15e   :  { %v6607_v9 = vpop.f32.mrf.mxu2 }
 0x160   :  { %v462_v13 = vpop.f32.mrf.mxu1 }
 0x166   :  { %v336_v16 = vpop.f32.mrf.mxu2 }
 0x167   :  { %v337_v20 = vadd.f32 %v336_v16, %v269_v60 }
 0x168   :  { %v6629_v23 = vpop.f32.mrf.mxu1 }
 0x169   :  { %v6627_v22 = vadd.f32 %v462_v13, %v337_v20  ;;  %v6050_v13 = vld [vmem:[%s7680_s5 + $0x38] sm:$0xff] }
 0x16a   :  { %1110 = vmatpush.bf16.msrb.mxu0 %v6050_v13  ;;  %v6056_v13 = vld [vmem:[%s7681_s4 + $0x18] sm:$0xff] }
 0x16e   :  { %v6637_v26 = vpop.f32.mrf.mxu2  ;;  %1111 = vmatpush.bf16.msrb.mxu0 %v6049_v15 }
 0x16f   :  { %v339_v24 = vadd.f32 %v6637_v26, %v6581_v63 }
 0x170   :  { %v467_v32 = vpop.f32.mrf.mxu1 }
 0x171   :  { %v473_v25 = vadd.f32 %v6629_v23, %v339_v24  ;;  %v6060_v24 = vld [vmem:[%s7680_s5 + $0x78] sm:$0xff] }
 0x172   :  { %1112 = vmatpush.bf16.msrb.mxu0 %v6048_v17 }
 0x176   :  { %v341_v33 = vpop.f32.mrf.mxu2  ;;  %1113 = vmatpush.bf16.msrb.mxu0 %v6047_v19  ;;  %v6062_v19 = vld [vmem:[%s7680_s5 + $0x80] sm:$0xff] }
 0x177   :  { %v342_v37 = vadd.f32 %v341_v33, %v274_v4 }
 0x178   :  { %v469_v4 = vpop.f32.mrf.mxu1 }
 0x179   :  { %v6657_v39 = vadd.f32 %v467_v32, %v342_v37 }
 0x17e   :  { %v6665_v42 = vpop.f32.mrf.mxu2 }
 0x17f   :  { %v344_v27 = vadd.f32 %v6665_v42, %v6607_v9  ;;  %v6294_v9 = vld [vmem:[%s7706_s3] ss:$0 sm:$0xff] }
 0x181   :  { %v722_v5 = vpop.f32.mrf.mxu1  ;;  %v475_v32 = vadd.f32 %v469_v4, %v344_v27  ;;  %v6065_v4 = vld [vmem:[%s7680_s5 + $0x98] sm:$0xff]  ;;  %v6058_v27 = vld [vmem:[%s7680_s5 + $0x68] sm:$0xff] }
 0x186   :  { %v506_v48 = vpop.f32.mrf.mxu2 }
 0x189   :  { %v724_v6 = vpop.f32.mrf.mxu1 }
 0x18e   :  { %v508_v53 = vpop.f32.mrf.mxu2 }
 0x18f   :  { %v516_v55 = vpack.c.bf16 %v508_v53, %v506_v48 }
 0x191   :  { %591 = vmatmul.bf16.vlgmr.msra.gmra.mxu3 %v516_v55  ;;  %v727_v8 = vpop.f32.mrf.mxu1 }
 0x196   :  { %v511_v56 = vpop.f32.mrf.mxu2 }
 0x199   :  { %v729_v12 = vpop.f32.mrf.mxu1 }
 0x19e   :  { %v513_v59 = vpop.f32.mrf.mxu2 }
 0x19f   :  { %v517_v60 = vpack.c.bf16 %v513_v59, %v511_v56  ;;  %v6041_v56 = vld [vmem:[%s7681_s4] sm:$0xff]  ;;  %v6044_v59 = vld [vmem:[%s7680_s5 + $0x10] sm:$0xff] }
 0x1a1   :  { %596 = vmatmul.bf16.gmra.mxu3 %v517_v60  ;;  %v982_v16 = vpop.f32.mrf.mxu1  ;;  %v6061_v60 = vld [vmem:[%s7681_s4 + $0x20] sm:$0xff] }
 0x1a6   :  { %v766_v61 = vpop.f32.mrf.mxu2 }
 0x1a9   :  { %v984_v20 = vpop.f32.mrf.mxu1 }
 0x1ae   :  { %v768_v62 = vpop.f32.mrf.mxu2 }
 0x1af   :  { %v776_v0 = vpack.c.bf16 %v768_v62, %v766_v61  ;;  %v6043_v61 = vld [vmem:[%s7680_s5 + $0x8] sm:$0xff]  ;;  %v6042_v62 = vld [vmem:[%s7680_s5] sm:$0xff] }
 0x1b1   :  { %851 = vmatmul.bf16.vlgmr.msrb.gmra.mxu3 %v776_v0  ;;  %v987_v30 = vpop.f32.mrf.mxu1  ;;  %v6055_v0 = vld [vmem:[%s7680_s5 + $0x58] sm:$0xff] }
 0x1b6   :  { %v771_v1 = vpop.f32.mrf.mxu2 }
 0x1b9   :  { %v989_v43 = vpop.f32.mrf.mxu1 }
 0x1be   :  { %v773_v2 = vpop.f32.mrf.mxu2 }
 0x1bf   :  { %v777_v3 = vpack.c.bf16 %v773_v2, %v771_v1  ;;  %v6054_v1 = vld [vmem:[%s7680_s5 + $0x50] sm:$0xff]  ;;  %v6053_v2 = vld [vmem:[%s7680_s5 + $0x48] sm:$0xff] }
 0x1c1   :  { %856 = vmatmul.bf16.gmra.mxu3 %v777_v3  ;;  %v6052_v3 = vld [vmem:[%s7680_s5 + $0x40] sm:$0xff] }
 0x214   :  { %v592_v7 = vpop.f32.mrf.mxu3 }
 0x215   :  { %v602_v33 = vadd.f32 %v592_v7, %v6627_v22  ;;  %v6045_v22 = vld [vmem:[%s7680_s5 + $0x18] sm:$0xff] }
 0x216   :  { %1151 = vmatpush.bf16.msrb.mxu1 %v6045_v22 }
 0x217   :  { %v732_v38 = vadd.f32 %v722_v5, %v602_v33 }
 0x21a   :  { %1152 = vmatpush.bf16.msrb.mxu1 %v6044_v59  ;;  %v4865_v59 = vld [vmem:[%s7683_s8 + $0xe8] sm:$0xf0] }
 0x21c   :  { %v594_v10 = vpop.f32.mrf.mxu3 }
 0x21d   :  { %v603_v29 = vadd.f32 %v594_v10, %v473_v25  ;;  %v6059_v25 = vld [vmem:[%s7680_s5 + $0x70] sm:$0xff] }
 0x21e   :  { %1153 = vmatpush.bf16.msrb.mxu1 %v6043_v61 }
 0x21f   :  { %v733_v36 = vadd.f32 %v724_v6, %v603_v29 }
 0x222   :  { %1154 = vmatpush.bf16.msrb.mxu1 %v6042_v62 }
 0x224   :  { %v597_v11 = vpop.f32.mrf.mxu3 }
 0x225   :  { %v604_v28 = vadd.f32 %v597_v11, %v6657_v39 }
 0x226   :  { %1305 = vmatpush.bf16.msra.mxu1 %v6060_v24 }
 0x227   :  { %v734_v34 = vadd.f32 %v727_v8, %v604_v28  ;;  %v6057_v28 = vld [vmem:[%s7680_s5 + $0x60] sm:$0xff] }
 0x22a   :  { %1306 = vmatpush.bf16.msra.mxu1 %v6059_v25 }
 0x22c   :  { %v599_v14 = vpop.f32.mrf.mxu3 }
 0x22d   :  { %v605_v35 = vadd.f32 %v599_v14, %v475_v32 }
 0x22e   :  { %1307 = vmatpush.bf16.msra.mxu1 %v6058_v27 }
 0x22f   :  { %v735_v23 = vadd.f32 %v729_v12, %v605_v35  ;;  %v6097_v35 = vld [vmem:[%s7683_s8 + $0xf4] sm:$0xf0] }
 0x232   :  { %1308 = vmatpush.bf16.msra.mxu1 %v6057_v28  ;;  %v6084_v28 = vld [vmem:[%s7683_s8 + $0x94] sm:$0xf] }
 0x234   :  { %v852_v18 = vpop.f32.mrf.mxu3 }
 0x235   :  { %v862_v63 = vadd.f32 %v852_v18, %v732_v38  ;;  %v6063_v18 = vld [vmem:[%s7680_s5 + $0x88] sm:$0xff] }
 0x236   :  { %v6095_v38 = vld [vmem:[%s7683_s8 + $0xe4] sm:$0xf0] }
 0x237   :  { %v992_v44 = vadd.f32 %v982_v16, %v862_v63  ;;  %v6064_v16 = vld [vmem:[%s7680_s5 + $0x90] sm:$0xff] }
 0x239   :  { %v1000_v49 = vadd.f32 %v6294_v9, %v992_v44  ;;  %v4831_v44 = vld [vmem:[%s7683_s8 + $0xa0] sm:$0xf] }
 0x23b   :  { %v1004_v54 = vmax.f32 %v1000_v49, 0.0 }
 0x23c   :  { %v854_v21 = vpop.f32.mrf.mxu3 }
 0x23d   :  { %v863_v40 = vadd.f32 %v854_v21, %v733_v36 }
 0x23f   :  { %v993_v39 = vadd.f32 %v984_v20, %v863_v40  ;;  %v4855_v40 = vld [vmem:[%s7683_s8 + $0xd0] sm:$0xf] }
 0x241   :  { %v1001_v47 = vadd.f32 %v6294_v9, %v993_v39 }
 0x243   :  { %v1005_v52 = vmax.f32 %v1001_v47, 0.0  ;;  %v4823_v47 = vld [vmem:[%s7683_s8 + $0x90] sm:$0xf] }
 0x244   :  { %v857_v31 = vpop.f32.mrf.mxu3 }
 0x245   :  { %v864_v37 = vadd.f32 %v857_v31, %v734_v34  ;;  %v1008_v55 = vpack.c.bf16 %v1005_v52, %v1004_v54  ;;  %v4871_v34 = vld [vmem:[%s7683_s8 + $0xf0] sm:$0xf]  ;;  %v4815_v52 = vld [vmem:[%s7683_s8 + $0x80] sm:$0xf] }
 0x246   :  { %v4872_v36 = vor.u32 %v6097_v35, %v4871_v34  ;;  %v6081_v34 = vld [vmem:[%s7683_s8 + $0x74] sm:$0xf0] }
 0x247   :  { %v994_v26 = vadd.f32 %v987_v30, %v864_v37  ;;  %v4863_v37 = vld [vmem:[%s7683_s8 + $0xe0] sm:$0xf] }
 0x248   :  { %v4864_v63 = vor.u32 %v6095_v38, %v4863_v37  ;;  %v4937_v37 = vld [vmem:[%s7683_s8 + $0x78] sm:$0xf0] }
 0x249   :  { %v1002_v45 = vadd.f32 %v6294_v9, %v994_v26  ;;  %v6093_v26 = vld [vmem:[%s7683_s8 + $0xd4] sm:$0xf0] }
 0x24b   :  { %v1006_v50 = vmax.f32 %v1002_v45, 0.0  ;;  %v6087_v45 = vld [vmem:[%s7683_s8 + $0xa4] sm:$0xf0] }
 0x24c   :  { %v859_v41 = vpop.f32.mrf.mxu3 }
 0x24d   :  { %v865_v42 = vadd.f32 %v859_v41, %v735_v23  ;;  %v4856_v23 = vor.u32 %v6093_v26, %v4855_v40  ;;  %v4847_v41 = vld [vmem:[%s7683_s8 + $0xc0] sm:$0xf] }
 0x24f   :  { %v995_v46 = vadd.f32 %v989_v43, %v865_v42  ;;  %v4839_v42 = vld [vmem:[%s7683_s8 + $0xb0] sm:$0xf]  ;;  %v6089_v43 = vld [vmem:[%s7683_s8 + $0xb4] sm:$0xf0] }
 0x250   :  { %v4840_v22 = vor.u32 %v6089_v43, %v4839_v42  ;;  %v4929_v42 = vld [vmem:[%s7683_s8 + $0x68] sm:$0xf0]  ;;  %v4795_v43 = vld [vmem:[%s7684_s7 + $0x4] sm:$0xf] }
 0x251   :  { %v1003_v48 = vadd.f32 %v6294_v9, %v995_v46  ;;  %v6091_v9 = vld [vmem:[%s7683_s8 + $0xc4] sm:$0xf0]  ;;  %v4832_v46 = vor.u32 %v6087_v45, %v4831_v44 }
 0x252   :  { %v4848_v39 = vor.u32 %v6091_v9, %v4847_v41  ;;  %v4927_v41 = vld [vmem:[%s7683_s8 + $0x60] sm:$0xf]  ;;  %v6079_v9 = vld [vmem:[%s7683_s8 + $0x64] sm:$0xf0] }
 0x253   :  { %v1007_v51 = vmax.f32 %v1003_v48, 0.0  ;;  %v6085_v48 = vld [vmem:[%s7683_s8 + $0x94] sm:$0xf0]  ;;  %v4928_v44 = vor.u32 %v6079_v9, %v4927_v41 }
 0x254   :  { %v4824_v49 = vor.u32 %v6085_v48, %v4823_v47  ;;  %v6077_v47 = vld [vmem:[%s7683_s8 + $0x54] sm:$0xf0]  ;;  %v6076_v48 = vld [vmem:[%s7683_s8 + $0x54] sm:$0xf] }
 0x255   :  { %v1009_v53 = vpack.c.bf16 %v1007_v51, %v1006_v50 }
 0x257   :  { %1027 = vmatpush.bf16.msra.mxu2 %v1009_v53  ;;  %1061 = vmatpush.bf16.msra.mxu3 %v1009_v53 }
 0x258   :  { %1256 = vmatpush.bf16.msra.mxu0 %v1009_v53 }
 0x25b   :  { %1028 = vmatpush.bf16.msra.mxu2 %v1008_v55  ;;  %1062 = vmatpush.bf16.msra.mxu3 %v1008_v55 }
 0x25c   :  { %1257 = vmatpush.bf16.msra.mxu0 %v1008_v55 }
 0x25e   :  { %4648 = vmatmul.msk.bf16.vlgmr.msra.gmra.mxu2 %vm1017_vm1, %v6041_v56  ;;  %4655 = vmatmul.msk.bf16.vlgmr.msra.gmra.mxu3 %vm1017_vm1, %v6046_v57  ;;  %v4873_v56 = vld [vmem:[%s7683_s8 + $0xf8] sm:$0xf0] }
 0x25f   :  { %1178 = vmatpush.bf16.msrb.mxu2 %v1009_v53  ;;  %1227 = vmatpush.bf16.msrb.mxu3 %v6055_v0  ;;  %v6092_v0 = vld [vmem:[%s7683_s8 + $0xd4] sm:$0xf] }
 0x263   :  { %1179 = vmatpush.bf16.msrb.mxu2 %v1008_v55  ;;  %1228 = vmatpush.bf16.msrb.mxu3 %v6054_v1  ;;  %v4857_v1 = vld [vmem:[%s7683_s8 + $0xd8] sm:$0xf0] }
 0x267   :  { %1334 = vmatpush.bf16.msra.mxu2 %v1009_v53  ;;  %1229 = vmatpush.bf16.msrb.mxu3 %v6053_v2  ;;  %v6083_v53 = vld [vmem:[%s7683_s8 + $0x84] sm:$0xf0]  ;;  %v4860_v2 = vor.u32 %v6092_v0, %v4857_v1  ;;  %v4895_v1 = vld [vmem:[%s7683_s8 + $0x20] sm:$0xf] }
 0x268   :  { %v4816_v54 = vor.u32 %v6083_v53, %v4815_v52  ;;  %v4911_v52 = vld [vmem:[%s7683_s8 + $0x40] sm:$0xf]  ;;  %v6075_v53 = vld [vmem:[%s7683_s8 + $0x44] sm:$0xf0] }
 0x26b   :  { %1335 = vmatpush.bf16.msra.mxu2 %v1008_v55  ;;  %1230 = vmatpush.bf16.msrb.mxu3 %v6052_v3  ;;  %v6096_v55 = vld [vmem:[%s7683_s8 + $0xf4] sm:$0xf]  ;;  %v6090_v3 = vld [vmem:[%s7683_s8 + $0xc4] sm:$0xf] }
 0x26c   :  { %v4876_v57 = vor.u32 %v6096_v55, %v4873_v56  ;;  %v4913_v55 = vld [vmem:[%s7683_s8 + $0x48] sm:$0xf0]  ;;  %v4912_v56 = vor.u32 %v6075_v53, %v4911_v52  ;;  %v4985_v52 = vld [vmem:[%s7683_s8 + $0x130] sm:$0xf]  ;;  %v6105_v53 = vld [vmem:[%s7683_s8 + $0x134] sm:$0xf0] }
 0x26e   :  { %4704 = vmatmul.msk.bf16.vlgmr.msrb.gmra.mxu2 %vm1017_vm1, %v6051_v58  ;;  %v6094_v58 = vld [vmem:[%s7683_s8 + $0xe4] sm:$0xf] }
 0x26f   :  { %1383 = vmatpush.bf16.msra.mxu3 %v6065_v4  ;;  %1555 = vmatpush.bf16.msrb.mxu2 %v4872_v36  ;;  %v4868_v62 = vor.u32 %v6094_v58, %v4865_v59  ;;  %v4849_v4 = vld [vmem:[%s7683_s8 + $0xc8] sm:$0xf0]  ;;  %v6080_v36 = vld [vmem:[%s7683_s8 + $0x74] sm:$0xf]  ;;  %v4903_v58 = vld [vmem:[%s7683_s8 + $0x30] sm:$0xf] }
 0x270   :  { %v6073_v59 = vld [vmem:[%s7683_s8 + $0x34] sm:$0xf0] }
 0x273   :  { %1384 = vmatpush.bf16.msra.mxu3 %v6064_v16  ;;  %1556 = vmatpush.bf16.msrb.mxu2 %v4864_v63  ;;  %v6086_v16 = vld [vmem:[%s7683_s8 + $0xa4] sm:$0xf] }
 0x277   :  { %1385 = vmatpush.bf16.msra.mxu3 %v6063_v18  ;;  %1557 = vmatpush.bf16.msrb.mxu2 %v4856_v23  ;;  %v4940_v23 = vor.u32 %v6080_v36, %v4937_v37 }
 0x27b   :  { %1386 = vmatpush.bf16.msra.mxu3 %v6062_v19  ;;  %1558 = vmatpush.bf16.msrb.mxu2 %v4848_v39  ;;  %v6078_v39 = vld [vmem:[%s7683_s8 + $0x64] sm:$0xf] }
 0x27c   :  { %v4932_v45 = vor.u32 %v6078_v39, %v4929_v42 }
 0x27e   :  { %4768 = vmatmul.msk.bf16.vlgmr.msra.gmra.mxu2 %vm1017_vm1, %v6061_v60 }
 0x27f   :  { %1559 = vmatpush.bf16.msrb.mxu2 %v4840_v22  ;;  %v1404_v22 = vld [vmem:[%s7684_s7] sm:$0xf] }
 0x283   :  { %1560 = vmatpush.bf16.msrb.mxu2 %v4832_v46  ;;  %v4919_v46 = vld [vmem:[%s7683_s8 + $0x50] sm:$0xf] }
 0x287   :  { %1561 = vmatpush.bf16.msrb.mxu2 %v4824_v49  ;;  %v4921_v49 = vld [vmem:[%s7683_s8 + $0x58] sm:$0xf0] }
 0x28b   :  { %1562 = vmatpush.bf16.msrb.mxu2 %v4816_v54  ;;  %v6074_v54 = vld [vmem:[%s7683_s8 + $0x44] sm:$0xf] }
 0x2e1   :  { %v1030_v5 = vpop.f32.mrf.mxu2  ;;  %v1064_v6 = vpop.f32.mrf.mxu3 }
 0x2e9   :  { %v1032_v7 = vpop.f32.mrf.mxu2  ;;  %v1066_v8 = vpop.f32.mrf.mxu3 }
 0x2ea   :  { %v1035_v10 = vpack.c.bf16 %v1032_v7, %v1030_v5  ;;  %v1069_v11 = vpack.c.bf16 %v1066_v8, %v1064_v6 }
 0x2ec   :  { %4680 = vmatmul.msk.bf16.vlgmr.msrb.gmra.mxu0 %vm109_vm0, %v1069_v11  ;;  %4697 = vmatmul.msk.bf16.vlgmr.msrb.gmra.mxu1 %vm109_vm0, %v1035_v10  ;;  %v4852_v10 = vor.u32 %v6090_v3, %v4849_v4  ;;  %v6088_v11 = vld [vmem:[%s7683_s8 + $0xb4] sm:$0xf]  ;;  %v6070_v3 = vld [vmem:[%s7683_s8 + $0x24] sm:$0xf]  ;;  %v4897_v4 = vld [vmem:[%s7683_s8 + $0x28] sm:$0xf0] }
 0x2f1   :  { %v1181_v12 = vpop.f32.mrf.mxu2 }
 0x2f9   :  { %v1183_v14 = vpop.f32.mrf.mxu2 }
 0x2fa   :  { %v1186_v15 = vpack.c.bf16 %v1183_v14, %v1181_v12  ;;  %v4841_v12 = vld [vmem:[%s7683_s8 + $0xb8] sm:$0xf0] }
 0x2fc   :  { %4729 = vmatmul.msk.bf16.vlgmr.msrb.gmra.mxu3 %vm109_vm0, %v1186_v15  ;;  %4736 = vmatmul.msk.bf16.vlgmr.msra.gmra.mxu0 %vm1017_vm1, %v6056_v13  ;;  %v4844_v15 = vor.u32 %v6088_v11, %v4841_v12  ;;  %v4887_v11 = vld [vmem:[%s7683_s8 + $0x10] sm:$0xf]  ;;  %v6069_v12 = vld [vmem:[%s7683_s8 + $0x14] sm:$0xf0] }
 0x2fd   :  { %1568 = vmatpush.bf16.msrb.mxu3 %v4876_v57  ;;  %v4916_v57 = vor.u32 %v6074_v54, %v4913_v55  ;;  %v6104_v54 = vld [vmem:[%s7683_s8 + $0x134] sm:$0xf]  ;;  %v4986_v55 = vor.u32 %v6105_v53, %v4985_v52 }
 0x301   :  { %v1337_v17 = vpop.f32.mrf.mxu2  ;;  %1569 = vmatpush.bf16.msrb.mxu3 %v4868_v62  ;;  %v4904_v62 = vor.u32 %v6073_v59, %v4903_v58  ;;  %v4977_v58 = vld [vmem:[%s7683_s8 + $0x120] sm:$0xf]  ;;  %v6103_v59 = vld [vmem:[%s7683_s8 + $0x124] sm:$0xf0] }
 0x305   :  { %1570 = vmatpush.bf16.msrb.mxu3 %v4860_v2  ;;  %v6071_v2 = vld [vmem:[%s7683_s8 + $0x24] sm:$0xf0] }
 0x309   :  { %v1339_v20 = vpop.f32.mrf.mxu2  ;;  %1571 = vmatpush.bf16.msrb.mxu3 %v4852_v10 }
 0x30a   :  { %v1342_v21 = vpack.c.bf16 %v1339_v20, %v1337_v17  ;;  %v4833_v17 = vld [vmem:[%s7683_s8 + $0xa8] sm:$0xf0]  ;;  %v6295_v20 = vld [vmem:[%s7682_s6] ss:$0 sm:$0xff] }
 0x30b   :  { %v4836_v25 = vor.u32 %v6086_v16, %v4833_v17  ;;  %v4879_v17 = vld [vmem:[%s7683_s8] sm:$0xf] }
 0x30c   :  { %4793 = vmatmul.msk.bf16.vlgmr.msra.gmra.mxu3 %vm109_vm0, %v1342_v21 }
 0x30d   :  { %1572 = vmatpush.bf16.msrb.mxu3 %v4844_v15  ;;  %v4889_v15 = vld [vmem:[%s7683_s8 + $0x18] sm:$0xf0] }
 0x311   :  { %1573 = vmatpush.bf16.msrb.mxu3 %v4836_v25  ;;  %v5017_v25 = vld [vmem:[%s7683_s8 + $0x170] sm:$0xf] }
 0x369   :  { %v1115_v29 = vpop.f32.mrf.mxu0  ;;  %v1156_v50 = vpop.f32.mrf.mxu1 }
 0x36a   :  { %v1157_v5 = vadd.f32 %v1156_v50, %v1115_v29  ;;  %v4825_v29 = vld [vmem:[%s7683_s8 + $0x98] sm:$0xf0]  ;;  %v4920_v50 = vor.u32 %v6077_v47, %v4919_v46  ;;  %v4993_v46 = vld [vmem:[%s7683_s8 + $0x140] sm:$0xf]  ;;  %v6107_v47 = vld [vmem:[%s7683_s8 + $0x144] sm:$0xf0] }
 0x36b   :  { %v4828_v35 = vor.u32 %v6084_v28, %v4825_v29  ;;  %v6112_v28 = vld [vmem:[%s7683_s8 + $0x174] sm:$0xf] }
 0x36d   :  { %1574 = vmatpush.bf16.msrb.mxu3 %v4828_v35  ;;  %v5011_v35 = vld [vmem:[%s7683_s8 + $0x168] sm:$0xf0] }
 0x371   :  { %v6779_v30 = vpop.f32.mrf.mxu0  ;;  %v1158_v60 = vpop.f32.mrf.mxu1 }
 0x372   :  { %v1159_v14 = vadd.f32 %v1158_v60, %v6779_v30  ;;  %v6072_v60 = vld [vmem:[%s7683_s8 + $0x34] sm:$0xf] }
 0x379   :  { %v1259_v31 = vpop.f32.mrf.mxu0 }
 0x37f   :  { %v1232_v51 = vpop.f32.mrf.mxu3 }
 0x380   :  { %v1237_v8 = vadd.f32 %v1232_v51, %v1157_v5  ;;  %v4924_v51 = vor.u32 %v6076_v48, %v4921_v49  ;;  %v4896_v5 = vor.u32 %v6071_v2, %v4895_v1  ;;  %v6106_v48 = vld [vmem:[%s7683_s8 + $0x144] sm:$0xf]  ;;  %v4994_v49 = vor.u32 %v6107_v47, %v4993_v46  ;;  %v4969_v1 = vld [vmem:[%s7683_s8 + $0x110] sm:$0xf]  ;;  %v6101_v2 = vld [vmem:[%s7683_s8 + $0x114] sm:$0xf0] }
 0x381   :  { %v1261_v32 = vpop.f32.mrf.mxu0 }
 0x382   :  { %v1264_v33 = vpack.c.bf16 %v1261_v32, %v1259_v31 }
 0x384   :  { %4761 = vmatmul.msk.bf16.vlgmr.msra.gmra.mxu1 %vm109_vm0, %v1264_v33  ;;  %v4935_v33 = vld [vmem:[%s7683_s8 + $0x70] sm:$0xf] }
 0x385   :  { %v4936_v63 = vor.u32 %v6081_v34, %v4935_v33  ;;  %v6110_v34 = vld [vmem:[%s7683_s8 + $0x164] sm:$0xf] }
 0x386   :  { %v5014_v37 = vor.u32 %v6110_v34, %v5011_v35 }
 0x387   :  { %v1234_v61 = vpop.f32.mrf.mxu3 }
 0x388   :  { %v1238_v18 = vadd.f32 %v1234_v61, %v1159_v14  ;;  %v4905_v61 = vld [vmem:[%s7683_s8 + $0x38] sm:$0xf0]  ;;  %v4888_v14 = vor.u32 %v6069_v12, %v4887_v11  ;;  %v4963_v12 = vld [vmem:[%s7683_s8 + $0x108] sm:$0xf0] }
 0x389   :  { %v4908_v0 = vor.u32 %v6072_v60, %v4905_v61  ;;  %v6102_v60 = vld [vmem:[%s7683_s8 + $0x124] sm:$0xf]  ;;  %v4978_v61 = vor.u32 %v6103_v59, %v4977_v58  ;;  %v6129_v59 = vld [vmem:[%s7685_s11 + $0x70] sm:$0xff] }
 0x38f   :  { %v1388_v6 = vpop.f32.mrf.mxu3 }
 0x397   :  { %v1390_v27 = vpop.f32.mrf.mxu3 }
 0x401   :  { %v1310_v7 = vpop.f32.mrf.mxu1 }
 0x402   :  { %v1315_v13 = vadd.f32 %v1310_v7, %v1237_v8  ;;  %v6082_v7 = vld [vmem:[%s7683_s8 + $0x84] sm:$0xf]  ;;  %v4817_v8 = vld [vmem:[%s7683_s8 + $0x88] sm:$0xf0] }
 0x403   :  { %v4820_v10 = vor.u32 %v6082_v7, %v4817_v8  ;;  %v4961_v7 = vld [vmem:[%s7683_s8 + $0x100] sm:$0xf]  ;;  %v6099_v8 = vld [vmem:[%s7683_s8 + $0x104] sm:$0xf0] }
 0x404   :  { %v1393_v19 = vadd.f32 %v1388_v6, %v1315_v13  ;;  %v4900_v6 = vor.u32 %v6070_v3, %v4897_v4  ;;  %v6068_v13 = vld [vmem:[%s7683_s8 + $0x14] sm:$0xf]  ;;  %v4970_v4 = vor.u32 %v6101_v2, %v4969_v1  ;;  %v4962_v11 = vor.u32 %v6099_v8, %v4961_v7  ;;  %v6127_v1 = vld [vmem:[%s7685_s11 + $0x60] sm:$0xff]  ;;  %v6120_v2 = vld [vmem:[%s7685_s11 + $0x28] sm:$0xff] }
 0x405   :  { %1575 = vmatpush.bf16.msrb.mxu3 %v4820_v10  ;;  %v4892_v16 = vor.u32 %v6068_v13, %v4889_v15  ;;  %v6100_v3 = vld [vmem:[%s7683_s8 + $0x114] sm:$0xf]  ;;  %v6098_v10 = vld [vmem:[%s7683_s8 + $0x104] sm:$0xf]  ;;  %v6139_v15 = vld [vmem:[%s7685_s11 + $0xb8] sm:$0xff] }
 0x406   :  { %v1399_v30 = vadd.f32 %v6295_v20, %v1393_v19  ;;  %v6066_v19 = vld [vmem:[%s7683_s8 + $0x4] sm:$0xf]  ;;  %v4966_v13 = vor.u32 %v6098_v10, %v4963_v12  ;;  %v6117_v7 = vld [vmem:[%s7685_s11 + $0x10] sm:$0xff]  ;;  %v6116_v10 = vld [vmem:[%s7685_s11 + $0x8] sm:$0xff] }
 0x407   :  { %v6125_v8 = vld [vmem:[%s7685_s11 + $0x50] sm:$0xff]  ;;  %v6115_v12 = vld [vmem:[%s7685_s11] sm:$0xff] }
 0x408   :  { %v1401_v38 = vmax.f32 %v1399_v30, 0.0  ;;  %v5019_v30 = vld [vmem:[%s7683_s8 + $0x178] sm:$0xf0] }
 0x409   :  { %v1312_v21 = vpop.f32.mrf.mxu1  ;;  %v5022_v33 = vor.u32 %v6112_v28, %v5019_v30  ;;  %v6136_v30 = vld [vmem:[%s7685_s11 + $0xa0] sm:$0xff] }
 0x40a   :  { %v1316_v24 = vadd.f32 %v1312_v21, %v1238_v18  ;;  %v6067_v18 = vld [vmem:[%s7683_s8 + $0x4] sm:$0xf0]  ;;  %v4881_v21 = vld [vmem:[%s7683_s8 + $0x8] sm:$0xf0] }
 0x40c   :  { %v1394_v31 = vadd.f32 %v1390_v27, %v1316_v24  ;;  %v4884_v24 = vor.u32 %v6066_v19, %v4881_v21  ;;  %v6113_v27 = vld [vmem:[%s7683_s8 + $0x174] sm:$0xf0]  ;;  %v6137_v21 = vld [vmem:[%s7685_s11 + $0xa8] sm:$0xff] }
 0x40d   :  { %v5018_v29 = vor.u32 %v6113_v27, %v5017_v25 }
 0x40e   :  { %v1400_v32 = vadd.f32 %v6295_v20, %v1394_v31  ;;  %v4880_v20 = vor.u32 %v6067_v18, %v4879_v17  ;;  %v5009_v31 = vld [vmem:[%s7683_s8 + $0x160] sm:$0xf]  ;;  %v6138_v17 = vld [vmem:[%s7685_s11 + $0xb0] sm:$0xff] }
 0x40f   :  { %1803 = vmatpush.bf16.msra.mxu3 %v5018_v29  ;;  %v6144_v29 = vld [vmem:[%s7685_s11 + $0xe0] sm:$0xff] }
 0x410   :  { %v1402_v40 = vmax.f32 %v1400_v32, 0.0  ;;  %v6111_v32 = vld [vmem:[%s7683_s8 + $0x164] sm:$0xf0] }
 0x411   :  { %v5010_v36 = vor.u32 %v6111_v32, %v5009_v31 }
 0x412   :  { %v1403_v26 = vpack.c.bf16 %v1402_v40, %v1401_v38  ;;  %v5001_v38 = vld [vmem:[%s7683_s8 + $0x150] sm:$0xf]  ;;  %v6109_v40 = vld [vmem:[%s7683_s8 + $0x154] sm:$0xf0] }
 0x413   :  { %1804 = vmatpush.bf16.msra.mxu3 %v5010_v36 }
 0x414   :  { %1416 = vmatpush.bf16.msrb.mxu0 %v1403_v26  ;;  %1451 = vmatpush.bf16.msrb.mxu1 %v1403_v26 }
 0x415   :  { %1699 = vmatpush.bf16.msra.mxu2 %v1403_v26  ;;  %v5003_v26 = vld [vmem:[%s7683_s8 + $0x158] sm:$0xf0] }
 0x417   :  { %4796 = vmatmul.msk.bf16.vlgmr.msrb.gmra.mxu1 %vm1405_vm2, %v4795_v43  ;;  %4794 = vmatmul.msk.bf16.vlgmr.msrb.gmra.mxu0 %vm1405_vm2, %v1404_v22 }
 0x418   :  { %1661 = vmatpush.bf16.msra.mxu0 %v4936_v63  ;;  %1674 = vmatpush.bf16.msra.mxu1 %v4940_v23  ;;  %v6108_v63 = vld [vmem:[%s7683_s8 + $0x154] sm:$0xf]  ;;  %v5002_v23 = vor.u32 %v6109_v40, %v5001_v38 }
 0x419   :  { %v5006_v41 = vor.u32 %v6108_v63, %v5003_v26  ;;  %v6142_v40 = vld [vmem:[%s7685_s11 + $0xd0] sm:$0xff]  ;;  %v6135_v63 = vld [vmem:[%s7685_s11 + $0x98] sm:$0xff]  ;;  %v6141_v26 = vld [vmem:[%s7685_s11 + $0xc8] sm:$0xff] }
 0x41a   :  { %1805 = vmatpush.bf16.msra.mxu3 %v5002_v23  ;;  %v6134_v23 = vld [vmem:[%s7685_s11 + $0x90] sm:$0xff] }
 0x41c   :  { %1662 = vmatpush.bf16.msra.mxu0 %v4928_v44  ;;  %1675 = vmatpush.bf16.msra.mxu1 %v4932_v45  ;;  %v4941_v45 = vld [vmem:[%s7684_s7 + $0x8] sm:$0xf] }
 0x41e   :  { %1806 = vmatpush.bf16.msra.mxu3 %v4994_v49 }
 0x420   :  { %1663 = vmatpush.bf16.msra.mxu0 %v4920_v50  ;;  %1676 = vmatpush.bf16.msra.mxu1 %v4924_v51  ;;  %v4995_v50 = vld [vmem:[%s7683_s8 + $0x148] sm:$0xf0] }
 0x421   :  { %v4998_v51 = vor.u32 %v6106_v48, %v4995_v50 }
 0x422   :  { %1807 = vmatpush.bf16.msra.mxu3 %v4986_v55  ;;  %v6130_v55 = vld [vmem:[%s7685_s11 + $0x78] sm:$0xff] }
 0x424   :  { %1664 = vmatpush.bf16.msra.mxu0 %v4912_v56  ;;  %1677 = vmatpush.bf16.msra.mxu1 %v4916_v57  ;;  %v4987_v56 = vld [vmem:[%s7683_s8 + $0x138] sm:$0xf0] }
 0x425   :  { %v4990_v57 = vor.u32 %v6104_v54, %v4987_v56  ;;  %v6114_v54 = vld [vmem:[%s7687_s10] sm:$0xff] }
 0x426   :  { %1808 = vmatpush.bf16.msra.mxu3 %v4978_v61  ;;  %v6122_v61 = vld [vmem:[%s7685_s11 + $0x38] sm:$0xff] }
 0x428   :  { %1665 = vmatpush.bf16.msra.mxu0 %v4904_v62  ;;  %1678 = vmatpush.bf16.msra.mxu1 %v4908_v0  ;;  %v4979_v62 = vld [vmem:[%s7683_s8 + $0x128] sm:$0xf0] }
 0x429   :  { %v4982_v0 = vor.u32 %v6102_v60, %v4979_v62  ;;  %v6128_v62 = vld [vmem:[%s7685_s11 + $0x68] sm:$0xff] }
 0x42a   :  { %1809 = vmatpush.bf16.msra.mxu3 %v4970_v4  ;;  %v6126_v4 = vld [vmem:[%s7685_s11 + $0x58] sm:$0xff] }
 0x42c   :  { %1666 = vmatpush.bf16.msra.mxu0 %v4896_v5  ;;  %1679 = vmatpush.bf16.msra.mxu1 %v4900_v6  ;;  %v4971_v5 = vld [vmem:[%s7683_s8 + $0x118] sm:$0xf0] }
 0x42d   :  { %v4974_v6 = vor.u32 %v6100_v3, %v4971_v5  ;;  %v6131_v3 = vld [vmem:[%s7687_s10 + $0x8] sm:$0xff]  ;;  %v6119_v5 = vld [vmem:[%s7685_s11 + $0x20] sm:$0xff] }
 0x42e   :  { %1810 = vmatpush.bf16.msra.mxu3 %v4962_v11  ;;  %v6124_v11 = vld [vmem:[%s7685_s11 + $0x48] sm:$0xff] }
 0x430   :  { %1667 = vmatpush.bf16.msra.mxu0 %v4888_v14  ;;  %1680 = vmatpush.bf16.msra.mxu1 %v4892_v16  ;;  %v6147_v14 = vld [vmem:[%s7685_s11 + $0xf8] sm:$0xff]  ;;  %v6146_v16 = vld [vmem:[%s7685_s11 + $0xf0] sm:$0xff] }
 0x434   :  { %1668 = vmatpush.bf16.msra.mxu0 %v4880_v20  ;;  %1681 = vmatpush.bf16.msra.mxu1 %v4884_v24  ;;  %v6145_v20 = vld [vmem:[%s7685_s11 + $0xe8] sm:$0xff] }
 0x438   :  { %1816 = vmatpush.bf16.msrb.mxu0 %v5022_v33  ;;  %v6143_v33 = vld [vmem:[%s7685_s11 + $0xd8] sm:$0xff] }
 0x43c   :  { %1817 = vmatpush.bf16.msrb.mxu0 %v5014_v37 }
 0x440   :  { %1818 = vmatpush.bf16.msrb.mxu0 %v5006_v41  ;;  %v6140_v41 = vld [vmem:[%s7685_s11 + $0xc0] sm:$0xff] }
 0x444   :  { %1819 = vmatpush.bf16.msrb.mxu0 %v4998_v51 }
 0x448   :  { %1820 = vmatpush.bf16.msrb.mxu0 %v4990_v57 }
 0x44c   :  { %1821 = vmatpush.bf16.msrb.mxu0 %v4982_v0  ;;  %v6121_v0 = vld [vmem:[%s7685_s11 + $0x30] sm:$0xff] }
 0x450   :  { %1822 = vmatpush.bf16.msrb.mxu0 %v4974_v6  ;;  %v6118_v6 = vld [vmem:[%s7685_s11 + $0x18] sm:$0xff] }
 0x454   :  { %1823 = vmatpush.bf16.msrb.mxu0 %v4966_v13  ;;  %v6123_v13 = vld [vmem:[%s7685_s11 + $0x40] sm:$0xff] }
 0x494   :  { %v1453_v9 = vpop.f32.mrf.mxu1  ;;  %v1418_v39 = vpop.f32.mrf.mxu0 }
 0x495   :  { %v1457_v42 = vpack.c.bf16 %v1453_v9, %v1453_v9  ;;  %v1422_v43 = vpack.c.bf16 %v1418_v39, %v1418_v39  ;;  %v6133_v9 = vld [vmem:[%s7685_s11 + $0x88] sm:$0xff]  ;;  %v6132_v39 = vld [vmem:[%s7685_s11 + $0x80] sm:$0xff] }
 0x497   :  { %1563 = vmatmul.bf16.vlgmr.msrb.gmra.mxu2 %v1457_v42  ;;  %1576 = vmatmul.bf16.vlgmr.msrb.gmra.mxu3 %v1457_v42  ;;  %v1831_v42 = vld [vmem:[%s7686_s9] sm:$0x3] }
 0x498   :  { %1669 = vmatmul.bf16.vlgmr.msra.gmra.mxu0 %v1422_v43  ;;  %1682 = vmatmul.bf16.vlgmr.msra.gmra.mxu1 %v1422_v43  ;;  %v1834_v43 = vperm.slane %v1831_v42, 1  ;;  %v1833_v47 = vperm.slane %v1831_v42, 0 }
 0x499   :  { %2107 = vmatpush.bf16.msra.mxu0 %v6147_v14  ;;  %2093 = vmatpush.bf16.msrb.mxu3 %v6139_v15 }
 0x49c   :  { %v1455_v22 = vpop.f32.mrf.mxu1  ;;  %v1420_v44 = vpop.f32.mrf.mxu0 }
 0x49d   :  { %2108 = vmatpush.bf16.msra.mxu0 %v6146_v16  ;;  %2094 = vmatpush.bf16.msrb.mxu3 %v6138_v17 }
 0x4a1   :  { %2109 = vmatpush.bf16.msra.mxu0 %v6145_v20  ;;  %2095 = vmatpush.bf16.msrb.mxu3 %v6137_v21 }
 0x4a5   :  { %2110 = vmatpush.bf16.msra.mxu0 %v6144_v29  ;;  %2096 = vmatpush.bf16.msrb.mxu3 %v6136_v30  ;;  %v6148_v29 = vld [vmem:[%s7687_s10 + $0x10] sm:$0xff]  ;;  %v6164_v30 = vld [vmem:[%s7685_s11 + $0x178] sm:$0xff] }
 0x4a7   :  { %4942 = vmatmul.msk.bf16.vlgmr.msra.gmra.mxu2 %vm1405_vm2, %v4941_v45 }
 0x4a9   :  { %2111 = vmatpush.bf16.msra.mxu0 %v6143_v33  ;;  %2097 = vmatpush.bf16.msrb.mxu3 %v6135_v63  ;;  %v6162_v33 = vld [vmem:[%s7685_s11 + $0x168] sm:$0xff]  ;;  %v6152_v63 = vld [vmem:[%s7685_s11 + $0x118] sm:$0xff] }
 0x4ad   :  { %2112 = vmatpush.bf16.msra.mxu0 %v6142_v40  ;;  %2098 = vmatpush.bf16.msrb.mxu3 %v6134_v23  ;;  %v6159_v40 = vld [vmem:[%s7685_s11 + $0x150] sm:$0xff] }
 0x4ae   :  { %v6151_v23 = vld [vmem:[%s7685_s11 + $0x110] sm:$0xff] }
 0x4b1   :  { %2113 = vmatpush.bf16.msra.mxu0 %v6141_v26  ;;  %2099 = vmatpush.bf16.msrb.mxu3 %v6133_v9  ;;  %v6158_v26 = vld [vmem:[%s7685_s11 + $0x148] sm:$0xff] }
 0x4b2   :  { %v6150_v9 = vld [vmem:[%s7685_s11 + $0x108] sm:$0xff] }
 0x4b5   :  { %2114 = vmatpush.bf16.msra.mxu0 %v6140_v41  ;;  %2100 = vmatpush.bf16.msrb.mxu3 %v6132_v39  ;;  %v6157_v41 = vld [vmem:[%s7685_s11 + $0x140] sm:$0xff] }
 0x4b6   :  { %v6149_v39 = vld [vmem:[%s7685_s11 + $0x100] sm:$0xff] }
 0x515   :  { %v1670_v18 = vpop.f32.mrf.mxu0  ;;  %v1683_v19 = vpop.f32.mrf.mxu1 }
 0x51a   :  { %v1564_v24 = vpop.f32.mrf.mxu2  ;;  %v1577_v25 = vpop.f32.mrf.mxu3 }
 0x51b   :  { %v1671_v27 = vadd.f32 %v1670_v18, %v1564_v24  ;;  %v1684_v28 = vadd.f32 %v1683_v19, %v1577_v25 }
 0x51d   :  { %v1672_v31 = vpop.f32.mrf.mxu0  ;;  %v1685_v32 = vpop.f32.mrf.mxu1 }
 0x51e   :  { %v6163_v31 = vld [vmem:[%s7685_s11 + $0x170] sm:$0xff]  ;;  %v6156_v32 = vld [vmem:[%s7685_s11 + $0x138] sm:$0xff] }
 0x522   :  { %v1566_v34 = vpop.f32.mrf.mxu2  ;;  %v1579_v35 = vpop.f32.mrf.mxu3 }
 0x523   :  { %v6155_v34 = vld [vmem:[%s7685_s11 + $0x130] sm:$0xff]  ;;  %v6161_v35 = vld [vmem:[%s7685_s11 + $0x160] sm:$0xff] }
 0x52a   :  { %v1701_v36 = vpop.f32.mrf.mxu2 }
 0x52b   :  { %v1705_v37 = vpack.c.bf16 %v1701_v36, %v1701_v36  ;;  %v6154_v36 = vld [vmem:[%s7685_s11 + $0x128] sm:$0xff] }
 0x52d   :  { %1811 = vmatmul.bf16.vlgmr.msra.gmra.mxu3 %v1705_v37  ;;  %1824 = vmatmul.bf16.vlgmr.msrb.gmra.mxu0 %v1705_v37  ;;  %v6160_v37 = vld [vmem:[%s7685_s11 + $0x158] sm:$0xff] }
 0x532   :  { %v1703_v38 = vpop.f32.mrf.mxu2 }
 0x533   :  { %v6153_v38 = vld [vmem:[%s7685_s11 + $0x120] sm:$0xff] }
 0x5aa   :  { %v1825_v22 = vpop.f32.mrf.mxu0 }
 0x5ab   :  { %v1830_v44 = vadd.f32 %v1825_v22, %v1684_v28 }
 0x5ad   :  { %v1838_v45 = vadd.f32 %v1834_v43, %v1830_v44 }
 0x5af   :  { %v1840_v46 = vmax.f32 %v1838_v45, 0.0 }
 0x5b0   :  { %v1812_v48 = vpop.f32.mrf.mxu3 }
 0x5b1   :  { %v1842_v49 = vpack.c.bf16 %v1840_v46, %v1840_v46  ;;  %v1829_v50 = vadd.f32 %v1812_v48, %v1671_v27 }
 0x5b2   :  { %v1827_v51 = vpop.f32.mrf.mxu0 }
 0x5b3   :  { %v1837_v52 = vadd.f32 %v1833_v47, %v1829_v50  ;;  %v1859_v53 = vsel %vm1854_vm3, %v1842_v49, 0 }
 0x5b4   :  { %1882 = vmatpush.bf16.msrb.mxu2 %v1859_v53  ;;  %2277 = vmatpush.bf16.msrb.mxu0 %v1859_v53 }
 0x5b5   :  { %v1839_v56 = vmax.f32 %v1837_v52, 0.0 }
 0x5b7   :  { %v1841_v57 = vpack.c.bf16 %v1839_v56, %v1839_v56  ;;  %5028 = vmatmul.msk.bf16.vlgmr.msrb.gmra.mxu2 %vm1850_vm4, %v6114_v54 }
 0x5b8   :  { %1955 = vmatpush.bf16.msra.mxu2 %v1859_v53  ;;  %v1814_v58 = vpop.f32.mrf.mxu3 }
 0x5b9   :  { %v1856_v60 = vsel %vm1854_vm3, %v1841_v57, 0 }
 0x5ba   :  { %1868 = vmatpush.bf16.msrb.mxu1 %v1856_v60  ;;  %2263 = vmatpush.bf16.msra.mxu3 %v1856_v60 }
 0x5bc   :  { %2231 = vmatpush.bf16.msrb.mxu2 %v6130_v55 }
 0x5bd   :  { %5027 = vmatmul.msk.bf16.vlgmr.msrb.gmra.mxu1 %vm1850_vm4, %v6114_v54 }
 0x5be   :  { %1941 = vmatpush.bf16.msra.mxu1 %v1856_v60 }
 0x5c0   :  { %2232 = vmatpush.bf16.msrb.mxu2 %v6129_v59 }
 0x5c2   :  { %2217 = vmatpush.bf16.msrb.mxu1 %v6122_v61 }
 0x5c4   :  { %2233 = vmatpush.bf16.msrb.mxu2 %v6128_v62 }
 0x5c6   :  { %2218 = vmatpush.bf16.msrb.mxu1 %v6121_v0 }
 0x5c7   :  { %5036 = vmatmul.msk.bf16.vlgmr.msra.gmra.mxu2 %vm1850_vm4, %v6131_v3 }
 0x5c8   :  { %2234 = vmatpush.bf16.msrb.mxu2 %v6127_v1  ;;  %v6296_v1 = vld [vmem:[%s7688_s12] ss:$0 sm:$0xff] }
 0x5ca   :  { %2219 = vmatpush.bf16.msrb.mxu1 %v6120_v2 }
 0x5cc   :  { %2235 = vmatpush.bf16.msrb.mxu2 %v6126_v4 }
 0x5cd   :  { %5035 = vmatmul.msk.bf16.vlgmr.msra.gmra.mxu1 %vm1850_vm4, %v6131_v3 }
 0x5ce   :  { %2220 = vmatpush.bf16.msrb.mxu1 %v6119_v5 }
 0x5d0   :  { %2236 = vmatpush.bf16.msrb.mxu2 %v6125_v8 }
 0x5d2   :  { %2221 = vmatpush.bf16.msrb.mxu1 %v6118_v6 }
 0x5d4   :  { %2237 = vmatpush.bf16.msrb.mxu2 %v6124_v11 }
 0x5d6   :  { %2222 = vmatpush.bf16.msrb.mxu1 %v6117_v7 }
 0x5d8   :  { %2238 = vmatpush.bf16.msrb.mxu2 %v6123_v13 }
 0x5da   :  { %2223 = vmatpush.bf16.msrb.mxu1 %v6116_v10 }
 0x5dc   :  { %2429 = vmatpush.bf16.msra.mxu2 %v6164_v30  ;;  %v6168_v30 = vld [vmem:[%s7689_s14 + $0x8] sm:$0xff] }
 0x5de   :  { %2224 = vmatpush.bf16.msrb.mxu1 %v6115_v12  ;;  %v6174_v12 = vld [vmem:[%s7689_s14 + $0x38] sm:$0xff] }
 0x5e0   :  { %2430 = vmatpush.bf16.msra.mxu2 %v6163_v31  ;;  %v6183_v31 = vld [vmem:[%s7689_s14 + $0x70] sm:$0xff] }
 0x5e2   :  { %2415 = vmatpush.bf16.msra.mxu1 %v6156_v32  ;;  %v6193_v32 = vld [vmem:[%s7689_s14 + $0xb0] sm:$0xff] }
 0x5e4   :  { %2431 = vmatpush.bf16.msra.mxu2 %v6162_v33  ;;  %v6167_v33 = vld [vmem:[%s7689_s14] sm:$0xff] }
 0x5e6   :  { %2416 = vmatpush.bf16.msra.mxu1 %v6155_v34  ;;  %v6182_v34 = vld [vmem:[%s7689_s14 + $0x68] sm:$0xff] }
 0x5e8   :  { %2432 = vmatpush.bf16.msra.mxu2 %v6161_v35  ;;  %v6192_v35 = vld [vmem:[%s7689_s14 + $0xa8] sm:$0xff] }
 0x5ea   :  { %2417 = vmatpush.bf16.msra.mxu1 %v6154_v36  ;;  %v6181_v36 = vld [vmem:[%s7689_s14 + $0x60] sm:$0xff] }
 0x5ec   :  { %2433 = vmatpush.bf16.msra.mxu2 %v6160_v37  ;;  %v6191_v37 = vld [vmem:[%s7689_s14 + $0xa0] sm:$0xff] }
 0x5ee   :  { %2418 = vmatpush.bf16.msra.mxu1 %v6153_v38  ;;  %v6195_v38 = vld [vmem:[%s7690_s13 + $0x30] sm:$0xff] }
 0x5f0   :  { %2434 = vmatpush.bf16.msra.mxu2 %v6159_v40  ;;  %v6180_v40 = vld [vmem:[%s7689_s14 + $0x58] sm:$0xff] }
 0x5f2   :  { %2419 = vmatpush.bf16.msra.mxu1 %v6152_v63  ;;  %v6190_v63 = vld [vmem:[%s7689_s14 + $0x98] sm:$0xff] }
 0x5f4   :  { %2435 = vmatpush.bf16.msra.mxu2 %v6158_v26  ;;  %v6196_v26 = vld [vmem:[%s7690_s13 + $0x38] sm:$0xff] }
 0x5f6   :  { %2420 = vmatpush.bf16.msra.mxu1 %v6151_v23  ;;  %v6179_v23 = vld [vmem:[%s7689_s14 + $0x50] sm:$0xff] }
 0x5f8   :  { %2436 = vmatpush.bf16.msra.mxu2 %v6157_v41  ;;  %v6189_v41 = vld [vmem:[%s7689_s14 + $0x90] sm:$0xff] }
 0x5fa   :  { %2421 = vmatpush.bf16.msra.mxu1 %v6150_v9  ;;  %v6178_v9 = vld [vmem:[%s7689_s14 + $0x48] sm:$0xff] }
 0x5fe   :  { %2422 = vmatpush.bf16.msra.mxu1 %v6149_v39  ;;  %v6188_v39 = vld [vmem:[%s7689_s14 + $0x88] sm:$0xff] }
 0x63a   :  { %v1870_v14 = vpop.f32.mrf.mxu1  ;;  %v1884_v15 = vpop.f32.mrf.mxu2 }
 0x642   :  { %v1872_v16 = vpop.f32.mrf.mxu1  ;;  %v1886_v17 = vpop.f32.mrf.mxu2 }
 0x643   :  { %v1889_v18 = vpack.c.bf16 %v1872_v16, %v1870_v14  ;;  %v1890_v19 = vpack.c.bf16 %v1886_v17, %v1884_v15  ;;  %v6165_v14 = vld [vmem:[%s7690_s13] sm:$0xff]  ;;  %v6175_v15 = vld [vmem:[%s7690_s13 + $0x10] sm:$0xff] }
 0x644   :  { %v6185_v16 = vld [vmem:[%s7690_s13 + $0x20] sm:$0xff]  ;;  %v6173_v17 = vld [vmem:[%s7689_s14 + $0x30] sm:$0xff] }
 0x645   :  { %2225 = vmatmul.bf16.vlgmr.msrb.gmra.mxu1 %v1889_v18  ;;  %2239 = vmatmul.bf16.vlgmr.msrb.gmra.mxu2 %v1890_v19  ;;  %v6172_v18 = vld [vmem:[%s7689_s14 + $0x28] sm:$0xff]  ;;  %v6171_v19 = vld [vmem:[%s7689_s14 + $0x20] sm:$0xff] }
 0x64a   :  { %v1943_v20 = vpop.f32.mrf.mxu1  ;;  %v1957_v21 = vpop.f32.mrf.mxu2 }
 0x652   :  { %v1945_v24 = vpop.f32.mrf.mxu1  ;;  %v1959_v25 = vpop.f32.mrf.mxu2 }
 0x653   :  { %v1962_v27 = vpack.c.bf16 %v1945_v24, %v1943_v20  ;;  %v1963_v28 = vpack.c.bf16 %v1959_v25, %v1957_v21  ;;  %v6170_v20 = vld [vmem:[%s7689_s14 + $0x18] sm:$0xff]  ;;  %v6166_v21 = vld [vmem:[%s7690_s13 + $0x8] sm:$0xff] }
 0x654   :  { %v6176_v24 = vld [vmem:[%s7690_s13 + $0x18] sm:$0xff]  ;;  %v6186_v25 = vld [vmem:[%s7690_s13 + $0x28] sm:$0xff] }
 0x655   :  { %2101 = vmatmul.bf16.vlgmr.msrb.gmra.mxu3 %v1962_v27  ;;  %2115 = vmatmul.bf16.vlgmr.msra.gmra.mxu0 %v1963_v28  ;;  %v6169_v27 = vld [vmem:[%s7689_s14 + $0x10] sm:$0xff]  ;;  %v6184_v28 = vld [vmem:[%s7689_s14 + $0x78] sm:$0xff] }
 0x665   :  { %5203 = vmatmul.msk.bf16.vlgmr.msra.gmra.mxu3 %vm1850_vm4, %v6148_v29  ;;  %5204 = vmatmul.msk.bf16.vlgmr.msrb.gmra.mxu0 %vm1850_vm4, %v6148_v29  ;;  %v6194_v29 = vld [vmem:[%s7689_s14 + $0xb8] sm:$0xff] }
 0x666   :  { %2811 = vmatpush.bf16.msrb.mxu2 %v6194_v29 }
 0x66a   :  { %2812 = vmatpush.bf16.msrb.mxu2 %v6193_v32 }
 0x66e   :  { %2813 = vmatpush.bf16.msrb.mxu2 %v6192_v35 }
 0x672   :  { %2814 = vmatpush.bf16.msrb.mxu2 %v6191_v37 }
 0x676   :  { %2815 = vmatpush.bf16.msrb.mxu2 %v6190_v63 }
 0x67a   :  { %2816 = vmatpush.bf16.msrb.mxu2 %v6189_v41  ;;  %v6230_v41 = vld [vmem:[%s7692_s17 + $0x38] sm:$0xff] }
 0x67e   :  { %2817 = vmatpush.bf16.msrb.mxu2 %v6188_v39  ;;  %v6229_v39 = vld [vmem:[%s7692_s17 + $0x30] sm:$0xff] }
 0x6c2   :  { %v2226_v52 = vpop.f32.mrf.mxu1 }
 0x6c8   :  { %v2240_v53 = vpop.f32.mrf.mxu2 }
 0x6ca   :  { %v2228_v54 = vpop.f32.mrf.mxu1 }
 0x6d0   :  { %v2242_v55 = vpop.f32.mrf.mxu2 }
 0x6d2   :  { %v2116_v42 = vpop.f32.mrf.mxu0 }
 0x6d8   :  { %v2102_v43 = vpop.f32.mrf.mxu3 }
 0x6d9   :  { %v2117_v22 = vadd.f32 %v2116_v42, %v2102_v43  ;;  %v6177_v42 = vld [vmem:[%s7689_s14 + $0x40] sm:$0xff] }
 0x6da   :  { %v2118_v44 = vpop.f32.mrf.mxu0  ;;  %v6187_v43 = vld [vmem:[%s7689_s14 + $0x80] sm:$0xff] }
 0x6db   :  { %v2227_v58 = vadd.f32 %v2226_v52, %v2117_v22  ;;  %2818 = vmatpush.bf16.msrb.mxu2 %v6187_v43  ;;  %v6204_v22 = vld [vmem:[%s7689_s14 + $0xf8] sm:$0xff]  ;;  %v6228_v43 = vld [vmem:[%s7692_s17 + $0x28] sm:$0xff] }
 0x6dd   :  { %v2241_v62 = vadd.f32 %v2240_v53, %v2227_v58  ;;  %v6197_v53 = vld [vmem:[%s7689_s14 + $0xc0] sm:$0xff] }
 0x6e0   :  { %v2104_v45 = vpop.f32.mrf.mxu3 }
 0x6e1   :  { %v2119_v59 = vadd.f32 %v2118_v44, %v2104_v45  ;;  %v6203_v44 = vld [vmem:[%s7689_s14 + $0xf0] sm:$0xff]  ;;  %v6202_v45 = vld [vmem:[%s7689_s14 + $0xe8] sm:$0xff] }
 0x6e2   :  { %v2279_v46 = vpop.f32.mrf.mxu0 }
 0x6e3   :  { %v2229_v61 = vadd.f32 %v2228_v54, %v2119_v59 }
 0x6e5   :  { %v2243_v4 = vadd.f32 %v2242_v55, %v2229_v61 }
 0x6e8   :  { %v2265_v47 = vpop.f32.mrf.mxu3 }
 0x6ea   :  { %v2281_v48 = vpop.f32.mrf.mxu0 }
 0x6eb   :  { %v2285_v49 = vpack.c.bf16 %v2281_v48, %v2279_v46  ;;  %v6201_v46 = vld [vmem:[%s7689_s14 + $0xe0] sm:$0xff]  ;;  %v6199_v48 = vld [vmem:[%s7689_s14 + $0xd0] sm:$0xff] }
 0x6ed   :  { %2437 = vmatmul.bf16.vlgmr.msra.gmra.mxu2 %v2285_v49 }
 0x6f0   :  { %v2267_v50 = vpop.f32.mrf.mxu3 }
 0x6f1   :  { %v2284_v51 = vpack.c.bf16 %v2267_v50, %v2265_v47  ;;  %v6200_v47 = vld [vmem:[%s7689_s14 + $0xd8] sm:$0xff] }
 0x6f3   :  { %2423 = vmatmul.bf16.vlgmr.msra.gmra.mxu1 %v2284_v51  ;;  %v6198_v51 = vld [vmem:[%s7689_s14 + $0xc8] sm:$0xff] }
 0x770   :  { %v2424_v56 = vpop.f32.mrf.mxu1  ;;  %v2438_v57 = vpop.f32.mrf.mxu2 }
 0x771   :  { %v2439_v60 = vadd.f32 %v2438_v57, %v2424_v56 }
 0x773   :  { %v2443_v0 = vadd.f32 %v2439_v60, %v2241_v62 }
 0x775   :  { %v2449_v6 = vadd.f32 %v6296_v1, %v2443_v0 }
 0x777   :  { %v2451_v10 = vmax.f32 %v2449_v6, 0.0 }
 0x778   :  { %v2426_v2 = vpop.f32.mrf.mxu1  ;;  %v2440_v3 = vpop.f32.mrf.mxu2 }
 0x779   :  { %v2441_v5 = vadd.f32 %v2440_v3, %v2426_v2 }
 0x77b   :  { %v2444_v7 = vadd.f32 %v2441_v5, %v2243_v4 }
 0x77d   :  { %v2450_v8 = vadd.f32 %v6296_v1, %v2444_v7 }
 0x77f   :  { %v2452_v11 = vmax.f32 %v2450_v8, 0.0 }
 0x781   :  { %v2453_v13 = vpack.c.bf16 %v2452_v11, %v2451_v10  ;;  %v6205_v10 = vld [vmem:[%s7690_s13 + $0x40] sm:$0xff] }
 0x783   :  { %2481 = vmatpush.bf16.msrb.mxu3 %v2453_v13  ;;  %2539 = vmatpush.bf16.msra.mxu0 %v2453_v13 }
 0x784   :  { %2732 = vmatpush.bf16.msrb.mxu1 %v2453_v13 }
 0x786   :  { %5309 = vmatmul.msk.bf16.vlgmr.msrb.gmra.mxu3 %vm1405_vm2, %v6165_v14  ;;  %5323 = vmatmul.msk.bf16.vlgmr.msra.gmra.mxu0 %vm1405_vm2, %v6175_v15  ;;  %v6206_v14 = vld [vmem:[%s7690_s13 + $0x48] sm:$0xff]  ;;  %v6214_v15 = vld [vmem:[%s7689_s14 + $0x138] sm:$0xff] }
 0x787   :  { %2685 = vmatpush.bf16.msrb.mxu0 %v6174_v12  ;;  %5417 = vmatmul.msk.bf16.vlgmr.msrb.gmra.mxu1 %vm1405_vm2, %v6185_v16  ;;  %v6213_v16 = vld [vmem:[%s7689_s14 + $0x130] sm:$0xff] }
 0x788   :  { %2862 = vmatpush.bf16.msra.mxu1 %v2453_v13  ;;  %2618 = vmatpush.bf16.msra.mxu3 %v6184_v28 }
 0x789   :  { %3071 = vmatpush.bf16.msra.mxu2 %v6214_v15 }
 0x78b   :  { %2686 = vmatpush.bf16.msrb.mxu0 %v6173_v17  ;;  %v6212_v17 = vld [vmem:[%s7689_s14 + $0x128] sm:$0xff] }
 0x78c   :  { %2619 = vmatpush.bf16.msra.mxu3 %v6183_v31 }
 0x78d   :  { %3072 = vmatpush.bf16.msra.mxu2 %v6213_v16  ;;  %v6215_v16 = vld [vmem:[%s7693_s16] sm:$0xff] }
 0x78f   :  { %2687 = vmatpush.bf16.msrb.mxu0 %v6172_v18  ;;  %v6211_v18 = vld [vmem:[%s7689_s14 + $0x120] sm:$0xff] }
 0x790   :  { %2620 = vmatpush.bf16.msra.mxu3 %v6182_v34 }
 0x791   :  { %3073 = vmatpush.bf16.msra.mxu2 %v6212_v17  ;;  %v6223_v17 = vld [vmem:[%s7693_s16 + $0x20] sm:$0xff] }
 0x793   :  { %2688 = vmatpush.bf16.msrb.mxu0 %v6171_v19  ;;  %v6210_v19 = vld [vmem:[%s7689_s14 + $0x118] sm:$0xff] }
 0x794   :  { %2621 = vmatpush.bf16.msra.mxu3 %v6181_v36 }
 0x795   :  { %3074 = vmatpush.bf16.msra.mxu2 %v6211_v18  ;;  %v6216_v18 = vld [vmem:[%s7693_s16 + $0x8] sm:$0xff] }
 0x796   :  { %5310 = vmatmul.msk.bf16.gmra.mxu3 %vm1405_vm2, %v6166_v21  ;;  %5324 = vmatmul.msk.bf16.gmra.mxu0 %vm1405_vm2, %v6176_v24  ;;  %v6208_v24 = vld [vmem:[%s7689_s14 + $0x108] sm:$0xff] }
 0x797   :  { %2689 = vmatpush.bf16.msrb.mxu0 %v6170_v20  ;;  %5418 = vmatmul.msk.bf16.gmra.mxu1 %vm1405_vm2, %v6186_v25  ;;  %v6209_v20 = vld [vmem:[%s7689_s14 + $0x110] sm:$0xff]  ;;  %v6207_v25 = vld [vmem:[%s7689_s14 + $0x100] sm:$0xff] }
 0x798   :  { %2622 = vmatpush.bf16.msra.mxu3 %v6180_v40 }
 0x799   :  { %3075 = vmatpush.bf16.msra.mxu2 %v6210_v19  ;;  %v6224_v19 = vld [vmem:[%s7693_s16 + $0x28] sm:$0xff] }
 0x79b   :  { %2690 = vmatpush.bf16.msrb.mxu0 %v6169_v27 }
 0x79c   :  { %2623 = vmatpush.bf16.msra.mxu3 %v6179_v23 }
 0x79d   :  { %3076 = vmatpush.bf16.msra.mxu2 %v6209_v20  ;;  %v6217_v20 = vld [vmem:[%s7693_s16 + $0x10] sm:$0xff] }
 0x79f   :  { %2691 = vmatpush.bf16.msrb.mxu0 %v6168_v30 }
 0x7a0   :  { %2624 = vmatpush.bf16.msra.mxu3 %v6178_v9 }
 0x7a1   :  { %3077 = vmatpush.bf16.msra.mxu2 %v6208_v24  ;;  %v6218_v24 = vld [vmem:[%s7693_s16 + $0x18] sm:$0xff] }
 0x7a3   :  { %2692 = vmatpush.bf16.msrb.mxu0 %v6167_v33 }
 0x7a4   :  { %2625 = vmatpush.bf16.msra.mxu3 %v6177_v42 }
 0x7a5   :  { %3078 = vmatpush.bf16.msra.mxu2 %v6207_v25  ;;  %v6226_v25 = vld [vmem:[%s7693_s16 + $0x38] sm:$0xff] }
 0x7a7   :  { %2992 = vmatpush.bf16.msra.mxu0 %v2453_v13  ;;  %5479 = vmatmul.msk.bf16.vlgmr.msra.gmra.mxu1 %vm1405_vm2, %v6195_v38 }
 0x7a8   :  { %2941 = vmatpush.bf16.msrb.mxu3 %v6204_v22  ;;  %v6227_v22 = vld [vmem:[%s7692_s17 + $0x20] sm:$0xff] }
 0x7ac   :  { %2942 = vmatpush.bf16.msrb.mxu3 %v6203_v44 }
 0x7b0   :  { %2943 = vmatpush.bf16.msrb.mxu3 %v6202_v45 }
 0x7b4   :  { %2944 = vmatpush.bf16.msrb.mxu3 %v6201_v46 }
 0x7b7   :  { %5480 = vmatmul.msk.bf16.gmra.mxu1 %vm1405_vm2, %v6196_v26 }
 0x7b8   :  { %2945 = vmatpush.bf16.msrb.mxu3 %v6200_v47 }
 0x7bc   :  { %2946 = vmatpush.bf16.msrb.mxu3 %v6199_v48 }
 0x7c0   :  { %2947 = vmatpush.bf16.msrb.mxu3 %v6198_v51 }
 0x7c4   :  { %2948 = vmatpush.bf16.msrb.mxu3 %v6197_v53 }
 0x803   :  { %v2541_v49 = vpop.f32.mrf.mxu0 }
 0x804   :  { %v2734_v50 = vpop.f32.mrf.mxu1 }
 0x809   :  { %v2483_v52 = vpop.f32.mrf.mxu3 }
 0x80b   :  { %v2543_v54 = vpop.f32.mrf.mxu0 }
 0x80c   :  { %v2551_v55 = vpack.c.bf16 %v2543_v54, %v2541_v49  ;;  %v2736_v56 = vpop.f32.mrf.mxu1 }
 0x80d   :  { %v2744_v57 = vpack.c.bf16 %v2736_v56, %v2734_v50 }
 0x80e   :  { %2626 = vmatmul.bf16.vlgmr.msra.gmra.mxu3 %v2551_v55 }
 0x80f   :  { %2819 = vmatmul.bf16.vlgmr.msrb.gmra.mxu2 %v2744_v57 }
 0x811   :  { %v2485_v58 = vpop.f32.mrf.mxu3 }
 0x812   :  { %v2493_v59 = vpack.c.bf16 %v2485_v58, %v2483_v52 }
 0x813   :  { %v2546_v60 = vpop.f32.mrf.mxu0 }
 0x814   :  { %v2739_v61 = vpop.f32.mrf.mxu1  ;;  %2693 = vmatmul.bf16.vlgmr.msrb.gmra.mxu0 %v2493_v59 }
 0x815   :  { %3312 = vmatpush.bf16.msrb.mxu0 %v6230_v41 }
 0x819   :  { %v2488_v62 = vpop.f32.mrf.mxu3  ;;  %3313 = vmatpush.bf16.msrb.mxu0 %v6229_v39  ;;  %v6238_v39 = vld [vmem:[%s7692_s17 + $0x58] sm:$0xff] }
 0x81b   :  { %v2548_v0 = vpop.f32.mrf.mxu0 }
 0x81c   :  { %v2552_v1 = vpack.c.bf16 %v2548_v0, %v2546_v60  ;;  %v2741_v2 = vpop.f32.mrf.mxu1  ;;  %v6297_v0 = vld [vmem:[%s7691_s15] ss:$0 sm:$0xff] }
 0x81d   :  { %v2745_v3 = vpack.c.bf16 %v2741_v2, %v2739_v61  ;;  %3314 = vmatpush.bf16.msrb.mxu0 %v6228_v43 }
 0x81e   :  { %2631 = vmatmul.bf16.gmra.mxu3 %v2552_v1 }
 0x81f   :  { %2824 = vmatmul.bf16.gmra.mxu2 %v2745_v3 }
 0x821   :  { %v2490_v4 = vpop.f32.mrf.mxu3  ;;  %3315 = vmatpush.bf16.msrb.mxu0 %v6227_v22  ;;  %v6237_v22 = vld [vmem:[%s7692_s17 + $0x50] sm:$0xff] }
 0x822   :  { %v2494_v5 = vpack.c.bf16 %v2490_v4, %v2488_v62 }
 0x824   :  { %v2864_v6 = vpop.f32.mrf.mxu1  ;;  %2698 = vmatmul.bf16.gmra.mxu0 %v2494_v5 }
 0x82c   :  { %v2866_v7 = vpop.f32.mrf.mxu1 }
 0x82d   :  { %v2874_v8 = vpack.c.bf16 %v2866_v7, %v2864_v6 }
 0x82f   :  { %2949 = vmatmul.bf16.vlgmr.msrb.gmra.mxu3 %v2874_v8 }
 0x834   :  { %v2869_v11 = vpop.f32.mrf.mxu1  ;;  %5541 = vmatmul.msk.bf16.vlgmr.msra.gmra.mxu0 %vm1405_vm2, %v6205_v10 }
 0x83c   :  { %v2871_v12 = vpop.f32.mrf.mxu1 }
 0x83d   :  { %v2875_v13 = vpack.c.bf16 %v2871_v12, %v2869_v11 }
 0x83f   :  { %2954 = vmatmul.bf16.gmra.mxu3 %v2875_v13 }
 0x844   :  { %5542 = vmatmul.msk.bf16.gmra.mxu0 %vm1405_vm2, %v6206_v14 }
 0x891   :  { %v2694_v21 = vpop.f32.mrf.mxu0  ;;  %v2627_v36 = vpop.f32.mrf.mxu3 }
 0x892   :  { %v2820_v38 = vpop.f32.mrf.mxu2  ;;  %v2695_v51 = vadd.f32 %v2694_v21, %v2627_v36  ;;  %v6225_v21 = vld [vmem:[%s7693_s16 + $0x30] sm:$0xff] }
 0x894   :  { %v2830_v57 = vadd.f32 %v2820_v38, %v2695_v51 }
 0x899   :  { %v2696_v27 = vpop.f32.mrf.mxu0  ;;  %v2629_v37 = vpop.f32.mrf.mxu3 }
 0x89a   :  { %v2822_v63 = vpop.f32.mrf.mxu2  ;;  %v2697_v49 = vadd.f32 %v2696_v27, %v2629_v37  ;;  %v6231_v27 = vld [vmem:[%s7693_s16 + $0x40] sm:$0xff] }
 0x89c   :  { %v2831_v54 = vadd.f32 %v2822_v63, %v2697_v49 }
 0x8a1   :  { %v2699_v28 = vpop.f32.mrf.mxu0  ;;  %v2632_v40 = vpop.f32.mrf.mxu3 }
 0x8a2   :  { %v2825_v23 = vpop.f32.mrf.mxu2  ;;  %v2700_v48 = vadd.f32 %v2699_v28, %v2632_v40  ;;  %v6232_v28 = vld [vmem:[%s7693_s16 + $0x48] sm:$0xff] }
 0x8a4   :  { %v2832_v52 = vadd.f32 %v2825_v23, %v2700_v48  ;;  %v6235_v48 = vld [vmem:[%s7692_s17 + $0x40] sm:$0xff] }
 0x8a9   :  { %v2701_v29 = vpop.f32.mrf.mxu0  ;;  %v2634_v26 = vpop.f32.mrf.mxu3 }
 0x8aa   :  { %v2827_v42 = vpop.f32.mrf.mxu2  ;;  %v2702_v53 = vadd.f32 %v2701_v29, %v2634_v26  ;;  %v6222_v29 = vld [vmem:[%s7692_s17 + $0x18] sm:$0xff] }
 0x8ab   :  { %3377 = vmatpush.bf16.msrb.mxu2 %v6222_v29 }
 0x8ac   :  { %v2833_v58 = vadd.f32 %v2827_v42, %v2702_v53 }
 0x8b1   :  { %v2994_v30 = vpop.f32.mrf.mxu0 }
 0x8b2   :  { %v2950_v9 = vpop.f32.mrf.mxu3 }
 0x8b3   :  { %v2960_v61 = vadd.f32 %v2950_v9, %v2830_v57 }
 0x8b9   :  { %v2996_v31 = vpop.f32.mrf.mxu0 }
 0x8ba   :  { %v3004_v32 = vpack.c.bf16 %v2996_v31, %v2994_v30  ;;  %v2952_v44 = vpop.f32.mrf.mxu3  ;;  %v6233_v30 = vld [vmem:[%s7693_s16 + $0x50] sm:$0xff] }
 0x8bb   :  { %v2961_v59 = vadd.f32 %v2952_v44, %v2831_v54  ;;  %v6221_v31 = vld [vmem:[%s7692_s17 + $0x10] sm:$0xff]  ;;  %v6248_v54 = vld [vmem:[%s7693_s16 + $0x88] sm:$0xff] }
 0x8bc   :  { %3079 = vmatmul.bf16.vlgmr.msra.gmra.mxu2 %v3004_v32  ;;  %v6220_v32 = vld [vmem:[%s7692_s17 + $0x8] sm:$0xff] }
 0x8bd   :  { %3378 = vmatpush.bf16.msrb.mxu2 %v6221_v31 }
 0x8c1   :  { %v2999_v33 = vpop.f32.mrf.mxu0  ;;  %3379 = vmatpush.bf16.msrb.mxu2 %v6220_v32  ;;  %v6256_v32 = vld [vmem:[%s7693_s16 + $0xa8] sm:$0xff] }
 0x8c2   :  { %v2955_v47 = vpop.f32.mrf.mxu3 }
 0x8c3   :  { %v2962_v55 = vadd.f32 %v2955_v47, %v2832_v52 }
 0x8c9   :  { %v3001_v34 = vpop.f32.mrf.mxu0 }
 0x8ca   :  { %v3005_v35 = vpack.c.bf16 %v3001_v34, %v2999_v33  ;;  %v2957_v56 = vpop.f32.mrf.mxu3  ;;  %v6219_v33 = vld [vmem:[%s7692_s17] sm:$0xff]  ;;  %v6234_v34 = vld [vmem:[%s7693_s16 + $0x58] sm:$0xff] }
 0x8cb   :  { %v2963_v62 = vadd.f32 %v2957_v56, %v2833_v58  ;;  %3380 = vmatpush.bf16.msrb.mxu2 %v6219_v33 }
 0x8cc   :  { %3084 = vmatmul.bf16.gmra.mxu2 %v3005_v35 }
 0x93f   :  { %v3080_v45 = vpop.f32.mrf.mxu2 }
 0x940   :  { %v3090_v3 = vadd.f32 %v3080_v45, %v2960_v61  ;;  %v6236_v45 = vld [vmem:[%s7692_s17 + $0x48] sm:$0xff]  ;;  %v6249_v61 = vld [vmem:[%s7693_s16 + $0x90] sm:$0xff] }
 0x942   :  { %v3098_v8 = vadd.f32 %v6297_v0, %v3090_v3  ;;  %v6250_v3 = vld [vmem:[%s7693_s16 + $0x98] sm:$0xff] }
 0x944   :  { %v3102_v14 = vmax.f32 %v3098_v8, 0.0  ;;  %v6263_v8 = vld [vmem:[%s7693_s16 + $0xc0] sm:$0xff] }
 0x947   :  { %v3082_v46 = vpop.f32.mrf.mxu2 }
 0x948   :  { %v3091_v1 = vadd.f32 %v3082_v46, %v2961_v59  ;;  %v6247_v46 = vld [vmem:[%s7693_s16 + $0x80] sm:$0xff] }
 0x94a   :  { %v3099_v6 = vadd.f32 %v6297_v0, %v3091_v1  ;;  %v6239_v1 = vld [vmem:[%s7693_s16 + $0x60] sm:$0xff] }
 0x94c   :  { %v3103_v12 = vmax.f32 %v3099_v6, 0.0  ;;  %v6240_v6 = vld [vmem:[%s7693_s16 + $0x68] sm:$0xff] }
 0x94e   :  { %v3106_v15 = vpack.c.bf16 %v3103_v12, %v3102_v14  ;;  %v6241_v12 = vld [vmem:[%s7693_s16 + $0x70] sm:$0xff]  ;;  %v6264_v14 = vld [vmem:[%s7693_s16 + $0xc8] sm:$0xff] }
 0x94f   :  { %v3085_v50 = vpop.f32.mrf.mxu2 }
 0x950   :  { %v3092_v60 = vadd.f32 %v3085_v50, %v2962_v55 }
 0x952   :  { %v3100_v4 = vadd.f32 %v6297_v0, %v3092_v60 }
 0x954   :  { %v3104_v10 = vmax.f32 %v3100_v4, 0.0 }
 0x957   :  { %v3087_v2 = vpop.f32.mrf.mxu2 }
 0x958   :  { %v3093_v5 = vadd.f32 %v3087_v2, %v2963_v62 }
 0x95a   :  { %v3101_v7 = vadd.f32 %v6297_v0, %v3093_v5 }
 0x95c   :  { %v3105_v11 = vmax.f32 %v3101_v7, 0.0 }
 0x95e   :  { %v3107_v13 = vpack.c.bf16 %v3105_v11, %v3104_v10 }
 0x960   :  { %3154 = vmatpush.bf16.msrb.mxu1 %v3107_v13  ;;  %3236 = vmatpush.bf16.msra.mxu3 %v3107_v13 }
 0x961   :  { %3605 = vmatpush.bf16.msra.mxu0 %v3107_v13 }
 0x964   :  { %3155 = vmatpush.bf16.msrb.mxu1 %v3106_v15  ;;  %3237 = vmatpush.bf16.msra.mxu3 %v3106_v15 }
 0x965   :  { %3606 = vmatpush.bf16.msra.mxu0 %v3106_v15 }
 0x967   :  { %5607 = vmatmul.msk.bf16.vlgmr.msrb.gmra.mxu1 %vm1017_vm1, %v6215_v16  ;;  %5635 = vmatmul.msk.bf16.vlgmr.msra.gmra.mxu3 %vm1017_vm1, %v6223_v17  ;;  %v6242_v17 = vld [vmem:[%s7693_s16 + $0x78] sm:$0xff] }
 0x968   :  { %3449 = vmatpush.bf16.msra.mxu1 %v3107_v13  ;;  %3525 = vmatpush.bf16.msrb.mxu3 %v6238_v39 }
 0x96c   :  { %3450 = vmatpush.bf16.msra.mxu1 %v3106_v15  ;;  %3526 = vmatpush.bf16.msrb.mxu3 %v6237_v22 }
 0x970   :  { %3761 = vmatpush.bf16.msrb.mxu1 %v3107_v13  ;;  %3527 = vmatpush.bf16.msrb.mxu3 %v6236_v45  ;;  %v6244_v45 = vld [vmem:[%s7692_s17 + $0x68] sm:$0xff] }
 0x974   :  { %3762 = vmatpush.bf16.msrb.mxu1 %v3106_v15  ;;  %3528 = vmatpush.bf16.msrb.mxu3 %v6235_v48 }
 0x977   :  { %5608 = vmatmul.msk.bf16.gmra.mxu1 %vm1017_vm1, %v6216_v18  ;;  %5636 = vmatmul.msk.bf16.gmra.mxu3 %vm1017_vm1, %v6224_v19  ;;  %v6265_v18 = vld [vmem:[%s7693_s16 + $0xd0] sm:$0xff]  ;;  %v6255_v19 = vld [vmem:[%s7693_s16 + $0xa0] sm:$0xff] }
 0x987   :  { %5609 = vmatmul.msk.bf16.gmra.mxu1 %vm1017_vm1, %v6217_v20  ;;  %5637 = vmatmul.msk.bf16.gmra.mxu3 %vm1017_vm1, %v6225_v21 }
 0x997   :  { %5610 = vmatmul.msk.bf16.gmra.mxu1 %vm1017_vm1, %v6218_v24  ;;  %5638 = vmatmul.msk.bf16.gmra.mxu3 %vm1017_vm1, %v6226_v25  ;;  %v6246_v25 = vld [vmem:[%s7692_s17 + $0x78] sm:$0xff] }
 0x998   :  { %3681 = vmatpush.bf16.msra.mxu2 %v6246_v25 }
 0x9a7   :  { %5711 = vmatmul.msk.bf16.vlgmr.msra.gmra.mxu1 %vm1017_vm1, %v6231_v27  ;;  %v6254_v27 = vld [vmem:[%s7692_s17 + $0x98] sm:$0xff] }
 0x9a8   :  { %4073 = vmatpush.bf16.msra.mxu1 %v3107_v13  ;;  %3837 = vmatpush.bf16.msra.mxu3 %v6254_v27 }
 0x9ac   :  { %4074 = vmatpush.bf16.msra.mxu1 %v3106_v15 }
 0x9b7   :  { %5712 = vmatmul.msk.bf16.gmra.mxu1 %vm1017_vm1, %v6232_v28  ;;  %v6266_v28 = vld [vmem:[%s7693_s16 + $0xd8] sm:$0xff] }
 0x9c7   :  { %5713 = vmatmul.msk.bf16.gmra.mxu1 %vm1017_vm1, %v6233_v30 }
 0x9d7   :  { %5714 = vmatmul.msk.bf16.gmra.mxu1 %vm1017_vm1, %v6234_v34 }
 0x9e4   :  { %v3157_v35 = vpop.f32.mrf.mxu1 }
 0x9e7   :  { %5823 = vmatmul.msk.bf16.vlgmr.msrb.gmra.mxu1 %vm1017_vm1, %v6247_v46 }
 0x9ea   :  { %v3239_v36 = vpop.f32.mrf.mxu3 }
 0x9ec   :  { %v3159_v37 = vpop.f32.mrf.mxu1 }
 0x9ed   :  { %v3177_v38 = vpack.c.bf16 %v3159_v37, %v3157_v35  ;;  %v6245_v37 = vld [vmem:[%s7692_s17 + $0x70] sm:$0xff] }
 0x9ee   :  { %3682 = vmatpush.bf16.msra.mxu2 %v6245_v37 }
 0x9ef   :  { %5683 = vmatmul.msk.bf16.vlgmr.msrb.gmra.mxu2 %vm109_vm0, %v3177_v38 }
 0x9f2   :  { %v3241_v40 = vpop.f32.mrf.mxu3  ;;  %3683 = vmatpush.bf16.msra.mxu2 %v6244_v45 }
 0x9f3   :  { %v3259_v63 = vpack.c.bf16 %v3241_v40, %v3239_v36  ;;  %v6253_v36 = vld [vmem:[%s7692_s17 + $0x90] sm:$0xff]  ;;  %v6252_v40 = vld [vmem:[%s7692_s17 + $0x88] sm:$0xff] }
 0x9f4   :  { %v3162_v26 = vpop.f32.mrf.mxu1  ;;  %3838 = vmatpush.bf16.msra.mxu3 %v6253_v36 }
 0x9f5   :  { %5663 = vmatmul.msk.bf16.vlgmr.msrb.gmra.mxu0 %vm109_vm0, %v3259_v63 }
 0x9f6   :  { %3917 = vmatpush.bf16.msrb.mxu0 %v3107_v13 }
 0x9f7   :  { %5824 = vmatmul.msk.bf16.gmra.mxu1 %vm1017_vm1, %v6248_v54 }
 0x9f8   :  { %3839 = vmatpush.bf16.msra.mxu3 %v6252_v40 }
 0x9fa   :  { %3918 = vmatpush.bf16.msrb.mxu0 %v3106_v15  ;;  %v3244_v23 = vpop.f32.mrf.mxu3 }
 0x9fc   :  { %v3164_v41 = vpop.f32.mrf.mxu1 }
 0x9fd   :  { %v3178_v9 = vpack.c.bf16 %v3164_v41, %v3162_v26  ;;  %v6251_v41 = vld [vmem:[%s7692_s17 + $0x80] sm:$0xff] }
 0x9fe   :  { %3840 = vmatpush.bf16.msra.mxu3 %v6251_v41 }
 0x9ff   :  { %5684 = vmatmul.msk.bf16.gmra.mxu2 %vm109_vm0, %v3178_v9 }
 0xa02   :  { %v3246_v42 = vpop.f32.mrf.mxu3 }
 0xa03   :  { %v3260_v43 = vpack.c.bf16 %v3246_v42, %v3244_v23  ;;  %v6257_v42 = vld [vmem:[%s7693_s16 + $0xb0] sm:$0xff] }
 0xa04   :  { %v3167_v44 = vpop.f32.mrf.mxu1 }
 0xa05   :  { %5664 = vmatmul.msk.bf16.gmra.mxu0 %vm109_vm0, %v3260_v43 }
 0xa07   :  { %5825 = vmatmul.msk.bf16.gmra.mxu1 %vm1017_vm1, %v6249_v61 }
 0xa0a   :  { %v3249_v47 = vpop.f32.mrf.mxu3 }
 0xa0c   :  { %v3169_v49 = vpop.f32.mrf.mxu1 }
 0xa0d   :  { %v3179_v50 = vpack.c.bf16 %v3169_v49, %v3167_v44 }
 0xa0f   :  { %5685 = vmatmul.msk.bf16.gmra.mxu2 %vm109_vm0, %v3179_v50 }
 0xa12   :  { %v3251_v51 = vpop.f32.mrf.mxu3 }
 0xa13   :  { %v3261_v52 = vpack.c.bf16 %v3251_v51, %v3249_v47  ;;  %v6243_v47 = vld [vmem:[%s7692_s17 + $0x60] sm:$0xff] }
 0xa14   :  { %v3172_v53 = vpop.f32.mrf.mxu1  ;;  %3684 = vmatpush.bf16.msra.mxu2 %v6243_v47 }
 0xa15   :  { %5665 = vmatmul.msk.bf16.gmra.mxu0 %vm109_vm0, %v3261_v52 }
 0xa17   :  { %5826 = vmatmul.msk.bf16.gmra.mxu1 %vm1017_vm1, %v6250_v3 }
 0xa1a   :  { %v3254_v55 = vpop.f32.mrf.mxu3 }
 0xa1c   :  { %v3174_v56 = vpop.f32.mrf.mxu1 }
 0xa1d   :  { %v3180_v57 = vpack.c.bf16 %v3174_v56, %v3172_v53  ;;  %v6258_v53 = vld [vmem:[%s7693_s16 + $0xb8] sm:$0xff] }
 0xa1f   :  { %5686 = vmatmul.msk.bf16.gmra.mxu2 %vm109_vm0, %v3180_v57 }
 0xa22   :  { %v3256_v58 = vpop.f32.mrf.mxu3 }
 0xa23   :  { %v3262_v59 = vpack.c.bf16 %v3256_v58, %v3254_v55 }
 0xa24   :  { %v3452_v60 = vpop.f32.mrf.mxu1 }
 0xa25   :  { %5666 = vmatmul.msk.bf16.gmra.mxu0 %vm109_vm0, %v3262_v59 }
 0xa27   :  { %5935 = vmatmul.msk.bf16.vlgmr.msra.gmra.mxu1 %vm1017_vm1, %v6263_v8 }
 0xa2c   :  { %v3454_v62 = vpop.f32.mrf.mxu1 }
 0xa2d   :  { %v3472_v0 = vpack.c.bf16 %v3454_v62, %v3452_v60 }
 0xa2f   :  { %5739 = vmatmul.msk.bf16.vlgmr.msrb.gmra.mxu3 %vm109_vm0, %v3472_v0 }
 0xa34   :  { %v3457_v2 = vpop.f32.mrf.mxu1 }
 0xa35   :  { %5767 = vmatmul.msk.bf16.vlgmr.msra.gmra.mxu0 %vm1017_vm1, %v6239_v1  ;;  %v6262_v1 = vld [vmem:[%s7692_s17 + $0xb8] sm:$0xff] }
 0xa36   :  { %3993 = vmatpush.bf16.msrb.mxu2 %v6262_v1 }
 0xa37   :  { %5936 = vmatmul.msk.bf16.gmra.mxu1 %vm1017_vm1, %v6264_v14  ;;  %v6261_v14 = vld [vmem:[%s7692_s17 + $0xb0] sm:$0xff] }
 0xa3a   :  { %3994 = vmatpush.bf16.msrb.mxu2 %v6261_v14 }
 0xa3c   :  { %v3459_v4 = vpop.f32.mrf.mxu1 }
 0xa3d   :  { %v3473_v5 = vpack.c.bf16 %v3459_v4, %v3457_v2  ;;  %v6270_v2 = vld [vmem:[%s7692_s17 + $0xd8] sm:$0xff] }
 0xa3e   :  { %4149 = vmatpush.bf16.msrb.mxu3 %v6270_v2 }
 0xa3f   :  { %5740 = vmatmul.msk.bf16.gmra.mxu3 %vm109_vm0, %v3473_v5 }
 0xa44   :  { %v3462_v7 = vpop.f32.mrf.mxu1 }
 0xa45   :  { %5768 = vmatmul.msk.bf16.gmra.mxu0 %vm1017_vm1, %v6240_v6 }
 0xa47   :  { %5937 = vmatmul.msk.bf16.gmra.mxu1 %vm1017_vm1, %v6265_v18 }
 0xa4c   :  { %v3464_v10 = vpop.f32.mrf.mxu1 }
 0xa4d   :  { %v3474_v11 = vpack.c.bf16 %v3464_v10, %v3462_v7 }
 0xa4f   :  { %5741 = vmatmul.msk.bf16.gmra.mxu3 %vm109_vm0, %v3474_v11 }
 0xa54   :  { %v3467_v13 = vpop.f32.mrf.mxu1 }
 0xa55   :  { %5769 = vmatmul.msk.bf16.gmra.mxu0 %vm1017_vm1, %v6241_v12 }
 0xa57   :  { %5938 = vmatmul.msk.bf16.gmra.mxu1 %vm1017_vm1, %v6266_v28 }
 0xa5c   :  { %v3469_v15 = vpop.f32.mrf.mxu1 }
 0xa5d   :  { %v3475_v16 = vpack.c.bf16 %v3469_v15, %v3467_v13  ;;  %v6269_v15 = vld [vmem:[%s7692_s17 + $0xd0] sm:$0xff] }
 0xa5e   :  { %4150 = vmatpush.bf16.msrb.mxu3 %v6269_v15 }
 0xa5f   :  { %5742 = vmatmul.msk.bf16.gmra.mxu3 %vm109_vm0, %v3475_v16 }
 0xa64   :  { %v3764_v38 = vpop.f32.mrf.mxu1 }
 0xa65   :  { %5770 = vmatmul.msk.bf16.gmra.mxu0 %vm1017_vm1, %v6242_v17  ;;  %v6268_v17 = vld [vmem:[%s7692_s17 + $0xc8] sm:$0xff] }
 0xa66   :  { %4151 = vmatpush.bf16.msrb.mxu3 %v6268_v17 }
 0xa6c   :  { %v3766_v9 = vpop.f32.mrf.mxu1 }
 0xa6d   :  { %v3784_v39 = vpack.c.bf16 %v3766_v9, %v3764_v38 }
 0xa6f   :  { %5851 = vmatmul.msk.bf16.vlgmr.msra.gmra.mxu3 %vm109_vm0, %v3784_v39 }
 0xa72   :  { %v3317_v20 = vpop.f32.mrf.mxu0  ;;  %v3382_v21 = vpop.f32.mrf.mxu2 }
 0xa73   :  { %v3383_v24 = vadd.f32 %v3382_v21, %v3317_v20 }
 0xa74   :  { %v3769_v46 = vpop.f32.mrf.mxu1 }
 0xa75   :  { %5879 = vmatmul.msk.bf16.vlgmr.msrb.gmra.mxu0 %vm1017_vm1, %v6255_v19 }
 0xa7a   :  { %v3319_v29 = vpop.f32.mrf.mxu0  ;;  %v3384_v30 = vpop.f32.mrf.mxu2 }
 0xa7b   :  { %v3385_v31 = vadd.f32 %v3384_v30, %v3319_v29  ;;  %v6260_v30 = vld [vmem:[%s7692_s17 + $0xa8] sm:$0xff] }
 0xa7c   :  { %v3771_v51 = vpop.f32.mrf.mxu1  ;;  %3995 = vmatpush.bf16.msrb.mxu2 %v6260_v30 }
 0xa7d   :  { %v3785_v52 = vpack.c.bf16 %v3771_v51, %v3769_v46 }
 0xa7f   :  { %5852 = vmatmul.msk.bf16.gmra.mxu3 %vm109_vm0, %v3785_v52 }
 0xa82   :  { %v3322_v33 = vpop.f32.mrf.mxu0  ;;  %v3387_v34 = vpop.f32.mrf.mxu2 }
 0xa83   :  { %v3388_v35 = vadd.f32 %v3387_v34, %v3322_v33  ;;  %v6259_v33 = vld [vmem:[%s7692_s17 + $0xa0] sm:$0xff] }
 0xa84   :  { %v3774_v57 = vpop.f32.mrf.mxu1  ;;  %3996 = vmatpush.bf16.msrb.mxu2 %v6259_v33 }
 0xa85   :  { %5880 = vmatmul.msk.bf16.gmra.mxu0 %vm1017_vm1, %v6256_v32 }
 0xa8a   :  { %v3324_v63 = vpop.f32.mrf.mxu0  ;;  %v3389_v26 = vpop.f32.mrf.mxu2 }
 0xa8b   :  { %v3390_v23 = vadd.f32 %v3389_v26, %v3324_v63 }
 0xa8c   :  { %v3776_v59 = vpop.f32.mrf.mxu1 }
 0xa8d   :  { %v3786_v60 = vpack.c.bf16 %v3776_v59, %v3774_v57 }
 0xa8f   :  { %5853 = vmatmul.msk.bf16.gmra.mxu3 %vm109_vm0, %v3786_v60 }
 0xa92   :  { %v3327_v43 = vpop.f32.mrf.mxu0  ;;  %v3392_v22 = vpop.f32.mrf.mxu2 }
 0xa93   :  { %v3393_v44 = vadd.f32 %v3392_v22, %v3327_v43 }
 0xa94   :  { %v3779_v3 = vpop.f32.mrf.mxu1 }
 0xa95   :  { %5881 = vmatmul.msk.bf16.gmra.mxu0 %vm1017_vm1, %v6257_v42 }
 0xa9a   :  { %v3329_v48 = vpop.f32.mrf.mxu0  ;;  %v3394_v49 = vpop.f32.mrf.mxu2 }
 0xa9b   :  { %v3395_v50 = vadd.f32 %v3394_v49, %v3329_v48 }
 0xa9c   :  { %v3781_v8 = vpop.f32.mrf.mxu1 }
 0xa9d   :  { %v3787_v10 = vpack.c.bf16 %v3781_v8, %v3779_v3 }
 0xa9f   :  { %5854 = vmatmul.msk.bf16.gmra.mxu3 %vm109_vm0, %v3787_v10 }
 0xaa2   :  { %v3332_v54 = vpop.f32.mrf.mxu0  ;;  %v3397_v55 = vpop.f32.mrf.mxu2 }
 0xaa3   :  { %v3398_v56 = vadd.f32 %v3397_v55, %v3332_v54 }
 0xaa4   :  { %v4076_v16 = vpop.f32.mrf.mxu1 }
 0xaa5   :  { %5882 = vmatmul.msk.bf16.gmra.mxu0 %vm1017_vm1, %v6258_v53 }
 0xaaa   :  { %v3334_v58 = vpop.f32.mrf.mxu0  ;;  %v3399_v9 = vpop.f32.mrf.mxu2 }
 0xaab   :  { %v3400_v39 = vadd.f32 %v3399_v9, %v3334_v58 }
 0xaac   :  { %v4078_v25 = vpop.f32.mrf.mxu1 }
 0xaad   :  { %v4096_v27 = vpack.c.bf16 %v4078_v25, %v4076_v16 }
 0xab2   :  { %v3530_v61 = vpop.f32.mrf.mxu3  ;;  %v3608_v62 = vpop.f32.mrf.mxu0 }
 0xab3   :  { %v7603_v0 = vadd.f32 %v3530_v61, %v3383_v24  ;;  %v6267_v24 = vld [vmem:[%s7692_s17 + $0xc0] sm:$0xff] }
 0xab4   :  { %4152 = vmatpush.bf16.msrb.mxu3 %v6267_v24  ;;  %v4081_v32 = vpop.f32.mrf.mxu1 }
 0xab7   :  { %5963 = vmatmul.msk.bf16.vlgmr.msrb.gmra.mxu3 %vm109_vm0, %v4096_v27 }
 0xaba   :  { %v3532_v4 = vpop.f32.mrf.mxu3  ;;  %v3610_v5 = vpop.f32.mrf.mxu0 }
 0xabb   :  { %v7611_v6 = vadd.f32 %v3532_v4, %v3385_v31  ;;  %v3628_v7 = vpack.c.bf16 %v3610_v5, %v3608_v62 }
 0xabc   :  { %v4083_v38 = vpop.f32.mrf.mxu1 }
 0xabd   :  { %5795 = vmatmul.msk.bf16.vlgmr.msra.gmra.mxu2 %vm109_vm0, %v3628_v7  ;;  %v4097_v40 = vpack.c.bf16 %v4083_v38, %v4081_v32 }
 0xac2   :  { %v3535_v11 = vpop.f32.mrf.mxu3  ;;  %v3613_v12 = vpop.f32.mrf.mxu0 }
 0xac3   :  { %v7615_v13 = vadd.f32 %v3535_v11, %v3388_v35 }
 0xac4   :  { %v4086_v41 = vpop.f32.mrf.mxu1 }
 0xac7   :  { %5964 = vmatmul.msk.bf16.gmra.mxu3 %vm109_vm0, %v4097_v40 }
 0xaca   :  { %v3537_v18 = vpop.f32.mrf.mxu3  ;;  %v3615_v19 = vpop.f32.mrf.mxu0 }
 0xacb   :  { %v7626_v20 = vadd.f32 %v3537_v18, %v3390_v23  ;;  %v3629_v21 = vpack.c.bf16 %v3615_v19, %v3613_v12 }
 0xacc   :  { %v4088_v45 = vpop.f32.mrf.mxu1 }
 0xacd   :  { %5796 = vmatmul.msk.bf16.gmra.mxu2 %vm109_vm0, %v3629_v21  ;;  %v4098_v46 = vpack.c.bf16 %v4088_v45, %v4086_v41 }
 0xad2   :  { %v3540_v28 = vpop.f32.mrf.mxu3  ;;  %v3618_v29 = vpop.f32.mrf.mxu0 }
 0xad3   :  { %v7636_v31 = vadd.f32 %v3540_v28, %v3393_v44 }
 0xad4   :  { %v4091_v48 = vpop.f32.mrf.mxu1 }
 0xad7   :  { %5965 = vmatmul.msk.bf16.gmra.mxu3 %vm109_vm0, %v4098_v46 }
 0xada   :  { %v3542_v34 = vpop.f32.mrf.mxu3  ;;  %v3620_v35 = vpop.f32.mrf.mxu0 }
 0xadb   :  { %v7641_v36 = vadd.f32 %v3542_v34, %v3395_v50  ;;  %v3630_v37 = vpack.c.bf16 %v3620_v35, %v3618_v29 }
 0xadc   :  { %v4093_v51 = vpop.f32.mrf.mxu1 }
 0xadd   :  { %5797 = vmatmul.msk.bf16.gmra.mxu2 %vm109_vm0, %v3630_v37  ;;  %v4099_v52 = vpack.c.bf16 %v4093_v51, %v4091_v48 }
 0xae2   :  { %v3545_v63 = vpop.f32.mrf.mxu3  ;;  %v3623_v26 = vpop.f32.mrf.mxu0 }
 0xae3   :  { %v3556_v23 = vadd.f32 %v3545_v63, %v3398_v56 }
 0xae7   :  { %5966 = vmatmul.msk.bf16.gmra.mxu3 %vm109_vm0, %v4099_v52 }
 0xaea   :  { %v3547_v42 = vpop.f32.mrf.mxu3  ;;  %v3625_v43 = vpop.f32.mrf.mxu0 }
 0xaeb   :  { %v7645_v22 = vadd.f32 %v3547_v42, %v3400_v39  ;;  %v3631_v44 = vpack.c.bf16 %v3625_v43, %v3623_v26 }
 0xaed   :  { %5798 = vmatmul.msk.bf16.gmra.mxu2 %vm109_vm0, %v3631_v44 }
 0xaf2   :  { %v3920_v47 = vpop.f32.mrf.mxu0  ;;  %v3842_v60 = vpop.f32.mrf.mxu3 }
 0xafa   :  { %v3922_v49 = vpop.f32.mrf.mxu0  ;;  %v3844_v1 = vpop.f32.mrf.mxu3 }
 0xafb   :  { %v3940_v50 = vpack.c.bf16 %v3922_v49, %v3920_v47 }
 0xafd   :  { %5907 = vmatmul.msk.bf16.vlgmr.msrb.gmra.mxu2 %vm109_vm0, %v3940_v50 }
 0xb02   :  { %v3925_v53 = vpop.f32.mrf.mxu0  ;;  %v3847_v2 = vpop.f32.mrf.mxu3 }
 0xb0a   :  { %v3927_v54 = vpop.f32.mrf.mxu0  ;;  %v3849_v5 = vpop.f32.mrf.mxu3 }
 0xb0b   :  { %v3941_v55 = vpack.c.bf16 %v3927_v54, %v3925_v53 }
 0xb0d   :  { %5908 = vmatmul.msk.bf16.gmra.mxu2 %vm109_vm0, %v3941_v55 }
 0xb12   :  { %v3930_v56 = vpop.f32.mrf.mxu0  ;;  %v3852_v10 = vpop.f32.mrf.mxu3 }
 0xb1a   :  { %v3932_v57 = vpop.f32.mrf.mxu0  ;;  %v3854_v15 = vpop.f32.mrf.mxu3 }
 0xb1b   :  { %v3942_v58 = vpack.c.bf16 %v3932_v57, %v3930_v56 }
 0xb1d   :  { %5909 = vmatmul.msk.bf16.gmra.mxu2 %vm109_vm0, %v3942_v58 }
 0xb22   :  { %v3935_v59 = vpop.f32.mrf.mxu0  ;;  %v3857_v18 = vpop.f32.mrf.mxu3 }
 0xb2a   :  { %v3937_v61 = vpop.f32.mrf.mxu0  ;;  %v3859_v25 = vpop.f32.mrf.mxu3 }
 0xb2b   :  { %v3943_v62 = vpack.c.bf16 %v3937_v61, %v3935_v59 }
 0xb2d   :  { %5910 = vmatmul.msk.bf16.gmra.mxu2 %vm109_vm0, %v3943_v62 }
 0xb3a   :  { %v4154_v29 = vpop.f32.mrf.mxu3 }
 0xb40   :  { %v3686_v3 = vpop.f32.mrf.mxu2 }
 0xb41   :  { %v3706_v4 = vadd.f32 %v3686_v3, %v7603_v0 }
 0xb42   :  { %v4156_v32 = vpop.f32.mrf.mxu3 }
 0xb43   :  { %v3862_v7 = vadd.f32 %v3842_v60, %v3706_v4 }
 0xb48   :  { %v3688_v8 = vpop.f32.mrf.mxu2 }
 0xb49   :  { %v3707_v34 = vadd.f32 %v3688_v8, %v7611_v6 }
 0xb4a   :  { %v4159_v38 = vpop.f32.mrf.mxu3 }
 0xb4b   :  { %v3863_v35 = vadd.f32 %v3844_v1, %v3707_v34 }
 0xb50   :  { %v3691_v11 = vpop.f32.mrf.mxu2 }
 0xb51   :  { %v3708_v12 = vadd.f32 %v3691_v11, %v7615_v13 }
 0xb52   :  { %v4161_v6 = vpop.f32.mrf.mxu3 }
 0xb53   :  { %v3864_v14 = vadd.f32 %v3847_v2, %v3708_v12 }
 0xb58   :  { %v3693_v16 = vpop.f32.mrf.mxu2 }
 0xb59   :  { %v3709_v42 = vadd.f32 %v3693_v16, %v7626_v20 }
 0xb5a   :  { %v4164_v49 = vpop.f32.mrf.mxu3 }
 0xb5b   :  { %v3865_v44 = vadd.f32 %v3849_v5, %v3709_v42 }
 0xb60   :  { %v3696_v17 = vpop.f32.mrf.mxu2 }
 0xb61   :  { %v3710_v19 = vadd.f32 %v3696_v17, %v7636_v31  ;;  %v6298_v31 = vld [vmem:[%s7694_s18] ss:$0 sm:$0xff] }
 0xb62   :  { %v4166_v56 = vpop.f32.mrf.mxu3 }
 0xb63   :  { %v3866_v21 = vadd.f32 %v3852_v10, %v3710_v19 }
 0xb68   :  { %v3698_v24 = vpop.f32.mrf.mxu2 }
 0xb69   :  { %v3711_v54 = vadd.f32 %v3698_v24, %v7641_v36 }
 0xb6a   :  { %v4169_v3 = vpop.f32.mrf.mxu3 }
 0xb6b   :  { %v3867_v20 = vadd.f32 %v3854_v15, %v3711_v54 }
 0xb70   :  { %v3701_v27 = vpop.f32.mrf.mxu2 }
 0xb71   :  { %v3712_v28 = vadd.f32 %v3701_v27, %v3556_v23 }
 0xb72   :  { %v4171_v11 = vpop.f32.mrf.mxu3 }
 0xb73   :  { %v3868_v0 = vadd.f32 %v3857_v18, %v3712_v28 }
 0xb78   :  { %v3703_v30 = vpop.f32.mrf.mxu2 }
 0xb79   :  { %v3713_v4 = vadd.f32 %v3703_v30, %v7645_v22 }
 0xb7b   :  { %v3869_v36 = vadd.f32 %v3859_v25, %v3713_v4 }
 0xb80   :  { %v3998_v33 = vpop.f32.mrf.mxu2 }
 0xb81   :  { %v4018_v13 = vadd.f32 %v3998_v33, %v3862_v7 }
 0xb83   :  { %v4174_v40 = vadd.f32 %v4154_v29, %v4018_v13 }
 0xb85   :  { %v4186_v41 = vadd.f32 %v6298_v31, %v4174_v40 }
 0xb88   :  { %v4000_v37 = vpop.f32.mrf.mxu2 }
 0xb89   :  { %v4019_v63 = vadd.f32 %v4000_v37, %v3863_v35 }
 0xb8b   :  { %v4175_v26 = vadd.f32 %v4156_v32, %v4019_v63 }
 0xb8d   :  { %v4187_v23 = vadd.f32 %v6298_v31, %v4175_v26 }
 0xb8f   :  { %v6274_v9 = vpack.c.bf16 %v4187_v23, %v4186_v41 }
 0xb90   :  { %v4003_v39 = vpop.f32.mrf.mxu2 }
 0xb91   :  { %6275 = vst [vmem:[%s7695_s19] sm:$0xff] %v6274_v9   ;;  %v4020_v43 = vadd.f32 %v4003_v39, %v3864_v14 }
 0xb93   :  { %v4176_v46 = vadd.f32 %v4159_v38, %v4020_v43 }
 0xb95   :  { %v4188_v50 = vadd.f32 %v6298_v31, %v4176_v46 }
 0xb98   :  { %v4005_v45 = vpop.f32.mrf.mxu2 }
 0xb99   :  { %v4021_v47 = vadd.f32 %v4005_v45, %v3865_v44 }
 0xb9b   :  { %v4177_v48 = vadd.f32 %v4161_v6, %v4021_v47 }
 0xb9d   :  { %v4189_v51 = vadd.f32 %v6298_v31, %v4177_v48 }
 0xb9f   :  { %v6279_v52 = vpack.c.bf16 %v4189_v51, %v4188_v50 }
 0xba0   :  { %v4008_v53 = vpop.f32.mrf.mxu2 }
 0xba1   :  { %6291 = vst [vmem:[%s7695_s19 + $0x8] sm:$0xff] %v6279_v52   ;;  %v4022_v55 = vadd.f32 %v4008_v53, %v3866_v21 }
 0xba3   :  { %v4178_v58 = vadd.f32 %v4164_v49, %v4022_v55 }
 0xba5   :  { %v4190_v61 = vadd.f32 %v6298_v31, %v4178_v58 }
 0xba8   :  { %v4010_v57 = vpop.f32.mrf.mxu2 }
 0xba9   :  { %v4023_v59 = vadd.f32 %v4010_v57, %v3867_v20 }
 0xbab   :  { %v4179_v60 = vadd.f32 %v4166_v56, %v4023_v59 }
 0xbad   :  { %v4191_v62 = vadd.f32 %v6298_v31, %v4179_v60 }
 0xbaf   :  { %v6284_v1 = vpack.c.bf16 %v4191_v62, %v4190_v61 }
 0xbb0   :  { %v4013_v2 = vpop.f32.mrf.mxu2 }
 0xbb1   :  { %6292 = vst [vmem:[%s7695_s19 + $0x10] sm:$0xff] %v6284_v1   ;;  %v4024_v5 = vadd.f32 %v4013_v2, %v3868_v0 }
 0xbb3   :  { %v4180_v8 = vadd.f32 %v4169_v3, %v4024_v5 }
 0xbb5   :  { %v4192_v14 = vadd.f32 %v6298_v31, %v4180_v8 }
 0xbb8   :  { %v4015_v7 = vpop.f32.mrf.mxu2 }
 0xbb9   :  { %v4025_v10 = vadd.f32 %v4015_v7, %v3869_v36 }
 0xbbb   :  { %v4181_v12 = vadd.f32 %v4171_v11, %v4025_v10 }
 0xbbd   :  { %v4193_v15 = vadd.f32 %v6298_v31, %v4181_v12 }
 0xbbf   :  { %v6289_v16 = vpack.c.bf16 %v4193_v15, %v4192_v14 }
 0xbc1   :  { %6293 = vst [vmem:[%s7695_s19 + $0x18] sm:$0xff] %v6289_v16  }

</bundles_post_ra>
